<compile_context>
chip_gen: v5e
topology: v5e:2x2
jax: 0.10.0
libtpu: 0.0.40
codegen_flags: <defaults>
</compile_context>

<pallas_src>
import functools

import jax
import jax.numpy as jnp
from jax import lax
from jax.experimental import pallas as pl
from jax.experimental.pallas import tpu as pltpu


# --------------------------------------------------------------------------
# VMEM budget helpers (generation aware, safe fallback when not on TPU).
# --------------------------------------------------------------------------
@functools.lru_cache(maxsize=1)
def _vmem_capacity_bytes():
    try:
        info = pltpu.get_tpu_info()
        cap = int(getattr(info, "vmem_capacity_bytes", 0))
        if cap > 0:
            return cap
    except Exception:
        pass
    return 64 * 1024 * 1024          # conservative (v7x-sized VMEM)


def _vmem_limit_bytes():
    return int(0.85 * _vmem_capacity_bytes())


# --------------------------------------------------------------------------
# Kernel 1: fused f_update(s) + f_update(t) + L2 normalization + similarity
#           on zero-padded operands  ->  log_alpha_pad [Np, Np]
# --------------------------------------------------------------------------
def _embed_sim_kernel(x_s_ref, adj_s_ref, imp_s_ref, x_t_ref, adj_t_ref, imp_t_ref,
                      w1_ref, w2_ref, out_ref):
    w1 = w1_ref[...].astype(jnp.bfloat16)
    w2 = w2_ref[...].astype(jnp.bfloat16)

    def gnn(x, adj, imp, scale):
        z = x * imp                                                   # [Np, F] f32
        zb = z.astype(jnp.bfloat16)
        m = jnp.dot(adj.astype(jnp.bfloat16), zb,
                    preferred_element_type=jnp.float32)               # neighbor agg
        h = jnp.maximum(
            jnp.dot((z + m).astype(jnp.bfloat16), w1,
                    preferred_element_type=jnp.float32), 0.0)
        h2 = jnp.dot(h.astype(jnp.bfloat16), w2,
                     preferred_element_type=jnp.float32)              # [Np, H]
        # L2 row normalization; the 50x logit scale folded into the [Np,1] rsqrt
        # instead of a full [Np,Np] multiply on the output.
        inv = lax.rsqrt(jnp.sum(h2 * h2, axis=-1, keepdims=True) + 1e-12) * scale
        return (h2 * inv).astype(jnp.bfloat16)

    h_s = gnn(x_s_ref[...], adj_s_ref[...], imp_s_ref[...], 50.0)
    h_t = gnn(x_t_ref[...], adj_t_ref[...], imp_t_ref[...], 1.0)
    # Padded rows are exactly zero -> h_s @ h_t^T already carries F.pad's zeros;
    # single full-tile store, no transpose materialized.
    out_ref[...] = lax.dot_general(
        h_s, h_t, (((1,), (1,)), ((), ())),
        preferred_element_type=jnp.float32)


def embed_and_similarity(x_s_pad, adj_s_pad, imp_s, x_t_pad, adj_t_pad, imp_t,
                         w1, w2):
    np_ = x_s_pad.shape[0]
    # TODO(synk): for very large Np (v7x 64 MiB VMEM / 2 TensorCores) tile this over
    # output row blocks with a grid; at typical SIGMA sizes it fits comfortably.
    return pl.pallas_call(
        _embed_sim_kernel,
        out_shape=jax.ShapeDtypeStruct((np_, np_), jnp.float32),
        in_specs=[pl.BlockSpec(memory_space=pltpu.MemorySpace.VMEM)] * 8,
        out_specs=pl.BlockSpec(memory_space=pltpu.MemorySpace.VMEM),
        compiler_params=pltpu.CompilerParams(vmem_limit_bytes=_vmem_limit_bytes()),
    )(x_s_pad, adj_s_pad, imp_s, x_t_pad, adj_t_pad, imp_t, w1, w2)


# --------------------------------------------------------------------------
# Kernel 2: Gumbel-Sinkhorn (on-chip stateless-hash noise) + fused reductions:
#   per-block masked row/col sums of theta (for theta_previous) and the
#   edge-consistency "matched" count; theta never leaves VMEM.
# --------------------------------------------------------------------------
def _mix32(x):
    """lowbias32-style integer hash; int32 wrapping arithmetic, logical shifts."""
    def srl(v, k):
        return jnp.bitwise_and(jnp.right_shift(v, k),
                               jnp.int32((1 << (32 - k)) - 1))
    x = x ^ srl(x, 16)
    x = x * jnp.int32(0x7FEB352D)
    x = x ^ srl(x, 15)
    x = x * jnp.int32(-2073450869)          # 0x846CA68B as int32
    x = x ^ srl(x, 16)
    return x


def _sinkhorn_stats_kernel(seed_ref, la_ref, adj_s_ref, adj_t_ref,
                           rowsum_ref, colsum_ref, matched_ref,
                           *, tau, n_iter, s_blk, n_s, n_t):
    np_ = la_ref.shape[-1]
    inv_tau = jnp.float32(1.0 / tau)

    row_i = lax.broadcasted_iota(jnp.int32, (np_, np_), 0)
    col_i = lax.broadcasted_iota(jnp.int32, (np_, np_), 1)
    idx = row_i * jnp.int32(np_) + col_i

    seed0 = seed_ref[0]
    block = pl.program_id(0)
    la0 = la_ref[...]

    # On-chip Gumbel noise, one sample at a time (no [s_blk,Np,Np] noise temporaries
    # beyond la itself; works both compiled on TPU and in interpret mode).
    parts = []
    for s in range(s_blk):
        salt = _mix32(seed0 + (block * jnp.int32(s_blk) + jnp.int32(s))
                      * jnp.int32(0x01000193))
        bits = _mix32(idx ^ salt)
        mant = jnp.bitwise_and(bits, jnp.int32(0x7FFFFF)).astype(jnp.float32)
        u = (mant + 0.5) * jnp.float32(1.0 / 8388608.0)        # uniform in (0, 1)
        g = -jnp.log(-jnp.log(u))                              # Gumbel(0, 1)
        parts.append(((la0 + g) * inv_tau)[None])
    la = parts[0] if s_blk == 1 else jnp.concatenate(parts, axis=0)  # [s_blk,Np,Np]

    def lse(x, axis):
        mx = jnp.max(x, axis=axis, keepdims=True)
        return mx + jnp.log(jnp.sum(jnp.exp(x - mx), axis=axis, keepdims=True))

    if n_iter >= 1:
        def body(_, a):
            a = a - lse(a, 2)       # row normalization (last dim)
            a = a - lse(a, 1)       # column normalization
            return a
        if n_iter > 1:
            la = lax.fori_loop(0, n_iter - 1, body, la, unroll=(n_iter <= 12))
        # Last iteration: final exp fused into the column normalization.
        la = la - lse(la, 2)
        mx = jnp.max(la, axis=1, keepdims=True)
        p = jnp.exp(la - mx)
        theta = p / jnp.sum(p, axis=1, keepdims=True)          # == exp(la - lse(la,1))
    else:
        theta = jnp.exp(la)

    # ---- fused reductions for theta_previous (only vectors leave VMEM) ------
    mask = jnp.where((row_i < n_s) & (col_i < n_t),
                     jnp.float32(1.0), jnp.float32(0.0))
    t_sum = jnp.sum(theta, axis=0) * mask                      # [Np, Np]
    rowsum_ref[...] = jnp.sum(t_sum, axis=1, keepdims=True)[None]   # [1, Np, 1]
    colsum_ref[...] = jnp.sum(t_sum, axis=0, keepdims=True)[None]   # [1, 1, Np]

    # ---- fused reward: matched = sum_s sum( (A_s T_s) * (T_s A_t) ) ---------
    #      (identity for sum(A_s * (T A_t T^T)); no transposes needed)
    a_s = adj_s_ref[...].astype(jnp.bfloat16)
    a_t = adj_t_ref[...].astype(jnp.bfloat16)
    th_b = theta.astype(jnp.bfloat16)
    pa = jnp.dot(th_b.reshape(s_blk * np_, np_), a_t,           # collapsed matmul
                 preferred_element_type=jnp.float32).reshape(s_blk, np_, np_)
    matched = jnp.float32(0.0)
    for s in range(s_blk):
        asth = jnp.dot(a_s, th_b[s], preferred_element_type=jnp.float32)
        matched = matched + jnp.sum(asth * pa[s])
    matched_ref[...] = jnp.broadcast_to(matched, (1, 1, np_))


def gumbel_sinkhorn_stats(log_alpha_pad, adj_s_pad, adj_t_pad, seed_arr, *,
                          tau, n_sink_iter, n_samples, s_blk, n_s, n_t):
    np_ = log_alpha_pad.shape[-1]
    n_blocks = n_samples // s_blk
    kern = functools.partial(
        _sinkhorn_stats_kernel, tau=float(tau), n_iter=int(n_sink_iter),
        s_blk=int(s_blk), n_s=int(n_s), n_t=int(n_t))
    rowsum, colsum, matched = pl.pallas_call(
        kern,
        out_shape=(
            jax.ShapeDtypeStruct((n_blocks, np_, 1), jnp.float32),
            jax.ShapeDtypeStruct((n_blocks, 1, np_), jnp.float32),
            jax.ShapeDtypeStruct((n_blocks, 1, np_), jnp.float32),
        ),
        grid_spec=pltpu.PrefetchScalarGridSpec(
            num_scalar_prefetch=1,
            grid=(n_blocks,),
            in_specs=[
                pl.BlockSpec((np_, np_), lambda i, seed: (0, 0)),
                pl.BlockSpec((np_, np_), lambda i, seed: (0, 0)),
                pl.BlockSpec((np_, np_), lambda i, seed: (0, 0)),
            ],
            out_specs=[
                pl.BlockSpec((1, np_, 1), lambda i, seed: (i, 0, 0)),
                pl.BlockSpec((1, 1, np_), lambda i, seed: (i, 0, 0)),
                pl.BlockSpec((1, 1, np_), lambda i, seed: (i, 0, 0)),
            ],
        ),
        compiler_params=pltpu.CompilerParams(
            dimension_semantics=("parallel",),
            vmem_limit_bytes=_vmem_limit_bytes()),
    )(seed_arr, log_alpha_pad, adj_s_pad, adj_t_pad)
    return rowsum, colsum, matched


def _pick_sample_block(n_samples, np_, max_blk=16):
    """Largest divisor of n_samples that fits the VMEM budget and leaves >=2 grid
    blocks (so v7x's second TensorCore gets work)."""
    budget = int(0.6 * _vmem_capacity_bytes())
    per_sample = 10 * np_ * np_ * 4        # la / theta / noise / exp / pa temporaries
    fixed = 8 * np_ * np_ * 4              # double-buffered [Np, Np] inputs etc.
    vmem_cap = max(1, (budget - fixed) // per_sample)
    cap = min(max_blk, vmem_cap, n_samples)
    if n_samples >= 2:
        cap = min(cap, max(1, n_samples // 2))
    cap = max(1, cap)
    divs = [d for d in range(1, n_samples + 1) if n_samples % d == 0 and d <= cap]
    return max(divs) if divs else 1


# --------------------------------------------------------------------------
# SIGMA forward (train=False): entire T loop on device, no host syncs.
# --------------------------------------------------------------------------
@functools.partial(
    jax.jit,
    static_argnames=("tau", "n_sink_iter", "n_samples", "T",
                     "miss_match_value", "s_blk"))
def sigma_forward(x_s, adj_s, x_t, adj_t, w1, w2, seed, *, tau, n_sink_iter,
                  n_samples, T, miss_match_value, s_blk):
    n_s = x_s.shape[0]
    n_t = x_t.shape[0]
    np_ = n_s + n_t
    mm = miss_match_value

    # Zero-pad features / adjacencies once (padded rows -> zero embeddings).
    x_s_pad = jnp.pad(x_s, ((0, n_t), (0, 0)))
    x_t_pad = jnp.pad(x_t, ((0, n_s), (0, 0)))
    adj_s_pad = jnp.pad(adj_s, ((0, n_t), (0, n_t)))
    adj_t_pad = jnp.pad(adj_t, ((0, n_s), (0, n_s)))

    n_edges_s = jnp.sum(adj_s)
    n_edges_t = jnp.sum(adj_t)

    def step(t, carry):
        best_reward, best_logits, imp_s, imp_t = carry

        log_alpha_pad = embed_and_similarity(
            x_s_pad, adj_s_pad, imp_s, x_t_pad, adj_t_pad, imp_t, w1, w2)

        seed_arr = jnp.reshape(seed + t * jnp.int32(1000003), (1,)).astype(jnp.int32)
        rowsum_b, colsum_b, matched_b = gumbel_sinkhorn_stats(
            log_alpha_pad, adj_s_pad, adj_t_pad, seed_arr,
            tau=tau, n_sink_iter=n_sink_iter, n_samples=n_samples,
            s_blk=s_blk, n_s=n_s, n_t=n_t)

        # reward_general: mean_s[ matched + mm*((E_s - matched) + (E_t - matched)) ]
        mean_matched = jnp.sum(matched_b[:, 0, 0]) / n_samples
        r = mean_matched * (1.0 - 2.0 * mm) + mm * (n_edges_s + n_edges_t)

        # theta_previous = mean_s theta[:, :n_s, :n_t]; only its row / column sums
        # are ever used, and those come straight from the kernel (zero beyond n_s/n_t).
        imp_s_new = (jnp.sum(rowsum_b[:, :, 0], axis=0) / n_samples)[:, None]
        imp_t_new = (jnp.sum(colsum_b[:, 0, :], axis=0) / n_samples)[:, None]

        improved = r > best_reward
        best_reward = jnp.where(improved, r, best_reward)
        best_logits = jnp.where(improved, log_alpha_pad, best_logits)
        imp_s = jnp.where(improved, imp_s_new, imp_s)
        imp_t = jnp.where(improved, imp_t_new, imp_t)
        # TODO(synk): training loss / loss_count accumulation (autograd) not implemented.
        return best_reward, best_logits, imp_s, imp_t

    init = (jnp.array(-jnp.inf, jnp.float32),
            jnp.zeros((np_, np_), jnp.float32),
            jnp.ones((np_, 1), jnp.float32),
            jnp.ones((np_, 1), jnp.float32))
    _, best_logits, _, _ = lax.fori_loop(0, T, step, init)
    return best_logits[:n_s, :n_t]


def edge_index_to_dense(edge_index, n):
    a = jnp.zeros((n, n), jnp.float32)
    return a.at[edge_index[0], edge_index[1]].set(1.0)


if __name__ == "__main__":
    key = jax.random.PRNGKey(0)

    # Small shapes consistent with the module's forward.
    n_s, n_t = 16, 16          # nodes in source / target graph
    f_dim, h_dim = 32, 32      # input feature dim / GNN hidden dim
    n_edges = 40

    # SIGMA hyper-parameters.
    tau = 1.0
    n_sink_iter = 8
    n_samples = 4
    T = 3
    miss_match_value = -1.0

    k1, k2, k3, k4, k5, k6 = jax.random.split(key, 6)
    x_s = jax.random.normal(k1, (n_s, f_dim), jnp.float32)
    x_t = jax.random.normal(k2, (n_t, f_dim), jnp.float32)
    adj_s = edge_index_to_dense(jax.random.randint(k3, (2, n_edges), 0, n_s), n_s)
    adj_t = edge_index_to_dense(jax.random.randint(k4, (2, n_edges), 0, n_t), n_t)

    # Deterministic f_update weights (shared between source and target graphs).
    w1 = jax.random.normal(k5, (f_dim, h_dim), jnp.float32) / jnp.sqrt(float(f_dim))
    w2 = jax.random.normal(k6, (h_dim, h_dim), jnp.float32) / jnp.sqrt(float(h_dim))

    s_blk = _pick_sample_block(n_samples, n_s + n_t)

    best_logits = sigma_forward(
        x_s, adj_s, x_t, adj_t, w1, w2, jnp.int32(12345),
        tau=tau, n_sink_iter=n_sink_iter, n_samples=n_samples, T=T,
        miss_match_value=miss_match_value, s_blk=s_blk)

    jax.block_until_ready(best_logits)
    assert best_logits.shape == (n_s, n_t)
    assert bool(jnp.all(jnp.isfinite(best_logits)))
    print("KERNEL_OK")
</pallas_src>

<mosaic_0001>
module attributes {stable_mosaic.version = 11 : i64} {
  func.func @_embed_sim_kernel(%arg0: memref<32x32xf32, #tpu.memory_space<vmem>>, %arg1: memref<32x32xf32, #tpu.memory_space<vmem>>, %arg2: memref<32x1xf32, #tpu.memory_space<vmem>>, %arg3: memref<32x32xf32, #tpu.memory_space<vmem>>, %arg4: memref<32x32xf32, #tpu.memory_space<vmem>>, %arg5: memref<32x1xf32, #tpu.memory_space<vmem>>, %arg6: memref<32x32xf32, #tpu.memory_space<vmem>>, %arg7: memref<32x32xf32, #tpu.memory_space<vmem>>, %arg8: memref<32x32xf32, #tpu.memory_space<vmem>>) attributes {dimension_semantics = [], scalar_prefetch = 0 : i64, scratch_operands = 0 : i64, tpu.core_type = #tpu.core_type<tc>} {
    %c0 = arith.constant 0 : index
    %c0_0 = arith.constant 0 : index
    %0 = vector.load %arg6[%c0, %c0_0] : memref<32x32xf32, #tpu.memory_space<vmem>>, vector<32x32xf32>
    %1 = arith.truncf %0 : vector<32x32xf32> to vector<32x32xbf16>
    %c0_1 = arith.constant 0 : index
    %c0_2 = arith.constant 0 : index
    %2 = vector.load %arg7[%c0_1, %c0_2] : memref<32x32xf32, #tpu.memory_space<vmem>>, vector<32x32xf32>
    %3 = arith.truncf %2 : vector<32x32xf32> to vector<32x32xbf16>
    %c0_3 = arith.constant 0 : index
    %c0_4 = arith.constant 0 : index
    %4 = vector.load %arg0[%c0_3, %c0_4] : memref<32x32xf32, #tpu.memory_space<vmem>>, vector<32x32xf32>
    %c0_5 = arith.constant 0 : index
    %c0_6 = arith.constant 0 : index
    %5 = vector.load %arg1[%c0_5, %c0_6] : memref<32x32xf32, #tpu.memory_space<vmem>>, vector<32x32xf32>
    %c0_7 = arith.constant 0 : index
    %c0_8 = arith.constant 0 : index
    %6 = vector.load %arg2[%c0_7, %c0_8] : memref<32x1xf32, #tpu.memory_space<vmem>>, vector<32x1xf32>
    %7 = vector.broadcast %6 : vector<32x1xf32> to vector<32x32xf32>
    %8 = arith.mulf %4, %7 : vector<32x32xf32>
    %9 = arith.truncf %8 : vector<32x32xf32> to vector<32x32xbf16>
    %10 = arith.truncf %5 : vector<32x32xf32> to vector<32x32xbf16>
    %cst = arith.constant dense<0.000000e+00> : vector<32x32xf32>
    %11 = tpu.matmul %10, %9, %cst {dimension_numbers = #tpu.dot_dimension_numbers<[1], [0], [0], [1], [0, 0, 1, 1], [], []>} : vector<32x32xbf16>, vector<32x32xbf16>, vector<32x32xf32> -> vector<32x32xf32>
    %12 = arith.addf %8, %11 : vector<32x32xf32>
    %13 = arith.truncf %12 : vector<32x32xf32> to vector<32x32xbf16>
    %cst_9 = arith.constant dense<0.000000e+00> : vector<32x32xf32>
    %14 = tpu.matmul %13, %1, %cst_9 {dimension_numbers = #tpu.dot_dimension_numbers<[1], [0], [0], [1], [0, 0, 1, 1], [], []>} : vector<32x32xbf16>, vector<32x32xbf16>, vector<32x32xf32> -> vector<32x32xf32>
    %cst_10 = arith.constant 0.000000e+00 : f32
    %15 = vector.broadcast %cst_10 : f32 to vector<32x32xf32>
    %16 = arith.maximumf %14, %15 : vector<32x32xf32>
    %17 = arith.truncf %16 : vector<32x32xf32> to vector<32x32xbf16>
    %cst_11 = arith.constant dense<0.000000e+00> : vector<32x32xf32>
    %18 = tpu.matmul %17, %3, %cst_11 {dimension_numbers = #tpu.dot_dimension_numbers<[1], [0], [0], [1], [0, 0, 1, 1], [], []>} : vector<32x32xbf16>, vector<32x32xbf16>, vector<32x32xf32> -> vector<32x32xf32>
    %19 = arith.mulf %18, %18 : vector<32x32xf32>
    %cst_12 = arith.constant dense<0.000000e+00> : vector<32xf32>
    %20 = vector.multi_reduction <add>, %19, %cst_12 [1] : vector<32x32xf32> to vector<32xf32>
    %21 = vector.shape_cast %20 : vector<32xf32> to vector<32x1xf32>
    %cst_13 = arith.constant 9.99999996E-13 : f32
    %22 = vector.broadcast %cst_13 : f32 to vector<32x1xf32>
    %23 = arith.addf %21, %22 : vector<32x1xf32>
    %24 = math.rsqrt %23 : vector<32x1xf32>
    %cst_14 = arith.constant 5.000000e+01 : f32
    %25 = vector.broadcast %cst_14 : f32 to vector<32x1xf32>
    %26 = arith.mulf %24, %25 : vector<32x1xf32>
    %27 = vector.broadcast %26 : vector<32x1xf32> to vector<32x32xf32>
    %28 = arith.mulf %18, %27 : vector<32x32xf32>
    %29 = arith.truncf %28 : vector<32x32xf32> to vector<32x32xbf16>
    %c0_15 = arith.constant 0 : index
    %c0_16 = arith.constant 0 : index
    %30 = vector.load %arg3[%c0_15, %c0_16] : memref<32x32xf32, #tpu.memory_space<vmem>>, vector<32x32xf32>
    %c0_17 = arith.constant 0 : index
    %c0_18 = arith.constant 0 : index
    %31 = vector.load %arg4[%c0_17, %c0_18] : memref<32x32xf32, #tpu.memory_space<vmem>>, vector<32x32xf32>
    %c0_19 = arith.constant 0 : index
    %c0_20 = arith.constant 0 : index
    %32 = vector.load %arg5[%c0_19, %c0_20] : memref<32x1xf32, #tpu.memory_space<vmem>>, vector<32x1xf32>
    %33 = vector.broadcast %32 : vector<32x1xf32> to vector<32x32xf32>
    %34 = arith.mulf %30, %33 : vector<32x32xf32>
    %35 = arith.truncf %34 : vector<32x32xf32> to vector<32x32xbf16>
    %36 = arith.truncf %31 : vector<32x32xf32> to vector<32x32xbf16>
    %cst_21 = arith.constant dense<0.000000e+00> : vector<32x32xf32>
    %37 = tpu.matmul %36, %35, %cst_21 {dimension_numbers = #tpu.dot_dimension_numbers<[1], [0], [0], [1], [0, 0, 1, 1], [], []>} : vector<32x32xbf16>, vector<32x32xbf16>, vector<32x32xf32> -> vector<32x32xf32>
    %38 = arith.addf %34, %37 : vector<32x32xf32>
    %39 = arith.truncf %38 : vector<32x32xf32> to vector<32x32xbf16>
    %cst_22 = arith.constant dense<0.000000e+00> : vector<32x32xf32>
    %40 = tpu.matmul %39, %1, %cst_22 {dimension_numbers = #tpu.dot_dimension_numbers<[1], [0], [0], [1], [0, 0, 1, 1], [], []>} : vector<32x32xbf16>, vector<32x32xbf16>, vector<32x32xf32> -> vector<32x32xf32>
    %cst_23 = arith.constant 0.000000e+00 : f32
    %41 = vector.broadcast %cst_23 : f32 to vector<32x32xf32>
    %42 = arith.maximumf %40, %41 : vector<32x32xf32>
    %43 = arith.truncf %42 : vector<32x32xf32> to vector<32x32xbf16>
    %cst_24 = arith.constant dense<0.000000e+00> : vector<32x32xf32>
    %44 = tpu.matmul %43, %3, %cst_24 {dimension_numbers = #tpu.dot_dimension_numbers<[1], [0], [0], [1], [0, 0, 1, 1], [], []>} : vector<32x32xbf16>, vector<32x32xbf16>, vector<32x32xf32> -> vector<32x32xf32>
    %45 = arith.mulf %44, %44 : vector<32x32xf32>
    %cst_25 = arith.constant dense<0.000000e+00> : vector<32xf32>
    %46 = vector.multi_reduction <add>, %45, %cst_25 [1] : vector<32x32xf32> to vector<32xf32>
    %47 = vector.shape_cast %46 : vector<32xf32> to vector<32x1xf32>
    %cst_26 = arith.constant 9.99999996E-13 : f32
    %48 = vector.broadcast %cst_26 : f32 to vector<32x1xf32>
    %49 = arith.addf %47, %48 : vector<32x1xf32>
    %50 = math.rsqrt %49 : vector<32x1xf32>
    %cst_27 = arith.constant 1.000000e+00 : f32
    %51 = vector.broadcast %cst_27 : f32 to vector<32x1xf32>
    %52 = arith.mulf %50, %51 : vector<32x1xf32>
    %53 = vector.broadcast %52 : vector<32x1xf32> to vector<32x32xf32>
    %54 = arith.mulf %44, %53 : vector<32x32xf32>
    %55 = arith.truncf %54 : vector<32x32xf32> to vector<32x32xbf16>
    %cst_28 = arith.constant dense<0.000000e+00> : vector<32x32xf32>
    %56 = tpu.matmul %29, %55, %cst_28 {dimension_numbers = #tpu.dot_dimension_numbers<[1], [1], [0], [0], [0, 0, 1, 0], [], []>} : vector<32x32xbf16>, vector<32x32xbf16>, vector<32x32xf32> -> vector<32x32xf32>
    %c0_29 = arith.constant 0 : index
    %c0_30 = arith.constant 0 : index
    %57 = vector.load %arg8[%c0_29, %c0_30] : memref<32x32xf32, #tpu.memory_space<vmem>>, vector<32x32xf32>
    tpu.vector_store %arg8[%c0_29, %c0_30], %56 {strides = array<i32>} : memref<32x32xf32, #tpu.memory_space<vmem>>, vector<32x32xf32>,
    return
  }
}

module attributes {stable_mosaic.version = 11 : i64} {
  func.func @_sinkhorn_stats_kernel(%arg0: i32, %arg1: memref<1xi32, #tpu.memory_space<smem>>, %arg2: memref<32x32xf32, #tpu.memory_space<vmem>>, %arg3: memref<32x32xf32, #tpu.memory_space<vmem>>, %arg4: memref<32x32xf32, #tpu.memory_space<vmem>>, %arg5: memref<1x32x1xf32, #tpu.memory_space<vmem>>, %arg6: memref<1x1x32xf32, #tpu.memory_space<vmem>>, %arg7: memref<1x1x32xf32, #tpu.memory_space<vmem>>) attributes {dimension_semantics = [#tpu.dimension_semantics<parallel>], iteration_bounds = array<i64: 2>, scalar_prefetch = 1 : i64, scratch_operands = 0 : i64, tpu.core_type = #tpu.core_type<tc>, window_params = [{pipeline_mode = #tpu.pipeline_mode<synchronous>, transform_indices = @transform_0, window_bounds = array<i64: 32, 32>}, {pipeline_mode = #tpu.pipeline_mode<synchronous>, transform_indices = @transform_1, window_bounds = array<i64: 32, 32>}, {pipeline_mode = #tpu.pipeline_mode<synchronous>, transform_indices = @transform_2, window_bounds = array<i64: 32, 32>}, {transform_indices = @transform_3, window_bounds = array<i64: 1, 32, 1>}, {transform_indices = @transform_4, window_bounds = array<i64: 1, 1, 32>}, {transform_indices = @transform_5, window_bounds = array<i64: 1, 1, 32>}]} {
    %0 = tpu.iota {dimensions = array<i32: 0>} : vector<32x32xi32>
    %1 = tpu.iota {dimensions = array<i32: 1>} : vector<32x32xi32>
    %c32_i32 = arith.constant 32 : i32
    %2 = vector.broadcast %c32_i32 : i32 to vector<32x32xi32>
    %3 = arith.muli %0, %2 : vector<32x32xi32>
    %4 = arith.addi %3, %1 : vector<32x32xi32>
    %c0 = arith.constant 0 : index
    %5 = memref.load %arg1[%c0] : memref<1xi32, #tpu.memory_space<smem>>
    %c0_0 = arith.constant 0 : index
    %c0_1 = arith.constant 0 : index
    %6 = vector.load %arg2[%c0_0, %c0_1] : memref<32x32xf32, #tpu.memory_space<vmem>>, vector<32x32xf32>
    %c2_i32 = arith.constant 2 : i32
    %7 = arith.muli %arg0, %c2_i32 : i32
    %c0_i32 = arith.constant 0 : i32
    %8 = arith.addi %7, %c0_i32 : i32
    %c16777619_i32 = arith.constant 16777619 : i32
    %9 = arith.muli %8, %c16777619_i32 : i32
    %10 = arith.addi %5, %9 : i32
    %c16_i32 = arith.constant 16 : i32
    %11 = arith.shrsi %10, %c16_i32 : i32
    %c65535_i32 = arith.constant 65535 : i32
    %12 = arith.andi %11, %c65535_i32 : i32
    %13 = arith.xori %10, %12 : i32
    %c2146121005_i32 = arith.constant 2146121005 : i32
    %14 = arith.muli %13, %c2146121005_i32 : i32
    %c15_i32 = arith.constant 15 : i32
    %15 = arith.shrsi %14, %c15_i32 : i32
    %c131071_i32 = arith.constant 131071 : i32
    %16 = arith.andi %15, %c131071_i32 : i32
    %17 = arith.xori %14, %16 : i32
    %c-2073450869_i32 = arith.constant -2073450869 : i32
    %18 = arith.muli %17, %c-2073450869_i32 : i32
    %c16_i32_2 = arith.constant 16 : i32
    %19 = arith.shrsi %18, %c16_i32_2 : i32
    %c65535_i32_3 = arith.constant 65535 : i32
    %20 = arith.andi %19, %c65535_i32_3 : i32
    %21 = arith.xori %18, %20 : i32
    %22 = vector.broadcast %21 : i32 to vector<32x32xi32>
    %23 = arith.xori %4, %22 : vector<32x32xi32>
    %c16_i32_4 = arith.constant 16 : i32
    %24 = vector.broadcast %c16_i32_4 : i32 to vector<32x32xi32>
    %25 = arith.shrsi %23, %24 : vector<32x32xi32>
    %c65535_i32_5 = arith.constant 65535 : i32
    %26 = vector.broadcast %c65535_i32_5 : i32 to vector<32x32xi32>
    %27 = arith.andi %25, %26 : vector<32x32xi32>
    %28 = arith.xori %23, %27 : vector<32x32xi32>
    %c2146121005_i32_6 = arith.constant 2146121005 : i32
    %29 = vector.broadcast %c2146121005_i32_6 : i32 to vector<32x32xi32>
    %30 = arith.muli %28, %29 : vector<32x32xi32>
    %c15_i32_7 = arith.constant 15 : i32
    %31 = vector.broadcast %c15_i32_7 : i32 to vector<32x32xi32>
    %32 = arith.shrsi %30, %31 : vector<32x32xi32>
    %c131071_i32_8 = arith.constant 131071 : i32
    %33 = vector.broadcast %c131071_i32_8 : i32 to vector<32x32xi32>
    %34 = arith.andi %32, %33 : vector<32x32xi32>
    %35 = arith.xori %30, %34 : vector<32x32xi32>
    %c-2073450869_i32_9 = arith.constant -2073450869 : i32
    %36 = vector.broadcast %c-2073450869_i32_9 : i32 to vector<32x32xi32>
    %37 = arith.muli %35, %36 : vector<32x32xi32>
    %c16_i32_10 = arith.constant 16 : i32
    %38 = vector.broadcast %c16_i32_10 : i32 to vector<32x32xi32>
    %39 = arith.shrsi %37, %38 : vector<32x32xi32>
    %c65535_i32_11 = arith.constant 65535 : i32
    %40 = vector.broadcast %c65535_i32_11 : i32 to vector<32x32xi32>
    %41 = arith.andi %39, %40 : vector<32x32xi32>
    %42 = arith.xori %37, %41 : vector<32x32xi32>
    %c8388607_i32 = arith.constant 8388607 : i32
    %43 = vector.broadcast %c8388607_i32 : i32 to vector<32x32xi32>
    %44 = arith.andi %42, %43 : vector<32x32xi32>
    %45 = arith.sitofp %44 : vector<32x32xi32> to vector<32x32xf32>
    %cst = arith.constant 5.000000e-01 : f32
    %46 = vector.broadcast %cst : f32 to vector<32x32xf32>
    %47 = arith.addf %45, %46 : vector<32x32xf32>
    %cst_12 = arith.constant 1.1920929E-7 : f32
    %48 = vector.broadcast %cst_12 : f32 to vector<32x32xf32>
    %49 = arith.mulf %47, %48 : vector<32x32xf32>
    %50 = math.log %49 : vector<32x32xf32>
    %cst_13 = arith.constant 0.000000e+00 : f32
    %51 = vector.broadcast %cst_13 : f32 to vector<32x32xf32>
    %52 = arith.subf %51, %50 : vector<32x32xf32>
    %53 = math.log %52 : vector<32x32xf32>
    %cst_14 = arith.constant 0.000000e+00 : f32
    %54 = vector.broadcast %cst_14 : f32 to vector<32x32xf32>
    %55 = arith.subf %54, %53 : vector<32x32xf32>
    %56 = arith.addf %6, %55 : vector<32x32xf32>
    %cst_15 = arith.constant 1.000000e+00 : f32
    %57 = vector.broadcast %cst_15 : f32 to vector<32x32xf32>
    %58 = arith.mulf %56, %57 : vector<32x32xf32>
    %59 = vector.shape_cast %58 : vector<32x32xf32> to vector<1x32x32xf32>
    %c2_i32_16 = arith.constant 2 : i32
    %60 = arith.muli %arg0, %c2_i32_16 : i32
    %c1_i32 = arith.constant 1 : i32
    %61 = arith.addi %60, %c1_i32 : i32
    %c16777619_i32_17 = arith.constant 16777619 : i32
    %62 = arith.muli %61, %c16777619_i32_17 : i32
    %63 = arith.addi %5, %62 : i32
    %c16_i32_18 = arith.constant 16 : i32
    %64 = arith.shrsi %63, %c16_i32_18 : i32
    %c65535_i32_19 = arith.constant 65535 : i32
    %65 = arith.andi %64, %c65535_i32_19 : i32
    %66 = arith.xori %63, %65 : i32
    %c2146121005_i32_20 = arith.constant 2146121005 : i32
    %67 = arith.muli %66, %c2146121005_i32_20 : i32
    %c15_i32_21 = arith.constant 15 : i32
    %68 = arith.shrsi %67, %c15_i32_21 : i32
    %c131071_i32_22 = arith.constant 131071 : i32
    %69 = arith.andi %68, %c131071_i32_22 : i32
    %70 = arith.xori %67, %69 : i32
    %c-2073450869_i32_23 = arith.constant -2073450869 : i32
    %71 = arith.muli %70, %c-2073450869_i32_23 : i32
    %c16_i32_24 = arith.constant 16 : i32
    %72 = arith.shrsi %71, %c16_i32_24 : i32
    %c65535_i32_25 = arith.constant 65535 : i32
    %73 = arith.andi %72, %c65535_i32_25 : i32
    %74 = arith.xori %71, %73 : i32
    %75 = vector.broadcast %74 : i32 to vector<32x32xi32>
    %76 = arith.xori %4, %75 : vector<32x32xi32>
    %c16_i32_26 = arith.constant 16 : i32
    %77 = vector.broadcast %c16_i32_26 : i32 to vector<32x32xi32>
    %78 = arith.shrsi %76, %77 : vector<32x32xi32>
    %c65535_i32_27 = arith.constant 65535 : i32
    %79 = vector.broadcast %c65535_i32_27 : i32 to vector<32x32xi32>
    %80 = arith.andi %78, %79 : vector<32x32xi32>
    %81 = arith.xori %76, %80 : vector<32x32xi32>
    %c2146121005_i32_28 = arith.constant 2146121005 : i32
    %82 = vector.broadcast %c2146121005_i32_28 : i32 to vector<32x32xi32>
    %83 = arith.muli %81, %82 : vector<32x32xi32>
    %c15_i32_29 = arith.constant 15 : i32
    %84 = vector.broadcast %c15_i32_29 : i32 to vector<32x32xi32>
    %85 = arith.shrsi %83, %84 : vector<32x32xi32>
    %c131071_i32_30 = arith.constant 131071 : i32
    %86 = vector.broadcast %c131071_i32_30 : i32 to vector<32x32xi32>
    %87 = arith.andi %85, %86 : vector<32x32xi32>
    %88 = arith.xori %83, %87 : vector<32x32xi32>
    %c-2073450869_i32_31 = arith.constant -2073450869 : i32
    %89 = vector.broadcast %c-2073450869_i32_31 : i32 to vector<32x32xi32>
    %90 = arith.muli %88, %89 : vector<32x32xi32>
    %c16_i32_32 = arith.constant 16 : i32
    %91 = vector.broadcast %c16_i32_32 : i32 to vector<32x32xi32>
    %92 = arith.shrsi %90, %91 : vector<32x32xi32>
    %c65535_i32_33 = arith.constant 65535 : i32
    %93 = vector.broadcast %c65535_i32_33 : i32 to vector<32x32xi32>
    %94 = arith.andi %92, %93 : vector<32x32xi32>
    %95 = arith.xori %90, %94 : vector<32x32xi32>
    %c8388607_i32_34 = arith.constant 8388607 : i32
    %96 = vector.broadcast %c8388607_i32_34 : i32 to vector<32x32xi32>
    %97 = arith.andi %95, %96 : vector<32x32xi32>
    %98 = arith.sitofp %97 : vector<32x32xi32> to vector<32x32xf32>
    %cst_35 = arith.constant 5.000000e-01 : f32
    %99 = vector.broadcast %cst_35 : f32 to vector<32x32xf32>
    %100 = arith.addf %98, %99 : vector<32x32xf32>
    %cst_36 = arith.constant 1.1920929E-7 : f32
    %101 = vector.broadcast %cst_36 : f32 to vector<32x32xf32>
    %102 = arith.mulf %100, %101 : vector<32x32xf32>
    %103 = math.log %102 : vector<32x32xf32>
    %cst_37 = arith.constant 0.000000e+00 : f32
    %104 = vector.broadcast %cst_37 : f32 to vector<32x32xf32>
    %105 = arith.subf %104, %103 : vector<32x32xf32>
    %106 = math.log %105 : vector<32x32xf32>
    %cst_38 = arith.constant 0.000000e+00 : f32
    %107 = vector.broadcast %cst_38 : f32 to vector<32x32xf32>
    %108 = arith.subf %107, %106 : vector<32x32xf32>
    %109 = arith.addf %6, %108 : vector<32x32xf32>
    %cst_39 = arith.constant 1.000000e+00 : f32
    %110 = vector.broadcast %cst_39 : f32 to vector<32x32xf32>
    %111 = arith.mulf %109, %110 : vector<32x32xf32>
    %112 = vector.shape_cast %111 : vector<32x32xf32> to vector<1x32x32xf32>
    %113 = tpu.concatenate %59, %112 in 0 : vector<1x32x32xf32>, vector<1x32x32xf32> -> vector<2x32x32xf32>
    %c0_i32_40 = arith.constant 0 : i32
    %cst_41 = arith.constant dense<0xFF800000> : vector<2x32xf32>
    %114 = vector.multi_reduction <maximumf>, %113, %cst_41 [2] : vector<2x32x32xf32> to vector<2x32xf32>
    %115 = vector.shape_cast %114 : vector<2x32xf32> to vector<2x32x1xf32>
    %116 = vector.broadcast %115 : vector<2x32x1xf32> to vector<2x32x32xf32>
    %117 = arith.subf %113, %116 : vector<2x32x32xf32>
    %118 = math.exp %117 : vector<2x32x32xf32>
    %cst_42 = arith.constant dense<0.000000e+00> : vector<2x32xf32>
    %119 = vector.multi_reduction <add>, %118, %cst_42 [2] : vector<2x32x32xf32> to vector<2x32xf32>
    %120 = vector.shape_cast %119 : vector<2x32xf32> to vector<2x32x1xf32>
    %121 = math.log %120 : vector<2x32x1xf32>
    %122 = arith.addf %115, %121 : vector<2x32x1xf32>
    %123 = vector.broadcast %122 : vector<2x32x1xf32> to vector<2x32x32xf32>
    %124 = arith.subf %113, %123 : vector<2x32x32xf32>
    %cst_43 = arith.constant dense<0xFF800000> : vector<2x32xf32>
    %125 = vector.multi_reduction <maximumf>, %124, %cst_43 [1] : vector<2x32x32xf32> to vector<2x32xf32>
    %126 = vector.shape_cast %125 : vector<2x32xf32> to vector<2x1x32xf32>
    %127 = vector.broadcast %126 : vector<2x1x32xf32> to vector<2x32x32xf32>
    %128 = arith.subf %124, %127 : vector<2x32x32xf32>
    %129 = math.exp %128 : vector<2x32x32xf32>
    %cst_44 = arith.constant dense<0.000000e+00> : vector<2x32xf32>
    %130 = vector.multi_reduction <add>, %129, %cst_44 [1] : vector<2x32x32xf32> to vector<2x32xf32>
    %131 = vector.shape_cast %130 : vector<2x32xf32> to vector<2x1x32xf32>
    %132 = math.log %131 : vector<2x1x32xf32>
    %133 = arith.addf %126, %132 : vector<2x1x32xf32>
    %134 = vector.broadcast %133 : vector<2x1x32xf32> to vector<2x32x32xf32>
    %135 = arith.subf %124, %134 : vector<2x32x32xf32>
    %c1_i32_45 = arith.constant 1 : i32
    %cst_46 = arith.constant dense<0xFF800000> : vector<2x32xf32>
    %136 = vector.multi_reduction <maximumf>, %135, %cst_46 [2] : vector<2x32x32xf32> to vector<2x32xf32>
    %137 = vector.shape_cast %136 : vector<2x32xf32> to vector<2x32x1xf32>
    %138 = vector.broadcast %137 : vector<2x32x1xf32> to vector<2x32x32xf32>
    %139 = arith.subf %135, %138 : vector<2x32x32xf32>
    %140 = math.exp %139 : vector<2x32x32xf32>
    %cst_47 = arith.constant dense<0.000000e+00> : vector<2x32xf32>
    %141 = vector.multi_reduction <add>, %140, %cst_47 [2] : vector<2x32x32xf32> to vector<2x32xf32>
    %142 = vector.shape_cast %141 : vector<2x32xf32> to vector<2x32x1xf32>
    %143 = math.log %142 : vector<2x32x1xf32>
    %144 = arith.addf %137, %143 : vector<2x32x1xf32>
    %145 = vector.broadcast %144 : vector<2x32x1xf32> to vector<2x32x32xf32>
    %146 = arith.subf %135, %145 : vector<2x32x32xf32>
    %cst_48 = arith.constant dense<0xFF800000> : vector<2x32xf32>
    %147 = vector.multi_reduction <maximumf>, %146, %cst_48 [1] : vector<2x32x32xf32> to vector<2x32xf32>
    %148 = vector.shape_cast %147 : vector<2x32xf32> to vector<2x1x32xf32>
    %149 = vector.broadcast %148 : vector<2x1x32xf32> to vector<2x32x32xf32>
    %150 = arith.subf %146, %149 : vector<2x32x32xf32>
    %151 = math.exp %150 : vector<2x32x32xf32>
    %cst_49 = arith.constant dense<0.000000e+00> : vector<2x32xf32>
    %152 = vector.multi_reduction <add>, %151, %cst_49 [1] : vector<2x32x32xf32> to vector<2x32xf32>
    %153 = vector.shape_cast %152 : vector<2x32xf32> to vector<2x1x32xf32>
    %154 = math.log %153 : vector<2x1x32xf32>
    %155 = arith.addf %148, %154 : vector<2x1x32xf32>
    %156 = vector.broadcast %155 : vector<2x1x32xf32> to vector<2x32x32xf32>
    %157 = arith.subf %146, %156 : vector<2x32x32xf32>
    %c2_i32_50 = arith.constant 2 : i32
    %cst_51 = arith.constant dense<0xFF800000> : vector<2x32xf32>
    %158 = vector.multi_reduction <maximumf>, %157, %cst_51 [2] : vector<2x32x32xf32> to vector<2x32xf32>
    %159 = vector.shape_cast %158 : vector<2x32xf32> to vector<2x32x1xf32>
    %160 = vector.broadcast %159 : vector<2x32x1xf32> to vector<2x32x32xf32>
    %161 = arith.subf %157, %160 : vector<2x32x32xf32>
    %162 = math.exp %161 : vector<2x32x32xf32>
    %cst_52 = arith.constant dense<0.000000e+00> : vector<2x32xf32>
    %163 = vector.multi_reduction <add>, %162, %cst_52 [2] : vector<2x32x32xf32> to vector<2x32xf32>
    %164 = vector.shape_cast %163 : vector<2x32xf32> to vector<2x32x1xf32>
    %165 = math.log %164 : vector<2x32x1xf32>
    %166 = arith.addf %159, %165 : vector<2x32x1xf32>
    %167 = vector.broadcast %166 : vector<2x32x1xf32> to vector<2x32x32xf32>
    %168 = arith.subf %157, %167 : vector<2x32x32xf32>
    %cst_53 = arith.constant dense<0xFF800000> : vector<2x32xf32>
    %169 = vector.multi_reduction <maximumf>, %168, %cst_53 [1] : vector<2x32x32xf32> to vector<2x32xf32>
    %170 = vector.shape_cast %169 : vector<2x32xf32> to vector<2x1x32xf32>
    %171 = vector.broadcast %170 : vector<2x1x32xf32> to vector<2x32x32xf32>
    %172 = arith.subf %168, %171 : vector<2x32x32xf32>
    %173 = math.exp %172 : vector<2x32x32xf32>
    %cst_54 = arith.constant dense<0.000000e+00> : vector<2x32xf32>
    %174 = vector.multi_reduction <add>, %173, %cst_54 [1] : vector<2x32x32xf32> to vector<2x32xf32>
    %175 = vector.shape_cast %174 : vector<2x32xf32> to vector<2x1x32xf32>
    %176 = math.log %175 : vector<2x1x32xf32>
    %177 = arith.addf %170, %176 : vector<2x1x32xf32>
    %178 = vector.broadcast %177 : vector<2x1x32xf32> to vector<2x32x32xf32>
    %179 = arith.subf %168, %178 : vector<2x32x32xf32>
    %c3_i32 = arith.constant 3 : i32
    %cst_55 = arith.constant dense<0xFF800000> : vector<2x32xf32>
    %180 = vector.multi_reduction <maximumf>, %179, %cst_55 [2] : vector<2x32x32xf32> to vector<2x32xf32>
    %181 = vector.shape_cast %180 : vector<2x32xf32> to vector<2x32x1xf32>
    %182 = vector.broadcast %181 : vector<2x32x1xf32> to vector<2x32x32xf32>
    %183 = arith.subf %179, %182 : vector<2x32x32xf32>
    %184 = math.exp %183 : vector<2x32x32xf32>
    %cst_56 = arith.constant dense<0.000000e+00> : vector<2x32xf32>
    %185 = vector.multi_reduction <add>, %184, %cst_56 [2] : vector<2x32x32xf32> to vector<2x32xf32>
    %186 = vector.shape_cast %185 : vector<2x32xf32> to vector<2x32x1xf32>
    %187 = math.log %186 : vector<2x32x1xf32>
    %188 = arith.addf %181, %187 : vector<2x32x1xf32>
    %189 = vector.broadcast %188 : vector<2x32x1xf32> to vector<2x32x32xf32>
    %190 = arith.subf %179, %189 : vector<2x32x32xf32>
    %cst_57 = arith.constant dense<0xFF800000> : vector<2x32xf32>
    %191 = vector.multi_reduction <maximumf>, %190, %cst_57 [1] : vector<2x32x32xf32> to vector<2x32xf32>
    %192 = vector.shape_cast %191 : vector<2x32xf32> to vector<2x1x32xf32>
    %193 = vector.broadcast %192 : vector<2x1x32xf32> to vector<2x32x32xf32>
    %194 = arith.subf %190, %193 : vector<2x32x32xf32>
    %195 = math.exp %194 : vector<2x32x32xf32>
    %cst_58 = arith.constant dense<0.000000e+00> : vector<2x32xf32>
    %196 = vector.multi_reduction <add>, %195, %cst_58 [1] : vector<2x32x32xf32> to vector<2x32xf32>
    %197 = vector.shape_cast %196 : vector<2x32xf32> to vector<2x1x32xf32>
    %198 = math.log %197 : vector<2x1x32xf32>
    %199 = arith.addf %192, %198 : vector<2x1x32xf32>
    %200 = vector.broadcast %199 : vector<2x1x32xf32> to vector<2x32x32xf32>
    %201 = arith.subf %190, %200 : vector<2x32x32xf32>
    %c4_i32 = arith.constant 4 : i32
    %cst_59 = arith.constant dense<0xFF800000> : vector<2x32xf32>
    %202 = vector.multi_reduction <maximumf>, %201, %cst_59 [2] : vector<2x32x32xf32> to vector<2x32xf32>
    %203 = vector.shape_cast %202 : vector<2x32xf32> to vector<2x32x1xf32>
    %204 = vector.broadcast %203 : vector<2x32x1xf32> to vector<2x32x32xf32>
    %205 = arith.subf %201, %204 : vector<2x32x32xf32>
    %206 = math.exp %205 : vector<2x32x32xf32>
    %cst_60 = arith.constant dense<0.000000e+00> : vector<2x32xf32>
    %207 = vector.multi_reduction <add>, %206, %cst_60 [2] : vector<2x32x32xf32> to vector<2x32xf32>
    %208 = vector.shape_cast %207 : vector<2x32xf32> to vector<2x32x1xf32>
    %209 = math.log %208 : vector<2x32x1xf32>
    %210 = arith.addf %203, %209 : vector<2x32x1xf32>
    %211 = vector.broadcast %210 : vector<2x32x1xf32> to vector<2x32x32xf32>
    %212 = arith.subf %201, %211 : vector<2x32x32xf32>
    %cst_61 = arith.constant dense<0xFF800000> : vector<2x32xf32>
    %213 = vector.multi_reduction <maximumf>, %212, %cst_61 [1] : vector<2x32x32xf32> to vector<2x32xf32>
    %214 = vector.shape_cast %213 : vector<2x32xf32> to vector<2x1x32xf32>
    %215 = vector.broadcast %214 : vector<2x1x32xf32> to vector<2x32x32xf32>
    %216 = arith.subf %212, %215 : vector<2x32x32xf32>
    %217 = math.exp %216 : vector<2x32x32xf32>
    %cst_62 = arith.constant dense<0.000000e+00> : vector<2x32xf32>
    %218 = vector.multi_reduction <add>, %217, %cst_62 [1] : vector<2x32x32xf32> to vector<2x32xf32>
    %219 = vector.shape_cast %218 : vector<2x32xf32> to vector<2x1x32xf32>
    %220 = math.log %219 : vector<2x1x32xf32>
    %221 = arith.addf %214, %220 : vector<2x1x32xf32>
    %222 = vector.broadcast %221 : vector<2x1x32xf32> to vector<2x32x32xf32>
    %223 = arith.subf %212, %222 : vector<2x32x32xf32>
    %c5_i32 = arith.constant 5 : i32
    %cst_63 = arith.constant dense<0xFF800000> : vector<2x32xf32>
    %224 = vector.multi_reduction <maximumf>, %223, %cst_63 [2] : vector<2x32x32xf32> to vector<2x32xf32>
    %225 = vector.shape_cast %224 : vector<2x32xf32> to vector<2x32x1xf32>
    %226 = vector.broadcast %225 : vector<2x32x1xf32> to vector<2x32x32xf32>
    %227 = arith.subf %223, %226 : vector<2x32x32xf32>
    %228 = math.exp %227 : vector<2x32x32xf32>
    %cst_64 = arith.constant dense<0.000000e+00> : vector<2x32xf32>
    %229 = vector.multi_reduction <add>, %228, %cst_64 [2] : vector<2x32x32xf32> to vector<2x32xf32>
    %230 = vector.shape_cast %229 : vector<2x32xf32> to vector<2x32x1xf32>
    %231 = math.log %230 : vector<2x32x1xf32>
    %232 = arith.addf %225, %231 : vector<2x32x1xf32>
    %233 = vector.broadcast %232 : vector<2x32x1xf32> to vector<2x32x32xf32>
    %234 = arith.subf %223, %233 : vector<2x32x32xf32>
    %cst_65 = arith.constant dense<0xFF800000> : vector<2x32xf32>
    %235 = vector.multi_reduction <maximumf>, %234, %cst_65 [1] : vector<2x32x32xf32> to vector<2x32xf32>
    %236 = vector.shape_cast %235 : vector<2x32xf32> to vector<2x1x32xf32>
    %237 = vector.broadcast %236 : vector<2x1x32xf32> to vector<2x32x32xf32>
    %238 = arith.subf %234, %237 : vector<2x32x32xf32>
    %239 = math.exp %238 : vector<2x32x32xf32>
    %cst_66 = arith.constant dense<0.000000e+00> : vector<2x32xf32>
    %240 = vector.multi_reduction <add>, %239, %cst_66 [1] : vector<2x32x32xf32> to vector<2x32xf32>
    %241 = vector.shape_cast %240 : vector<2x32xf32> to vector<2x1x32xf32>
    %242 = math.log %241 : vector<2x1x32xf32>
    %243 = arith.addf %236, %242 : vector<2x1x32xf32>
    %244 = vector.broadcast %243 : vector<2x1x32xf32> to vector<2x32x32xf32>
    %245 = arith.subf %234, %244 : vector<2x32x32xf32>
    %c6_i32 = arith.constant 6 : i32
    %cst_67 = arith.constant dense<0xFF800000> : vector<2x32xf32>
    %246 = vector.multi_reduction <maximumf>, %245, %cst_67 [2] : vector<2x32x32xf32> to vector<2x32xf32>
    %247 = vector.shape_cast %246 : vector<2x32xf32> to vector<2x32x1xf32>
    %248 = vector.broadcast %247 : vector<2x32x1xf32> to vector<2x32x32xf32>
    %249 = arith.subf %245, %248 : vector<2x32x32xf32>
    %250 = math.exp %249 : vector<2x32x32xf32>
    %cst_68 = arith.constant dense<0.000000e+00> : vector<2x32xf32>
    %251 = vector.multi_reduction <add>, %250, %cst_68 [2] : vector<2x32x32xf32> to vector<2x32xf32>
    %252 = vector.shape_cast %251 : vector<2x32xf32> to vector<2x32x1xf32>
    %253 = math.log %252 : vector<2x32x1xf32>
    %254 = arith.addf %247, %253 : vector<2x32x1xf32>
    %255 = vector.broadcast %254 : vector<2x32x1xf32> to vector<2x32x32xf32>
    %256 = arith.subf %245, %255 : vector<2x32x32xf32>
    %cst_69 = arith.constant dense<0xFF800000> : vector<2x32xf32>
    %257 = vector.multi_reduction <maximumf>, %256, %cst_69 [1] : vector<2x32x32xf32> to vector<2x32xf32>
    %258 = vector.shape_cast %257 : vector<2x32xf32> to vector<2x1x32xf32>
    %259 = vector.broadcast %258 : vector<2x1x32xf32> to vector<2x32x32xf32>
    %260 = arith.subf %256, %259 : vector<2x32x32xf32>
    %261 = math.exp %260 : vector<2x32x32xf32>
    %cst_70 = arith.constant dense<0.000000e+00> : vector<2x32xf32>
    %262 = vector.multi_reduction <add>, %261, %cst_70 [1] : vector<2x32x32xf32> to vector<2x32xf32>
    %263 = vector.shape_cast %262 : vector<2x32xf32> to vector<2x1x32xf32>
    %264 = math.log %263 : vector<2x1x32xf32>
    %265 = arith.addf %258, %264 : vector<2x1x32xf32>
    %266 = vector.broadcast %265 : vector<2x1x32xf32> to vector<2x32x32xf32>
    %267 = arith.subf %256, %266 : vector<2x32x32xf32>
    %cst_71 = arith.constant dense<0xFF800000> : vector<2x32xf32>
    %268 = vector.multi_reduction <maximumf>, %267, %cst_71 [2] : vector<2x32x32xf32> to vector<2x32xf32>
    %269 = vector.shape_cast %268 : vector<2x32xf32> to vector<2x32x1xf32>
    %270 = vector.broadcast %269 : vector<2x32x1xf32> to vector<2x32x32xf32>
    %271 = arith.subf %267, %270 : vector<2x32x32xf32>
    %272 = math.exp %271 : vector<2x32x32xf32>
    %cst_72 = arith.constant dense<0.000000e+00> : vector<2x32xf32>
    %273 = vector.multi_reduction <add>, %272, %cst_72 [2] : vector<2x32x32xf32> to vector<2x32xf32>
    %274 = vector.shape_cast %273 : vector<2x32xf32> to vector<2x32x1xf32>
    %275 = math.log %274 : vector<2x32x1xf32>
    %276 = arith.addf %269, %275 : vector<2x32x1xf32>
    %277 = vector.broadcast %276 : vector<2x32x1xf32> to vector<2x32x32xf32>
    %278 = arith.subf %267, %277 : vector<2x32x32xf32>
    %cst_73 = arith.constant dense<0xFF800000> : vector<2x32xf32>
    %279 = vector.multi_reduction <maximumf>, %278, %cst_73 [1] : vector<2x32x32xf32> to vector<2x32xf32>
    %280 = vector.shape_cast %279 : vector<2x32xf32> to vector<2x1x32xf32>
    %281 = vector.broadcast %280 : vector<2x1x32xf32> to vector<2x32x32xf32>
    %282 = arith.subf %278, %281 : vector<2x32x32xf32>
    %283 = math.exp %282 : vector<2x32x32xf32>
    %cst_74 = arith.constant dense<0.000000e+00> : vector<2x32xf32>
    %284 = vector.multi_reduction <add>, %283, %cst_74 [1] : vector<2x32x32xf32> to vector<2x32xf32>
    %285 = vector.shape_cast %284 : vector<2x32xf32> to vector<2x1x32xf32>
    %286 = vector.broadcast %285 : vector<2x1x32xf32> to vector<2x32x32xf32>
    %287 = arith.divf %283, %286 : vector<2x32x32xf32>
    %c16_i32_75 = arith.constant 16 : i32
    %288 = vector.broadcast %c16_i32_75 : i32 to vector<32x32xi32>
    %289 = arith.cmpi slt, %0, %288 : vector<32x32xi32>
    %c16_i32_76 = arith.constant 16 : i32
    %290 = vector.broadcast %c16_i32_76 : i32 to vector<32x32xi32>
    %291 = arith.cmpi slt, %1, %290 : vector<32x32xi32>
    %292 = arith.andi %289, %291 : vector<32x32xi1>
    %cst_77 = arith.constant 1.000000e+00 : f32
    %cst_78 = arith.constant 0.000000e+00 : f32
    %293 = vector.broadcast %cst_77 : f32 to vector<32x32xf32>
    %294 = vector.broadcast %cst_78 : f32 to vector<32x32xf32>
    %295 = arith.select %292, %293, %294 : vector<32x32xi1>, vector<32x32xf32>
    %cst_79 = arith.constant dense<0.000000e+00> : vector<32x32xf32>
    %296 = vector.multi_reduction <add>, %287, %cst_79 [0] : vector<2x32x32xf32> to vector<32x32xf32>
    %297 = arith.mulf %296, %295 : vector<32x32xf32>
    %cst_80 = arith.constant dense<0.000000e+00> : vector<32xf32>
    %298 = vector.multi_reduction <add>, %297, %cst_80 [1] : vector<32x32xf32> to vector<32xf32>
    %299 = vector.shape_cast %298 : vector<32xf32> to vector<32x1xf32>
    %300 = vector.shape_cast %299 : vector<32x1xf32> to vector<1x32x1xf32>
    %c0_81 = arith.constant 0 : index
    %c0_82 = arith.constant 0 : index
    %c0_83 = arith.constant 0 : index
    %301 = vector.load %arg5[%c0_81, %c0_82, %c0_83] : memref<1x32x1xf32, #tpu.memory_space<vmem>>, vector<1x32x1xf32>
    tpu.vector_store %arg5[%c0_81, %c0_82, %c0_83], %300 {strides = array<i32>} : memref<1x32x1xf32, #tpu.memory_space<vmem>>, vector<1x32x1xf32>,
    %cst_84 = arith.constant dense<0.000000e+00> : vector<32xf32>
    %302 = vector.multi_reduction <add>, %297, %cst_84 [0] : vector<32x32xf32> to vector<32xf32>
    %303 = vector.shape_cast %302 : vector<32xf32> to vector<1x32xf32>
    %304 = vector.shape_cast %303 : vector<1x32xf32> to vector<1x1x32xf32>
    %c0_85 = arith.constant 0 : index
    %c0_86 = arith.constant 0 : index
    %c0_87 = arith.constant 0 : index
    %305 = vector.load %arg6[%c0_85, %c0_86, %c0_87] : memref<1x1x32xf32, #tpu.memory_space<vmem>>, vector<1x1x32xf32>
    tpu.vector_store %arg6[%c0_85, %c0_86, %c0_87], %304 {strides = array<i32>} : memref<1x1x32xf32, #tpu.memory_space<vmem>>, vector<1x1x32xf32>,
    %c0_88 = arith.constant 0 : index
    %c0_89 = arith.constant 0 : index
    %306 = vector.load %arg3[%c0_88, %c0_89] : memref<32x32xf32, #tpu.memory_space<vmem>>, vector<32x32xf32>
    %307 = arith.truncf %306 : vector<32x32xf32> to vector<32x32xbf16>
    %c0_90 = arith.constant 0 : index
    %c0_91 = arith.constant 0 : index
    %308 = vector.load %arg4[%c0_90, %c0_91] : memref<32x32xf32, #tpu.memory_space<vmem>>, vector<32x32xf32>
    %309 = arith.truncf %308 : vector<32x32xf32> to vector<32x32xbf16>
    %310 = arith.truncf %287 : vector<2x32x32xf32> to vector<2x32x32xbf16>
    %311 = vector.shape_cast %310 : vector<2x32x32xbf16> to vector<64x32xbf16>
    %cst_92 = arith.constant dense<0.000000e+00> : vector<64x32xf32>
    %312 = tpu.matmul %311, %309, %cst_92 {dimension_numbers = #tpu.dot_dimension_numbers<[1], [0], [0], [1], [0, 0, 1, 1], [], []>} : vector<64x32xbf16>, vector<32x32xbf16>, vector<64x32xf32> -> vector<64x32xf32>
    %313 = vector.shape_cast %312 : vector<64x32xf32> to vector<2x32x32xf32>
    %314 = vector.extract_strided_slice %310 {offsets = [0, 0, 0], sizes = [1, 32, 32], strides = [1, 1, 1]} : vector<2x32x32xbf16> to vector<1x32x32xbf16>
    %315 = vector.shape_cast %314 : vector<1x32x32xbf16> to vector<32x32xbf16>
    %cst_93 = arith.constant dense<0.000000e+00> : vector<32x32xf32>
    %316 = tpu.matmul %307, %315, %cst_93 {dimension_numbers = #tpu.dot_dimension_numbers<[1], [0], [0], [1], [0, 0, 1, 1], [], []>} : vector<32x32xbf16>, vector<32x32xbf16>, vector<32x32xf32> -> vector<32x32xf32>
    %317 = vector.extract_strided_slice %313 {offsets = [0, 0, 0], sizes = [1, 32, 32], strides = [1, 1, 1]} : vector<2x32x32xf32> to vector<1x32x32xf32>
    %318 = vector.shape_cast %317 : vector<1x32x32xf32> to vector<32x32xf32>
    %319 = arith.mulf %316, %318 : vector<32x32xf32>
    %320 = vector.shape_cast %319 : vector<32x32xf32> to vector<1x32x32xf32>
    %cst_94 = arith.constant dense<0.000000e+00> : vector<1xf32>
    %321 = vector.multi_reduction <add>, %320, %cst_94 [1, 2] : vector<1x32x32xf32> to vector<1xf32>
    %322 = vector.shape_cast %321 : vector<1xf32> to vector<1x1x1xf32>
    %323 = vector.extract %322[0, 0, 0] : f32 from vector<1x1x1xf32>
    %cst_95 = arith.constant 0.000000e+00 : f32
    %324 = arith.addf %cst_95, %323 : f32
    %325 = vector.extract_strided_slice %310 {offsets = [1, 0, 0], sizes = [1, 32, 32], strides = [1, 1, 1]} : vector<2x32x32xbf16> to vector<1x32x32xbf16>
    %326 = vector.shape_cast %325 : vector<1x32x32xbf16> to vector<32x32xbf16>
    %cst_96 = arith.constant dense<0.000000e+00> : vector<32x32xf32>
    %327 = tpu.matmul %307, %326, %cst_96 {dimension_numbers = #tpu.dot_dimension_numbers<[1], [0], [0], [1], [0, 0, 1, 1], [], []>} : vector<32x32xbf16>, vector<32x32xbf16>, vector<32x32xf32> -> vector<32x32xf32>
    %328 = vector.extract_strided_slice %313 {offsets = [1, 0, 0], sizes = [1, 32, 32], strides = [1, 1, 1]} : vector<2x32x32xf32> to vector<1x32x32xf32>
    %329 = vector.shape_cast %328 : vector<1x32x32xf32> to vector<32x32xf32>
    %330 = arith.mulf %327, %329 : vector<32x32xf32>
    %331 = vector.shape_cast %330 : vector<32x32xf32> to vector<1x32x32xf32>
    %cst_97 = arith.constant dense<0.000000e+00> : vector<1xf32>
    %332 = vector.multi_reduction <add>, %331, %cst_97 [1, 2] : vector<1x32x32xf32> to vector<1xf32>
    %333 = vector.shape_cast %332 : vector<1xf32> to vector<1x1x1xf32>
    %334 = vector.extract %333[0, 0, 0] : f32 from vector<1x1x1xf32>
    %335 = arith.addf %324, %334 : f32
    %336 = vector.broadcast %335 : f32 to vector<1x1x32xf32>
    %c0_98 = arith.constant 0 : index
    %c0_99 = arith.constant 0 : index
    %c0_100 = arith.constant 0 : index
    %337 = vector.load %arg7[%c0_98, %c0_99, %c0_100] : memref<1x1x32xf32, #tpu.memory_space<vmem>>, vector<1x1x32xf32>
    tpu.vector_store %arg7[%c0_98, %c0_99, %c0_100], %336 {strides = array<i32>} : memref<1x1x32xf32, #tpu.memory_space<vmem>>, vector<1x1x32xf32>,
    return
  }
  func.func @transform_0(%arg0: i32, %arg1: memref<1xi32, #tpu.memory_space<smem>>) -> (i32, i32) {
    %c0_i32 = arith.constant 0 : i32
    %c0_i32_0 = arith.constant 0 : i32
    %c0_i32_1 = arith.constant 0 : i32
    return %c0_i32, %c0_i32_0 : i32, i32
  }
  func.func @transform_1(%arg0: i32, %arg1: memref<1xi32, #tpu.memory_space<smem>>) -> (i32, i32) {
    %c0_i32 = arith.constant 0 : i32
    %c0_i32_0 = arith.constant 0 : i32
    %c0_i32_1 = arith.constant 0 : i32
    return %c0_i32, %c0_i32_0 : i32, i32
  }
  func.func @transform_2(%arg0: i32, %arg1: memref<1xi32, #tpu.memory_space<smem>>) -> (i32, i32) {
    %c0_i32 = arith.constant 0 : i32
    %c0_i32_0 = arith.constant 0 : i32
    %c0_i32_1 = arith.constant 0 : i32
    return %c0_i32, %c0_i32_0 : i32, i32
  }
  func.func @transform_3(%arg0: i32, %arg1: memref<1xi32, #tpu.memory_space<smem>>) -> (i32, i32, i32) {
    %c0_i32 = arith.constant 0 : i32
    %c0_i32_0 = arith.constant 0 : i32
    %c0_i32_1 = arith.constant 0 : i32
    return %arg0, %c0_i32, %c0_i32_0 : i32, i32, i32
  }
  func.func @transform_4(%arg0: i32, %arg1: memref<1xi32, #tpu.memory_space<smem>>) -> (i32, i32, i32) {
    %c0_i32 = arith.constant 0 : i32
    %c0_i32_0 = arith.constant 0 : i32
    %c0_i32_1 = arith.constant 0 : i32
    return %arg0, %c0_i32, %c0_i32_0 : i32, i32, i32
  }
  func.func @transform_5(%arg0: i32, %arg1: memref<1xi32, #tpu.memory_space<smem>>) -> (i32, i32, i32) {
    %c0_i32 = arith.constant 0 : i32
    %c0_i32_0 = arith.constant 0 : i32
    %c0_i32_1 = arith.constant 0 : i32
    return %arg0, %c0_i32, %c0_i32_0 : i32, i32, i32
  }
}

</mosaic_0001>

<bundles_post_ra>
// kernel: custom-call
= control target key start
LH: loop header
LB: loop body
LE: loop exit
PB: predicated region body
PF: predicated region fallthrough
CT: control target
= control target key end

     0   :  { %s6_s0 = inlined_call_operand.vmem [shape: f32[32,32], index: 0, kind: output, shape index: {}]  }

// kernel: custom-call.2
= control target key start
LH: loop header
LB: loop body
LE: loop exit
PB: predicated region body
PF: predicated region fallthrough
CT: control target
= control target key end

     0   :  { %s6_s0 = inlined_call_operand.vmem [shape: f32[32,1], index: 0, kind: output, shape index: {}]  }

// kernel: closed_call.36
= control target key start
LH: loop header
LB: loop body
LE: loop exit
PB: predicated region body
PF: predicated region fallthrough
CT: control target
= control target key end

     0   :  { %v508_v0 = vmov 0   ;;  %vm82_vm0 = vcmask 261120   ;;  %s803_s2 = inlined_call_operand.vmem [shape: f32[32,1], index: 2, kind: input, shape index: {}]   ;;  %s804_s5 = inlined_call_operand.vmem [shape: f32[32,1], index: 5, kind: input, shape index: {}]   ;;  %s805_s0 = inlined_call_operand.vmem [shape: f32[32,32], index: 0, kind: input, shape index: {}]   ;;  %s806_s3 = inlined_call_operand.vmem [shape: f32[32,32], index: 3, kind: input, shape index: {}]   ;;  %s807_s1 = inlined_call_operand.vmem [shape: f32[32,32], index: 1, kind: input, shape index: {}]   ;;  %s808_s4 = inlined_call_operand.vmem [shape: f32[32,32], index: 4, kind: input, shape index: {}]   ;;  %s809_s6 = inlined_call_operand.vmem [shape: f32[32,32], index: 6, kind: input, shape index: {}]   ;;  %s810_s7 = inlined_call_operand.vmem [shape: f32[32,32], index: 7, kind: input, shape index: {}]   ;;  %s811_s8 = inlined_call_operand.vmem [shape: f32[32,32], index: 8, kind: output, shape index: {}]  }
   0x1   :  { %490 = vset.pattern.permute.xlu1 %v508_v0  ;;  %489 = vset.pattern.permute.xlu0 %v508_v0  ;;  %v52_v1 = vld [vmem:[%s803_s2 + $0x10] sm:$0xff]  ;;  %v50_v2 = vld [vmem:[%s803_s2] sm:$0xff]  ;;  %v53_v4 = vld [vmem:[%s803_s2 + $0x18] sm:$0xff] }
   0x2   :  { %66 = vperm.xlu0 %489, %v52_v1   ;;  %56 = vperm.xlu1 %490, %v50_v2   ;;  %v250_v3 = vld [vmem:[%s804_s5 + $0x10] sm:$0xff]  ;;  %v51_v5 = vld [vmem:[%s803_s2 + $0x8] sm:$0xff]  ;;  %v251_v6 = vld [vmem:[%s804_s5 + $0x18] sm:$0xff] }
   0x3   :  { %491 = vset.pattern.permute.xlu2 %v508_v0  ;;  %v248_v7 = vld [vmem:[%s804_s5] sm:$0xff]  ;;  %v249_v8 = vld [vmem:[%s804_s5 + $0x8] sm:$0xff]  ;;  %v44_v12 = vld [vmem:[%s805_s0 + $0x10] sm:$0xff] }
   0x4   :  { %264 = vperm.xlu2 %491, %v250_v3   ;;  %v45_v13 = vld [vmem:[%s805_s0 + $0x18] sm:$0xff]  ;;  %v242_v14 = vld [vmem:[%s806_s3 + $0x10] sm:$0xff]  ;;  %v43_v19 = vld [vmem:[%s805_s0 + $0x8] sm:$0xff] }
   0x5   :  { %v243_v16 = vld [vmem:[%s806_s3 + $0x18] sm:$0xff]  ;;  %v42_v22 = vld [vmem:[%s805_s0] sm:$0xff]  ;;  %v47_v29 = vld [vmem:[%s807_s1 + $0x8] sm:$0xff] }
   0x6   :  { %v46_v27 = vld [vmem:[%s807_s1] sm:$0xff]  ;;  %v48_v30 = vld [vmem:[%s807_s1 + $0x10] sm:$0xff]  ;;  %v49_v31 = vld [vmem:[%s807_s1 + $0x18] sm:$0xff] }
   0x7   :  { %v240_v32 = vld [vmem:[%s806_s3] sm:$0xff]  ;;  %v241_v33 = vld [vmem:[%s806_s3 + $0x8] sm:$0xff]  ;;  %v80_v38 = vpack.c.bf16 %v47_v29, %v46_v27  ;;  %v81_v39 = vpack.c.bf16 %v49_v31, %v48_v30  ;;  %v246_v46 = vld [vmem:[%s808_s4 + $0x10] sm:$0xff] }
   0x8   :  { %v244_v43 = vld [vmem:[%s808_s4] sm:$0xff]  ;;  %v245_v44 = vld [vmem:[%s808_s4 + $0x8] sm:$0xff]  ;;  %v247_v47 = vld [vmem:[%s808_s4 + $0x18] sm:$0xff] }
   0x9   :  { %v278_v45 = vpack.c.bf16 %v245_v44, %v244_v43  ;;  %v279_v48 = vpack.c.bf16 %v247_v47, %v246_v46  ;;  %v32_v49 = vld [vmem:[%s809_s6 + $0x10] sm:$0xff]  ;;  %v33_v50 = vld [vmem:[%s809_s6 + $0x18] sm:$0xff]  ;;  %v30_v52 = vld [vmem:[%s809_s6] sm:$0xff] }
   0xa   :  { %71 = vperm.xlu0 %489, %v53_v4   ;;  %61 = vperm.xlu1 %490, %v51_v5   ;;  %v35_v51 = vpack.c.bf16 %v33_v50, %v32_v49  ;;  %v31_v53 = vld [vmem:[%s809_s6 + $0x8] sm:$0xff] }
   0xb   :  { %v34_v54 = vpack.c.bf16 %v31_v53, %v30_v52 }
   0xc   :  { %269 = vperm.xlu2 %491, %v251_v6   ;;  %126 = vmatpush.bf16.msra.mxu1 %v35_v51 }
  0x10   :  { %127 = vmatpush.bf16.msra.mxu1 %v34_v54 }
  0x12   :  { %254 = vperm.xlu0 %489, %v248_v7   ;;  %259 = vperm.xlu1 %490, %v249_v8  }
  0x5e   :  { %v265_v9 = vpop.permute.xlu2 %264 }
  0x5f   :  { %v598_v23 = vmul.f32 %v265_v9, %v242_v14  ;;  %v36_v14 = vld [vmem:[%s810_s7] sm:$0xff] }
  0x66   :  { %v270_v15 = vpop.permute.xlu2 %269 }
  0x67   :  { %v600_v24 = vmul.f32 %v270_v15, %v243_v16  ;;  %v37_v15 = vld [vmem:[%s810_s7 + $0x8] sm:$0xff] }
  0x68   :  { %v40_v16 = vpack.c.bf16 %v37_v15, %v36_v14 }
  0x69   :  { %v277_v34 = vpack.c.bf16 %v600_v24, %v598_v23 }
  0x74   :  { %v67_v10 = vpop.permute.xlu0 %66  ;;  %v57_v11 = vpop.permute.xlu1 %56 }
  0x75   :  { %v593_v20 = vmul.f32 %v67_v10, %v44_v12  ;;  %v74_v28 = vmul.f32 %v57_v11, %v42_v22  ;;  %v38_v11 = vld [vmem:[%s810_s7 + $0x10] sm:$0xff]  ;;  %v39_v12 = vld [vmem:[%s810_s7 + $0x18] sm:$0xff] }
  0x7c   :  { %v72_v17 = vpop.permute.xlu0 %71  ;;  %v62_v18 = vpop.permute.xlu1 %61 }
  0x7d   :  { %v77_v21 = vmul.f32 %v72_v17, %v45_v13  ;;  %v75_v25 = vmul.f32 %v62_v18, %v43_v19  ;;  %v41_v13 = vpack.c.bf16 %v39_v12, %v38_v11 }
  0x7f   :  { %v79_v26 = vpack.c.bf16 %v77_v21, %v593_v20  ;;  %v78_v35 = vpack.c.bf16 %v75_v25, %v74_v28  ;;  %157 = vmatpush.bf16.msra.mxu2 %v41_v13  ;;  %354 = vmatpush.bf16.msrb.mxu1 %v41_v13 }
  0x81   :  { %95 = vmatpush.bf16.msra.mxu0 %v79_v26  ;;  %486 = vmatpush.bf16.msra.mxu3 %v79_v26 }
  0x83   :  { %158 = vmatpush.bf16.msra.mxu2 %v40_v16  ;;  %355 = vmatpush.bf16.msrb.mxu1 %v40_v16 }
  0x84   :  { %v255_v36 = vpop.permute.xlu0 %254  ;;  %v260_v37 = vpop.permute.xlu1 %259 }
  0x85   :  { %v272_v40 = vmul.f32 %v255_v36, %v240_v32  ;;  %v273_v41 = vmul.f32 %v260_v37, %v241_v33  ;;  %96 = vmatpush.bf16.msra.mxu0 %v78_v35  ;;  %487 = vmatpush.bf16.msra.mxu3 %v78_v35 }
  0x87   :  { %v276_v42 = vpack.c.bf16 %v273_v41, %v272_v40 }
  0x88   :  { %472 = vmatmul.msk.bf16.vlgmr.msra.gmra.mxu0 %vm82_vm0, %v80_v38  ;;  %473 = vmatmul.msk.bf16.vlgmr.msra.gmra.mxu3 %vm82_vm0, %v81_v39 }
  0x89   :  { %292 = vmatpush.bf16.msrb.mxu3 %v277_v34  ;;  %323 = vmatpush.bf16.msrb.mxu0 %v35_v51 }
  0x8d   :  { %293 = vmatpush.bf16.msrb.mxu3 %v276_v42  ;;  %324 = vmatpush.bf16.msrb.mxu0 %v34_v54 }
  0x98   :  { %478 = vmatmul.msk.bf16.vlgmr.msrb.gmra.mxu3 %vm82_vm0, %v278_v45 }
  0xa8   :  { %479 = vmatmul.msk.bf16.gmra.mxu3 %vm82_vm0, %v279_v48 }
 0x105   :  { %v98_v55 = vpop.f32.mrf.mxu0 }
 0x106   :  { %v108_v58 = vadd.f32 %v98_v55, %v74_v28 }
 0x10b   :  { %v103_v56 = vpop.f32.mrf.mxu3 }
 0x10c   :  { %v110_v0 = vadd.f32 %v103_v56, %v593_v20 }
 0x10d   :  { %v100_v57 = vpop.f32.mrf.mxu0 }
 0x10e   :  { %v109_v59 = vadd.f32 %v100_v57, %v75_v25 }
 0x110   :  { %v112_v60 = vpack.c.bf16 %v109_v59, %v108_v58 }
 0x112   :  { %474 = vmatmul.msk.bf16.vlgmr.msra.gmra.mxu1 %vm82_vm0, %v112_v60 }
 0x113   :  { %v105_v61 = vpop.f32.mrf.mxu3 }
 0x114   :  { %v111_v63 = vadd.f32 %v105_v61, %v77_v21 }
 0x116   :  { %v113_v1 = vpack.c.bf16 %v111_v63, %v110_v0 }
 0x11b   :  { %v295_v62 = vpop.f32.mrf.mxu3 }
 0x11c   :  { %v305_v3 = vadd.f32 %v295_v62, %v272_v40 }
 0x122   :  { %475 = vmatmul.msk.bf16.gmra.mxu1 %vm82_vm0, %v113_v1 }
 0x123   :  { %v297_v2 = vpop.f32.mrf.mxu3 }
 0x124   :  { %v306_v4 = vadd.f32 %v297_v2, %v273_v41 }
 0x126   :  { %v309_v5 = vpack.c.bf16 %v306_v4, %v305_v3 }
 0x128   :  { %480 = vmatmul.msk.bf16.vlgmr.msrb.gmra.mxu0 %vm82_vm0, %v309_v5 }
 0x12b   :  { %v300_v6 = vpop.f32.mrf.mxu3 }
 0x12c   :  { %v307_v8 = vadd.f32 %v300_v6, %v598_v23 }
 0x133   :  { %v302_v7 = vpop.f32.mrf.mxu3 }
 0x134   :  { %v308_v9 = vadd.f32 %v302_v7, %v600_v24 }
 0x136   :  { %v310_v10 = vpack.c.bf16 %v308_v9, %v307_v8 }
 0x138   :  { %481 = vmatmul.msk.bf16.gmra.mxu0 %vm82_vm0, %v310_v10 }
 0x18f   :  { %v129_v17 = vpop.f32.mrf.mxu1 }
 0x190   :  { %v139_v19 = vmax.f32 %v129_v17, 0.0 }
 0x197   :  { %v131_v18 = vpop.f32.mrf.mxu1 }
 0x198   :  { %v140_v20 = vmax.f32 %v131_v18, 0.0 }
 0x19a   :  { %v143_v21 = vpack.c.bf16 %v140_v20, %v139_v19 }
 0x19c   :  { %476 = vmatmul.msk.bf16.vlgmr.msra.gmra.mxu2 %vm82_vm0, %v143_v21 }
 0x19f   :  { %v134_v22 = vpop.f32.mrf.mxu1 }
 0x1a0   :  { %v141_v25 = vmax.f32 %v134_v22, 0.0 }
 0x1a5   :  { %v326_v23 = vpop.f32.mrf.mxu0 }
 0x1a6   :  { %v336_v29 = vmax.f32 %v326_v23, 0.0 }
 0x1a7   :  { %v136_v24 = vpop.f32.mrf.mxu1 }
 0x1a8   :  { %v142_v26 = vmax.f32 %v136_v24, 0.0 }
 0x1aa   :  { %v144_v27 = vpack.c.bf16 %v142_v26, %v141_v25 }
 0x1ac   :  { %477 = vmatmul.msk.bf16.gmra.mxu2 %vm82_vm0, %v144_v27 }
 0x1ad   :  { %v328_v28 = vpop.f32.mrf.mxu0 }
 0x1ae   :  { %v337_v30 = vmax.f32 %v328_v28, 0.0 }
 0x1b0   :  { %v340_v31 = vpack.c.bf16 %v337_v30, %v336_v29 }
 0x1b2   :  { %482 = vmatmul.msk.bf16.vlgmr.msrb.gmra.mxu1 %vm82_vm0, %v340_v31 }
 0x1b5   :  { %v331_v32 = vpop.f32.mrf.mxu0 }
 0x1b6   :  { %v338_v34 = vmax.f32 %v331_v32, 0.0 }
 0x1bd   :  { %v333_v33 = vpop.f32.mrf.mxu0 }
 0x1be   :  { %v339_v35 = vmax.f32 %v333_v33, 0.0 }
 0x1c0   :  { %v341_v36 = vpack.c.bf16 %v339_v35, %v338_v34 }
 0x1c2   :  { %483 = vmatmul.msk.bf16.gmra.mxu1 %vm82_vm0, %v341_v36 }
 0x21f   :  { %v674_v37 = vpop.f32.mrf.mxu2 }
 0x220   :  { %v170_v54 = vmul.f32 %v674_v37, %v674_v37 }
 0x222   :  { %v174_v56 = vsel %vm82_vm0, %v170_v54, 0.0 }
 0x227   :  { %v676_v38 = vpop.f32.mrf.mxu2 }
 0x228   :  { %v171_v55 = vmul.f32 %v676_v38, %v676_v38 }
 0x22a   :  { %v177_v57 = vsel %vm82_vm0, %v171_v55, 0.0 }
 0x22f   :  { %v678_v39 = vpop.f32.mrf.mxu1  ;;  %v683_v42 = vpop.f32.mrf.mxu2 }
 0x230   :  { %v367_v40 = vmul.f32 %v678_v39, %v678_v39  ;;  %v172_v43 = vmul.f32 %v683_v42, %v683_v42 }
 0x232   :  { %v371_v41 = vsel %vm82_vm0, %v367_v40, 0.0  ;;  %v180_v45 = vsel %vm82_vm0, %v172_v43, 0.0 }
 0x233   :  { %372 = vadd.xlane.f32.xlu1 %v371_v41 }
 0x237   :  { %v687_v44 = vpop.f32.mrf.mxu1  ;;  %v709_v58 = vpop.f32.mrf.mxu2 }
 0x238   :  { %v368_v49 = vmul.f32 %v687_v44, %v687_v44  ;;  %v173_v59 = vmul.f32 %v709_v58, %v709_v58 }
 0x23a   :  { %v374_v52 = vsel %vm82_vm0, %v368_v49, 0.0  ;;  %v183_v60 = vsel %vm82_vm0, %v173_v59, 0.0 }
 0x23b   :  { %181 = vadd.xlane.f32.xlu1 %v180_v45 }
 0x23f   :  { %v690_v46 = vpop.f32.mrf.mxu1 }
 0x240   :  { %v369_v47 = vmul.f32 %v690_v46, %v690_v46 }
 0x242   :  { %v377_v48 = vsel %vm82_vm0, %v369_v47, 0.0 }
 0x243   :  { %378 = vadd.xlane.f32.xlu2 %v377_v48 }
 0x247   :  { %v697_v50 = vpop.f32.mrf.mxu1 }
 0x248   :  { %v370_v51 = vmul.f32 %v697_v50, %v697_v50 }
 0x24a   :  { %v380_v53 = vsel %vm82_vm0, %v370_v51, 0.0 }
 0x24b   :  { %375 = vadd.xlane.f32.xlu2 %v374_v52  ;;  %381 = vadd.xlane.f32.xlu0 %v380_v53 }
 0x253   :  { %175 = vadd.xlane.f32.xlu2 %v174_v56  ;;  %178 = vadd.xlane.f32.xlu0 %v177_v57 }
 0x25b   :  { %184 = vadd.xlane.f32.xlu2 %v183_v60 }
 0x2a6   :  { %v373_v61 = vpop.xlane.xlu1 %372 }
 0x2a7   :  { %v714_v63 = vadd.f32 1e-12, %v373_v61 }
 0x2a9   :  { %vm393_vm11 = vweird.f32 %v714_v63 }
 0x2ae   :  { %v182_v18 = vpop.xlane.xlu1 %181 }
 0x2af   :  { %v732_v23 = vadd.f32 1e-12, %v182_v18 }
 0x2b6   :  { %v379_v62 = vpop.xlane.xlu2 %378 }
 0x2b7   :  { %v385_v0 = vadd.f32 1e-12, %v379_v62 }
 0x2b9   :  { %492 = vrsqrt.f32 %v385_v0  ;;  %vm413_vm2 = vweird.f32 %v385_v0 }
 0x2ba   :  { %494 = vrsqrt.f32 %v714_v63 }
 0x2be   :  { %v376_v1 = vpop.xlane.xlu2 %375  ;;  %v382_v2 = vpop.xlane.xlu0 %381 }
 0x2bf   :  { %v493_v3 = vpop.eup %492  ;;  %v384_v4 = vadd.f32 1e-12, %v376_v1  ;;  %v386_v5 = vadd.f32 1e-12, %v382_v2 }
 0x2c0   :  { %v408_v6 = vmul.f32 %v493_v3, %v385_v0  ;;  %v717_v7 = vpop.eup %494  ;;  %vm414_vm1 = vweird.f32 %v493_v3 }
 0x2c1   :  { %496 = vrsqrt.f32 %v384_v4  ;;  %v388_v9 = vmul.f32 %v717_v7, %v714_v63  ;;  %vm738_vm4 = vmor %vm413_vm2, %vm414_vm1  ;;  %vm423_vm6 = vweird.f32 %v386_v5  ;;  %vm394_vm7 = vweird.f32 %v717_v7 }
 0x2c2   :  { %v409_v8 = vmul.f32 %v493_v3, %v408_v6  ;;  %498 = vrsqrt.f32 %v386_v5  ;;  %vm403_vm9 = vweird.f32 %v384_v4  ;;  %vm764_vm12 = vmor %vm393_vm11, %vm394_vm7 }
 0x2c3   :  { %v389_v17 = vmul.f32 %v717_v7, %v388_v9 }
 0x2c4   :  { %v410_v10 = vmul.f32 0.5, %v409_v8 }
 0x2c5   :  { %v390_v25 = vmul.f32 0.5, %v389_v17 }
 0x2c6   :  { %v176_v11 = vpop.xlane.xlu2 %175  ;;  %v179_v12 = vpop.xlane.xlu0 %178  ;;  %v411_v21 = vsub.f32 1.5, %v410_v10 }
 0x2c7   :  { %v721_v13 = vpop.eup %496  ;;  %v723_v14 = vadd.f32 1e-12, %v176_v11  ;;  %v725_v15 = vadd.f32 1e-12, %v179_v12  ;;  %v391_v35 = vsub.f32 1.5, %v390_v25 }
 0x2c8   :  { %v499_v16 = vpop.eup %498  ;;  %v398_v19 = vmul.f32 %v721_v13, %v384_v4  ;;  %v412_v30 = vmul.f32 %v493_v3, %v411_v21  ;;  %vm404_vm5 = vweird.f32 %v721_v13 }
 0x2c9   :  { %v418_v20 = vmul.f32 %v499_v16, %v386_v5  ;;  %500 = vrsqrt.f32 %v723_v14  ;;  %vm424_vm3 = vweird.f32 %v499_v16  ;;  %v392_v53 = vmul.f32 %v717_v7, %v391_v35  ;;  %vm752_vm10 = vmor %vm403_vm9, %vm404_vm5 }
 0x2ca   :  { %v399_v22 = vmul.f32 %v721_v13, %v398_v19  ;;  %502 = vrsqrt.f32 %v725_v15  ;;  %v416_v45 = vsel %vm738_vm4, %v493_v3, %v412_v30  ;;  %vm425_vm8 = vmor %vm423_vm6, %vm424_vm3  ;;  %vm196_vm15 = vweird.f32 %v723_v14 }
 0x2cb   :  { %v419_v24 = vmul.f32 %v499_v16, %v418_v20  ;;  %504 = vrsqrt.f32 %v732_v23  ;;  %v429_v57 = vmul.f32 %v416_v45, %v690_v46  ;;  %v396_v63 = vsel %vm764_vm12, %v717_v7, %v392_v53 }
 0x2cc   :  { %v400_v26 = vmul.f32 0.5, %v399_v22  ;;  %vm206_vm2 = vweird.f32 %v725_v15  ;;  %v427_v8 = vmul.f32 %v396_v63, %v678_v39 }
 0x2cd   :  { %v420_v27 = vmul.f32 0.5, %v419_v24 }
 0x2ce   :  { %v401_v28 = vsub.f32 1.5, %v400_v26  ;;  %v185_v29 = vpop.xlane.xlu2 %184 }
 0x2cf   :  { %v501_v31 = vpop.eup %500  ;;  %v421_v32 = vsub.f32 1.5, %v420_v27  ;;  %v735_v33 = vadd.f32 1e-12, %v185_v29 }
 0x2d0   :  { %v503_v34 = vpop.eup %502  ;;  %v191_v36 = vmul.f32 %v501_v31, %v723_v14  ;;  %v402_v48 = vmul.f32 %v721_v13, %v401_v28  ;;  %vm197_vm13 = vweird.f32 %v501_v31 }
 0x2d1   :  { %v201_v41 = vmul.f32 %v503_v34, %v725_v15  ;;  %506 = vrsqrt.f32 %v735_v33  ;;  %v422_v47 = vmul.f32 %v499_v16, %v421_v32  ;;  %v505_v54 = vpop.eup %504  ;;  %vm207_vm14 = vweird.f32 %v503_v34  ;;  %vm198_vm1 = vmor %vm196_vm15, %vm197_vm13 }
 0x2d2   :  { %v192_v43 = vmul.f32 %v501_v31, %v191_v36  ;;  %v406_v61 = vsel %vm752_vm10, %v721_v13, %v402_v48  ;;  %v211_v6 = vmul.f32 %v505_v54, %v732_v23  ;;  %vm208_vm3 = vmor %vm206_vm2, %vm207_vm14  ;;  %vm217_vm5 = vweird.f32 %v505_v54 }
 0x2d3   :  { %v202_v49 = vmul.f32 %v503_v34, %v201_v41  ;;  %v426_v52 = vsel %vm425_vm8, %v499_v16, %v422_v47  ;;  %v428_v5 = vmul.f32 %v406_v61, %v687_v44  ;;  %vm226_vm6 = vweird.f32 %v735_v33 }
 0x2d4   :  { %v193_v51 = vmul.f32 0.5, %v192_v43  ;;  %v430_v59 = vmul.f32 %v426_v52, %v697_v50  ;;  %v212_v12 = vmul.f32 %v505_v54, %v211_v6  ;;  %vm216_vm8 = vweird.f32 %v732_v23 }
 0x2d5   :  { %v203_v56 = vmul.f32 0.5, %v202_v49  ;;  %v431_v7 = vpack.c.bf16 %v428_v5, %v427_v8  ;;  %vm218_vm9 = vmor %vm216_vm8, %vm217_vm5 }
 0x2d6   :  { %v194_v60 = vsub.f32 1.5, %v193_v51  ;;  %v432_v2 = vpack.c.bf16 %v430_v59, %v429_v57  ;;  %v213_v44 = vmul.f32 0.5, %v212_v12 }
 0x2d7   :  { %v507_v62 = vpop.eup %506  ;;  %v204_v1 = vsub.f32 1.5, %v203_v56  ;;  %v440_v17 = vsel %vm82_vm0, %v431_v7, 0 }
 0x2d8   :  { %v195_v46 = vmul.f32 %v501_v31, %v194_v60  ;;  %v221_v50 = vmul.f32 %v507_v62, %v735_v33  ;;  %v443_v4 = vsel %vm82_vm0, %v432_v2, 0  ;;  %v214_v20 = vsub.f32 1.5, %v213_v44 }
 0x2d9   :  { %v205_v3 = vmul.f32 %v503_v34, %v204_v1  ;;  %451 = vmatpush.bf16.xpose.msrb.mxu2 %v443_v4  ;;  %vm227_vm4 = vweird.f32 %v507_v62 }
 0x2da   :  { %v199_v9 = vsel %vm198_vm1, %v501_v31, %v195_v46  ;;  %v222_v11 = vmul.f32 %v507_v62, %v221_v50  ;;  %v215_v22 = vmul.f32 %v505_v54, %v214_v20  ;;  %vm228_vm7 = vmor %vm226_vm6, %vm227_vm4 }
 0x2db   :  { %v209_v10 = vsel %vm208_vm3, %v503_v34, %v205_v3  ;;  %v230_v13 = vmul.f32 50.0, %v199_v9 }
 0x2dc   :  { %v231_v14 = vmul.f32 50.0, %v209_v10  ;;  %v223_v16 = vmul.f32 0.5, %v222_v11  ;;  %v219_v25 = vsel %vm218_vm9, %v505_v54, %v215_v22 }
 0x2dd   :  { %v234_v18 = vmul.f32 %v230_v13, %v674_v37  ;;  %v232_v26 = vmul.f32 50.0, %v219_v25 }
 0x2de   :  { %v235_v15 = vmul.f32 %v231_v14, %v676_v38  ;;  %v224_v19 = vsub.f32 1.5, %v223_v16 }
 0x2df   :  { %v236_v27 = vmul.f32 %v232_v26, %v683_v42 }
 0x2e0   :  { %v238_v21 = vpack.c.bf16 %v235_v15, %v234_v18  ;;  %v225_v39 = vmul.f32 %v507_v62, %v224_v19 }
 0x2e1   :  { %452 = vmatpush.bf16.xpose.msrb.mxu2 %v440_v17 }
 0x2e2   :  { %v229_v24 = vsel %vm228_vm7, %v507_v62, %v225_v39 }
 0x2e3   :  { %v233_v37 = vmul.f32 50.0, %v229_v24 }
 0x2e5   :  { %v237_v38 = vmul.f32 %v233_v37, %v709_v58 }
 0x2e7   :  { %v239_v28 = vpack.c.bf16 %v237_v38, %v236_v27 }
 0x2e8   :  { %484 = vmatmul.msk.bf16.vlgmr.msrb.gmra.mxu2 %vm82_vm0, %v238_v21 }
 0x2f8   :  { %485 = vmatmul.msk.bf16.gmra.mxu2 %vm82_vm0, %v239_v28 }
 0x36b   :  { %v454_v29 = vpop.f32.mrf.mxu2 }
 0x36c   :  { %464 = vst.msk [vmem:[%s811_s8] sm:$0xff] %vm82_vm0, %v454_v29 }
 0x373   :  { %v456_v30 = vpop.f32.mrf.mxu2 }
 0x374   :  { %465 = vst.msk [vmem:[%s811_s8 + $0x8] sm:$0xff] %vm82_vm0, %v456_v30 }
 0x37b   :  { %v459_v23 = vpop.f32.mrf.mxu2 }
 0x37c   :  { %466 = vst.msk [vmem:[%s811_s8 + $0x10] sm:$0xff] %vm82_vm0, %v459_v23 }
 0x383   :  { %v461_v42 = vpop.f32.mrf.mxu2 }
 0x384   :  { %467 = vst.msk [vmem:[%s811_s8 + $0x18] sm:$0xff] %vm82_vm0, %v461_v42 }

// kernel: closed_call.37
= control target key start
LH: loop header
LB: loop body
LE: loop exit
PB: predicated region body
PF: predicated region fallthrough
CT: control target
= control target key end

     0   :  { %s2909_s23 = smov 0   ;;  %s4219_s0 = inlined_call_operand.<no memory space> [shape: s32[1], index: 0, kind: input, shape index: {}]   ;;  %s4220_s1 = inlined_call_operand.vmem [shape: f32[32,32], index: 1, kind: input, shape index: {}]   ;;  %s4221_s2 = inlined_call_operand.vmem [shape: f32[32,32], index: 2, kind: input, shape index: {}]   ;;  %s4222_s3 = inlined_call_operand.vmem [shape: f32[32,32], index: 3, kind: input, shape index: {}]   ;;  %s4223_s4 = inlined_call_operand.vmem [shape: f32[2,32,1], index: 4, kind: output, shape index: {0}]   ;;  %s4224_s5 = inlined_call_operand.vmem [shape: f32[2,1,32], index: 5, kind: output, shape index: {1}]   ;;  %s4225_s6 = inlined_call_operand.vmem [shape: f32[2,1,32], index: 6, kind: output, shape index: {2}]  }
   0x1   :  { %12 = sst [smem:[#allocation3]] %s4219_s0 }
   0x2 LB: > { %s2915_s24 = sadd.s32 4294967295, %s2868_s23   ;;  %p2360_p0 = scmp.ge.s32.totalorder %s2868_s23, 1  ;;  %s2868_s23 = sphi %s2909_s23, %s18_s23  }
   0x3   : > { %p184_p1 = scmp.lt.s32.totalorder %s2868_s23, 3 }
   0x5   : > { %p185_p2 = pnand %p2360_p0, %p184_p1 }
   0x6   : > { %s240_s25 = sld [smem:[#allocation3]] (!%p185_p2)  ;;  %s2375_s0 = sshll.u32 (!%p185_p2), %s2915_s24, 1 }
   0x7   : > { %188 = sbr.rel (%p185_p2) target bundleno = 3080 (0xc08), region = 32  ;;  %s352_s26 = sadd.s32 (!%p185_p2), 1, %s2375_s0 }
   0x8   : > { %s245_s27 = smul.u32 (!%p185_p2), 33555238, %s2915_s24  ;;  %p213_p3 = scmp.lt.s32.totalorder (!%p185_p2), %s2915_s24, 1 }
   0x9   : > { %s353_s28 = smul.u32 (!%p185_p2), 16777619, %s352_s26 }
   0xc   : > { %v225_v0 = vlaneseq  ;;  %s354_s29 = sadd.s32 %s353_s28, %s240_s25  ;;  %s246_s30 = sadd.s32 %s245_s27, %s240_s25  ;;  %vm459_vm0 = vcmask 261120   ;;  %vm2089_vm10 = vcmask 253952   ;;  %vm2075_vm11 = vcmask 7168  }
   0xd   : > { %s355_s7 = sshra.s32 %s354_s29, 16  ;;  %s247_s8 = sshra.s32 %s246_s30, 16 }
   0xe   : > { %v226_v1 = vshrl.u32 %v225_v0, 7  ;;  %s356_s9 = sand.u32 65535, %s355_s7  ;;  %s248_s10 = sand.u32 65535, %s247_s8  ;;  %v2921_v5 = vand.u32 127, %v225_v0 }
   0xf   : > { %s357_s11 = sxor.u32 %s356_s9, %s354_s29  ;;  %s249_s12 = sxor.u32 %s248_s10, %s246_s30 }
  0x10   : > { %v228_v2 = vadd.s32 16, %v226_v1  ;;  %v229_v3 = vadd.s32 24, %v226_v1  ;;  %s358_s13 = smul.u32 2146121005, %s357_s11  ;;  %v227_v4 = vadd.s32 8, %v226_v1  ;;  %v232_v6 = vmul.u32 32, %v226_v1 }
  0x11   : > { %s250_s14 = smul.u32 2146121005, %s249_s12  ;;  %vm2038_vm7 = vcmp.lt.s32.totalorder %v2921_v5, 16  ;;  %s4227_s24 = smov (!%p213_p3, %s2915_s24), 1 }
  0x12   : > { %s359_s15 = sshra.s32 %s358_s13, 15  ;;  %v234_v7 = vmul.u32 32, %v228_v2  ;;  %v235_v8 = vmul.u32 32, %v229_v3  ;;  %v233_v9 = vmul.u32 32, %v227_v4  ;;  %v236_v10 = vadd.s32 %v232_v6, %v2921_v5  ;;  %s220_s9 = scalar_lea.vmem %s4224_s5, %s4227_s24 }
  0x13   : > { %s360_s16 = sand.u32 131071, %s359_s15  ;;  %s251_s17 = sshra.s32 %s250_s14, 15 }
  0x14   : > { %s361_s18 = sxor.u32 %s360_s16, %s358_s13  ;;  %s252_s19 = sand.u32 131071, %s251_s17  ;;  %v238_v11 = vadd.s32 %v234_v7, %v2921_v5  ;;  %v239_v12 = vadd.s32 %v235_v8, %v2921_v5  ;;  %v237_v13 = vadd.s32 %v233_v9, %v2921_v5 }
  0x15   : > { %s362_s20 = smul.u32 2221516427, %s361_s18  ;;  %s253_s21 = sxor.u32 %s252_s19, %s250_s14 }
  0x16   : > { %s254_s22 = smul.u32 2221516427, %s253_s21  ;;  %s2398_s10 = sshll.u32 %s4227_s24, 5 }
  0x17   : > { %s363_s25 = sshra.s32 %s362_s20, 16  ;;  %s4192_s13 = scalar_lea.vmem %s4223_s4, %s2398_s10 }
  0x18   : > { %s364_s0 = sand.u32 65535, %s363_s25  ;;  %s255_s26 = sshra.s32 %s254_s22, 16 }
  0x19   : > { %s365_s27 = sxor.u32 %s364_s0, %s362_s20  ;;  %s256_s28 = sand.u32 65535, %s255_s26 }
  0x1a   : > { %v366_v14 = vstv %s365_s27  ;;  %s257_s29 = sxor.u32 %s256_s28, %s254_s22  ;;  %s223_s18 = scalar_lea.vmem %s4225_s6, %s4227_s24 }
  0x1b   : > { %v367_v15 = vxor.u32 %v366_v14, %v236_v10  ;;  %v258_v16 = vstv %s257_s29  ;;  %v369_v17 = vxor.u32 %v366_v14, %v238_v11  ;;  %v370_v18 = vxor.u32 %v366_v14, %v239_v12 }
  0x1c   : > { %v259_v19 = vxor.u32 %v258_v16, %v236_v10  ;;  %v368_v20 = vxor.u32 %v366_v14, %v237_v13  ;;  %v260_v21 = vxor.u32 %v258_v16, %v237_v13  ;;  %v261_v22 = vxor.u32 %v258_v16, %v238_v11 }
  0x1d   : > { %v2376_v23 = vshrl.u32 %v367_v15, 16  ;;  %v2378_v24 = vshrl.u32 %v369_v17, 16  ;;  %v2379_v25 = vshrl.u32 %v370_v18, 16  ;;  %v262_v26 = vxor.u32 %v258_v16, %v239_v12 }
  0x1e   : > { %v2363_v27 = vshrl.u32 %v259_v19, 16  ;;  %v2377_v28 = vshrl.u32 %v368_v20, 16  ;;  %v2364_v29 = vshrl.u32 %v260_v21, 16  ;;  %v2365_v30 = vshrl.u32 %v261_v22, 16 }
  0x1f   : > { %v379_v31 = vxor.u32 %v2376_v23, %v367_v15  ;;  %v381_v32 = vxor.u32 %v2378_v24, %v369_v17  ;;  %v382_v33 = vxor.u32 %v2379_v25, %v370_v18  ;;  %v2366_v34 = vshrl.u32 %v262_v26, 16 }
  0x20   : > { %v271_v35 = vxor.u32 %v2363_v27, %v259_v19  ;;  %v380_v36 = vxor.u32 %v2377_v28, %v368_v20  ;;  %v272_v37 = vxor.u32 %v2364_v29, %v260_v21  ;;  %v273_v38 = vxor.u32 %v2365_v30, %v261_v22 }
  0x21   : > { %v383_v39 = vmul.u32 2146121005, %v379_v31  ;;  %v385_v40 = vmul.u32 2146121005, %v381_v32  ;;  %v386_v41 = vmul.u32 2146121005, %v382_v33  ;;  %v274_v42 = vxor.u32 %v2366_v34, %v262_v26 }
  0x22   : > { %v275_v43 = vmul.u32 2146121005, %v271_v35  ;;  %v384_v44 = vmul.u32 2146121005, %v380_v36  ;;  %v276_v45 = vmul.u32 2146121005, %v272_v37 }
  0x23   : > { %v2380_v46 = vshrl.u32 %v383_v39, 15  ;;  %v2382_v47 = vshrl.u32 %v385_v40, 15  ;;  %v2383_v48 = vshrl.u32 %v386_v41, 15  ;;  %v277_v49 = vmul.u32 2146121005, %v273_v38 }
  0x24   : > { %v2367_v50 = vshrl.u32 %v275_v43, 15  ;;  %v2381_v51 = vshrl.u32 %v384_v44, 15  ;;  %v2368_v52 = vshrl.u32 %v276_v45, 15  ;;  %v278_v53 = vmul.u32 2146121005, %v274_v42 }
  0x25   : > { %v395_v54 = vxor.u32 %v2380_v46, %v383_v39  ;;  %v397_v55 = vxor.u32 %v2382_v47, %v385_v40  ;;  %v398_v56 = vxor.u32 %v2383_v48, %v386_v41  ;;  %v2369_v57 = vshrl.u32 %v277_v49, 15 }
  0x26   : > { %v287_v58 = vxor.u32 %v2367_v50, %v275_v43  ;;  %v396_v59 = vxor.u32 %v2381_v51, %v384_v44  ;;  %v288_v60 = vxor.u32 %v2368_v52, %v276_v45  ;;  %v2370_v61 = vshrl.u32 %v278_v53, 15 }
  0x27   : > { %v399_v62 = vmul.u32 2221516427, %v395_v54  ;;  %v401_v63 = vmul.u32 2221516427, %v397_v55  ;;  %v402_v0 = vmul.u32 2221516427, %v398_v56  ;;  %v289_v1 = vxor.u32 %v2369_v57, %v277_v49 }
  0x28   : > { %v291_v2 = vmul.u32 2221516427, %v287_v58  ;;  %v400_v3 = vmul.u32 2221516427, %v396_v59  ;;  %v292_v4 = vmul.u32 2221516427, %v288_v60  ;;  %v290_v6 = vxor.u32 %v2370_v61, %v278_v53 }
  0x29   : > { %v2384_v7 = vshrl.u32 %v399_v62, 16  ;;  %v2386_v8 = vshrl.u32 %v401_v63, 16  ;;  %v2387_v9 = vshrl.u32 %v402_v0, 16  ;;  %v293_v10 = vmul.u32 2221516427, %v289_v1 }
  0x2a   : > { %v2371_v11 = vshrl.u32 %v291_v2, 16  ;;  %v2385_v12 = vshrl.u32 %v400_v3, 16  ;;  %v2372_v13 = vshrl.u32 %v292_v4, 16  ;;  %v294_v17 = vmul.u32 2221516427, %v290_v6 }
  0x2b   : > { %v411_v14 = vxor.u32 %v2384_v7, %v399_v62  ;;  %v413_v15 = vxor.u32 %v2386_v8, %v401_v63  ;;  %v414_v16 = vxor.u32 %v2387_v9, %v402_v0  ;;  %v2373_v21 = vshrl.u32 %v293_v10, 16 }
  0x2c   : > { %v303_v18 = vxor.u32 %v2371_v11, %v291_v2  ;;  %v412_v19 = vxor.u32 %v2385_v12, %v400_v3  ;;  %v304_v20 = vxor.u32 %v2372_v13, %v292_v4  ;;  %v2374_v32 = vshrl.u32 %v294_v17, 16 }
  0x2d   : > { %v415_v22 = vand.u32 8388607, %v411_v14  ;;  %v417_v23 = vand.u32 8388607, %v413_v15  ;;  %v418_v24 = vand.u32 8388607, %v414_v16  ;;  %v305_v28 = vxor.u32 %v2373_v21, %v293_v10 }
  0x2e   : > { %v307_v25 = vand.u32 8388607, %v303_v18  ;;  %v416_v26 = vand.u32 8388607, %v412_v19  ;;  %v308_v27 = vand.u32 8388607, %v304_v20  ;;  %v306_v40 = vxor.u32 %v2374_v32, %v294_v17 }
  0x2f   : > { %v419_v29 = vcvt.s32.f32 %v415_v22  ;;  %v421_v30 = vcvt.s32.f32 %v417_v23  ;;  %v422_v31 = vcvt.s32.f32 %v418_v24  ;;  %v309_v36 = vand.u32 8388607, %v305_v28  ;;  %v241_v22 = vld [vmem:[%s4220_s1] sm:$0xff] }
  0x30   : > { %v311_v33 = vcvt.s32.f32 %v307_v25  ;;  %v420_v34 = vcvt.s32.f32 %v416_v26  ;;  %v312_v35 = vcvt.s32.f32 %v308_v27  ;;  %v310_v47 = vand.u32 8388607, %v306_v40 }
  0x31   : > { %v423_v37 = vadd.f32 0.5, %v419_v29  ;;  %v425_v38 = vadd.f32 0.5, %v421_v30  ;;  %v426_v39 = vadd.f32 0.5, %v422_v31  ;;  %v313_v44 = vcvt.s32.f32 %v309_v36  ;;  %v243_v29 = vld [vmem:[%s4220_s1 + $0x10] sm:$0xff] }
  0x32   : > { %v315_v41 = vadd.f32 0.5, %v311_v33  ;;  %v424_v42 = vadd.f32 0.5, %v420_v34  ;;  %v316_v43 = vadd.f32 0.5, %v312_v35  ;;  %v314_v52 = vcvt.s32.f32 %v310_v47 }
  0x33   : > { %v427_v45 = vmul.f32 1.1920929e-07, %v423_v37  ;;  %v429_v46 = vmul.f32 1.1920929e-07, %v425_v38  ;;  %v430_v49 = vmul.f32 1.1920929e-07, %v426_v39  ;;  %v317_v50 = vadd.f32 0.5, %v313_v44  ;;  %v242_v37 = vld [vmem:[%s4220_s1 + $0x8] sm:$0xff] }
  0x34   : > { %v319_v48 = vmul.f32 1.1920929e-07, %v315_v41  ;;  %v428_v51 = vmul.f32 1.1920929e-07, %v424_v42  ;;  %v320_v53 = vmul.f32 1.1920929e-07, %v316_v43  ;;  %v318_v55 = vadd.f32 0.5, %v314_v52 }
  0x35   : > { %2414 = vlog2.f32 %v427_v45  ;;  %v321_v54 = vmul.f32 1.1920929e-07, %v317_v50  ;;  %v244_v45 = vld [vmem:[%s4220_s1 + $0x18] sm:$0xff] }
  0x36   : > { %2416 = vlog2.f32 %v319_v48  ;;  %v322_v56 = vmul.f32 1.1920929e-07, %v318_v55 }
  0x37   : > { %2418 = vlog2.f32 %v429_v46 }
  0x38   : > { %2420 = vlog2.f32 %v430_v49 }
  0x39   : > { %2422 = vlog2.f32 %v428_v51 }
  0x3a   : > { %2424 = vlog2.f32 %v320_v53 }
  0x3b   : > { %v2415_v57 = vpop.eup %2414  ;;  %2426 = vlog2.f32 %v321_v54 }
  0x3c   : > { %v2417_v58 = vpop.eup %2416  ;;  %v432_v59 = vmul.f32 0.6931472, %v2415_v57  ;;  %2428 = vlog2.f32 %v322_v56 }
  0x3d   : > { %v2419_v60 = vpop.eup %2418  ;;  %v324_v61 = vmul.f32 0.6931472, %v2417_v58 }
  0x3e   : > { %v2421_v62 = vpop.eup %2420  ;;  %v439_v63 = vsub.f32 0.0, %v432_v59  ;;  %v436_v0 = vmul.f32 0.6931472, %v2419_v60 }
  0x3f   : > { %v2423_v1 = vpop.eup %2422  ;;  %v331_v2 = vsub.f32 0.0, %v324_v61  ;;  %v438_v3 = vmul.f32 0.6931472, %v2421_v62 }
  0x40   : > { %v2425_v4 = vpop.eup %2424  ;;  %2430 = vlog2.f32 %v439_v63  ;;  %v441_v6 = vsub.f32 0.0, %v436_v0  ;;  %v434_v7 = vmul.f32 0.6931472, %v2423_v1 }
  0x41   : > { %v2427_v8 = vpop.eup %2426  ;;  %2432 = vlog2.f32 %v331_v2  ;;  %v442_v9 = vsub.f32 0.0, %v438_v3  ;;  %v326_v10 = vmul.f32 0.6931472, %v2425_v4 }
  0x42   : > { %v2429_v11 = vpop.eup %2428  ;;  %2434 = vlog2.f32 %v441_v6  ;;  %v440_v12 = vsub.f32 0.0, %v434_v7  ;;  %v328_v13 = vmul.f32 0.6931472, %v2427_v8 }
  0x43   : > { %2436 = vlog2.f32 %v442_v9  ;;  %v332_v14 = vsub.f32 0.0, %v326_v10  ;;  %v330_v15 = vmul.f32 0.6931472, %v2429_v11 }
  0x44   : > { %2438 = vlog2.f32 %v440_v12  ;;  %v333_v16 = vsub.f32 0.0, %v328_v13 }
  0x45   : > { %2440 = vlog2.f32 %v332_v14  ;;  %v334_v17 = vsub.f32 0.0, %v330_v15 }
  0x46   : > { %v2431_v18 = vpop.eup %2430  ;;  %2442 = vlog2.f32 %v333_v16 }
  0x47   : > { %v2433_v19 = vpop.eup %2432  ;;  %v444_v20 = vmul.f32 0.6931472, %v2431_v18  ;;  %2444 = vlog2.f32 %v334_v17 }
  0x48   : > { %v2435_v21 = vpop.eup %2434  ;;  %v336_v23 = vmul.f32 0.6931472, %v2433_v19 }
  0x49   : > { %v2437_v24 = vpop.eup %2436  ;;  %v451_v25 = vsub.f32 0.0, %v444_v20  ;;  %v448_v26 = vmul.f32 0.6931472, %v2435_v21 }
  0x4a   : > { %v2439_v27 = vpop.eup %2438  ;;  %v343_v28 = vsub.f32 0.0, %v336_v23  ;;  %v450_v30 = vmul.f32 0.6931472, %v2437_v24 }
  0x4b   : > { %v2441_v31 = vpop.eup %2440  ;;  %v2933_v32 = vadd.f32 %v451_v25, %v241_v22  ;;  %v453_v33 = vsub.f32 0.0, %v448_v26  ;;  %v446_v34 = vmul.f32 0.6931472, %v2439_v27 }
  0x4c   : > { %v2443_v35 = vpop.eup %2442  ;;  %v2935_v36 = vadd.f32 %v343_v28, %v241_v22  ;;  %v338_v38 = vmul.f32 0.6931472, %v2441_v31  ;;  %v454_v41 = vsub.f32 0.0, %v450_v30 }
  0x4d   : > { %v472_v39 = vsel %vm459_vm0, %v2933_v32, -inf  ;;  %v2942_v40 = vadd.f32 %v453_v33, %v243_v29  ;;  %v452_v42 = vsub.f32 0.0, %v446_v34  ;;  %v2445_v43 = vpop.eup %2444  ;;  %v340_v49 = vmul.f32 0.6931472, %v2443_v35 }
  0x4e   : > { %473 = vmax.xlane.f32.xlu0 %v472_v39  ;;  %v460_v44 = vsel %vm459_vm0, %v2935_v36, -inf  ;;  %v344_v46 = vsub.f32 0.0, %v338_v38  ;;  %v2955_v51 = vadd.f32 %v454_v41, %v244_v45  ;;  %v342_v52 = vmul.f32 0.6931472, %v2445_v43 }
  0x4f   : > { %461 = vmax.xlane.f32.xlu2 %v460_v44  ;;  %v478_v47 = vsel %vm459_vm0, %v2942_v40, -inf  ;;  %v2951_v48 = vadd.f32 %v452_v42, %v242_v37  ;;  %v345_v54 = vsub.f32 0.0, %v340_v49 }
  0x50   : > { %479 = vmax.xlane.f32.xlu1 %v478_v47  ;;  %v2953_v50 = vadd.f32 %v344_v46, %v242_v37  ;;  %v481_v56 = vsel %vm459_vm0, %v2955_v51, -inf  ;;  %v346_v57 = vsub.f32 0.0, %v342_v52 }
  0x51   : > { %v475_v53 = vsel %vm459_vm0, %v2951_v48, -inf  ;;  %v2963_v58 = vadd.f32 %v345_v54, %v243_v29 }
  0x52   : > { %v463_v55 = vsel %vm459_vm0, %v2953_v50, -inf  ;;  %v2965_v59 = vadd.f32 %v346_v57, %v244_v45 }
  0x53   : > { %v466_v60 = vsel %vm459_vm0, %v2963_v58, -inf }
  0x54   : > { %v469_v61 = vsel %vm459_vm0, %v2965_v59, -inf }
  0x56   : > { %476 = vmax.xlane.f32.xlu0 %v475_v53 }
  0x57   : > { %464 = vmax.xlane.f32.xlu2 %v463_v55 }
  0x58   : > { %482 = vmax.xlane.f32.xlu1 %v481_v56 }
  0x5e   : > { %467 = vmax.xlane.f32.xlu0 %v466_v60 }
  0x60   : > { %470 = vmax.xlane.f32.xlu1 %v469_v61 }
  0xc1   : > { %v2971_v62 = vpop.xlane.xlu0 %473 }
  0xc2   : > { %v488_v63 = vsub.f32 %v2933_v32, %v2971_v62  ;;  %v2975_v0 = vpop.xlane.xlu2 %461 }
  0xc3   : > { %v2977_v1 = vpop.xlane.xlu1 %479  ;;  %v484_v7 = vsub.f32 %v2935_v36, %v2975_v0 }
  0xc4   : > { %v500_v2 = vmul.f32 1.442695, %v488_v63  ;;  %v490_v3 = vsub.f32 %v2942_v40, %v2977_v1 }
  0xc5   : > { %v492_v18 = vmul.f32 1.442695, %v484_v7 }
  0xc6   : > { %2446 = vpow2.f32 %v500_v2  ;;  %v504_v4 = vmul.f32 1.442695, %v490_v3 }
  0xc8   : > { %2448 = vpow2.f32 %v504_v4 }
  0xc9   : > { %v2981_v6 = vpop.xlane.xlu0 %476 }
  0xca   : > { %v489_v8 = vsub.f32 %v2951_v48, %v2981_v6  ;;  %v2987_v9 = vpop.xlane.xlu2 %464 }
  0xcb   : > { %v2989_v10 = vpop.xlane.xlu1 %482  ;;  %v485_v11 = vsub.f32 %v2953_v50, %v2987_v9 }
  0xcc   : > { %v2447_v12 = vpop.eup %2446  ;;  %v491_v13 = vsub.f32 %v2955_v51, %v2989_v10  ;;  %v502_v14 = vmul.f32 1.442695, %v489_v8 }
  0xcd   : > { %v494_v15 = vmul.f32 1.442695, %v485_v11  ;;  %v520_v16 = vsel %vm459_vm0, %v2447_v12, 0.0 }
  0xce   : > { %v2449_v17 = vpop.eup %2448  ;;  %v506_v19 = vmul.f32 1.442695, %v491_v13  ;;  %2450 = vpow2.f32 %v502_v14  ;;  %521 = vadd.xlane.f32.xlu2 %v520_v16 }
  0xcf   : > { %2452 = vpow2.f32 %v494_v15  ;;  %v526_v20 = vsel %vm459_vm0, %v2449_v17, 0.0 }
  0xd0   : > { %2454 = vpow2.f32 %v506_v19  ;;  %527 = vadd.xlane.f32.xlu1 %v526_v20 }
  0xd1   : > { %v2997_v21 = vpop.xlane.xlu0 %467  ;;  %2456 = vpow2.f32 %v492_v18 }
  0xd2   : > { %v486_v22 = vsub.f32 %v2963_v58, %v2997_v21 }
  0xd3   : > { %v3001_v23 = vpop.xlane.xlu1 %470 }
  0xd4   : > { %v2451_v24 = vpop.eup %2450  ;;  %v496_v25 = vmul.f32 1.442695, %v486_v22  ;;  %v487_v26 = vsub.f32 %v2965_v59, %v3001_v23 }
  0xd5   : > { %v2453_v27 = vpop.eup %2452  ;;  %v523_v28 = vsel %vm459_vm0, %v2451_v24, 0.0 }
  0xd6   : > { %v2455_v29 = vpop.eup %2454  ;;  %2458 = vpow2.f32 %v496_v25  ;;  %524 = vadd.xlane.f32.xlu0 %v523_v28  ;;  %v511_v30 = vsel %vm459_vm0, %v2453_v27, 0.0  ;;  %v498_v31 = vmul.f32 1.442695, %v487_v26 }
  0xd7   : > { %v529_v33 = vsel %vm459_vm0, %v2455_v29, 0.0  ;;  %v2457_v34 = vpop.eup %2456 }
  0xd8   : > { %530 = vadd.xlane.f32.xlu2 %v529_v33  ;;  %512 = vadd.xlane.f32.xlu1 %v511_v30  ;;  %2460 = vpow2.f32 %v498_v31  ;;  %v508_v35 = vsel %vm459_vm0, %v2457_v34, 0.0 }
  0xdc   : > { %v2459_v37 = vpop.eup %2458 }
  0xdd   : > { %v514_v38 = vsel %vm459_vm0, %v2459_v37, 0.0 }
  0xde   : > { %509 = vadd.xlane.f32.xlu0 %v508_v35  ;;  %v2461_v39 = vpop.eup %2460 }
  0xdf   : > { %v517_v41 = vsel %vm459_vm0, %v2461_v39, 0.0 }
  0xe0   : > { %515 = vadd.xlane.f32.xlu2 %v514_v38 }
  0xe6   : > { %518 = vadd.xlane.f32.xlu0 %v517_v41 }
 0x141   : > { %v522_v42 = vpop.xlane.xlu2 %521 }
 0x142   : > { %2462 = vlog2.f32 %v522_v42 }
 0x143   : > { %v528_v43 = vpop.xlane.xlu1 %527 }
 0x144   : > { %2464 = vlog2.f32 %v528_v43 }
 0x148   : > { %v2463_v44 = vpop.eup %2462 }
 0x149   : > { %v525_v45 = vpop.xlane.xlu0 %524  ;;  %v541_v52 = vmul.f32 0.6931472, %v2463_v44 }
 0x14a   : > { %v2465_v46 = vpop.eup %2464  ;;  %2466 = vlog2.f32 %v525_v45 }
 0x14b   : > { %v531_v47 = vpop.xlane.xlu2 %530  ;;  %v545_v49 = vmul.f32 0.6931472, %v2465_v46  ;;  %v513_v53 = vpop.xlane.xlu1 %512  ;;  %v552_v56 = vadd.f32 %v541_v52, %v2971_v62 }
 0x14c   : > { %2468 = vlog2.f32 %v531_v47 }
 0x14d   : > { %v554_v55 = vadd.f32 %v545_v49, %v2977_v1  ;;  %2470 = vlog2.f32 %v513_v53  ;;  %v3018_v4 = vsub.f32 %v2933_v32, %v552_v56 }
 0x14f   : > { %v3015_v3 = vsub.f32 %v2942_v40, %v554_v55 }
 0x150   : > { %v2467_v54 = vpop.eup %2466 }
 0x151   : > { %v543_v57 = vmul.f32 0.6931472, %v2467_v54  ;;  %v510_v60 = vpop.xlane.xlu0 %509  ;;  %v579_v12 = vsel %vm459_vm0, %v3015_v3, -inf }
 0x152   : > { %2472 = vlog2.f32 %v510_v60  ;;  %v2469_v61 = vpop.eup %2468 }
 0x153   : > { %v553_v63 = vadd.f32 %v543_v57, %v2981_v6  ;;  %v516_v2 = vpop.xlane.xlu2 %515  ;;  %v547_v7 = vmul.f32 0.6931472, %v2469_v61  ;;  %v2471_v8 = vpop.eup %2470  ;;  %v577_v6 = vsel %vm459_vm0, %v3018_v4, -inf }
 0x154   : > { %2474 = vlog2.f32 %v516_v2  ;;  %v580_v15 = vmax.f32 %v577_v6, %v579_v12  ;;  %v535_v16 = vmul.f32 0.6931472, %v2471_v8 }
 0x155   : > { %v3021_v1 = vsub.f32 %v2951_v48, %v553_v63  ;;  %v555_v62 = vadd.f32 %v547_v7, %v2989_v10 }
 0x156   : > { %v549_v24 = vadd.f32 %v535_v16, %v2987_v9 }
 0x157   : > { %v578_v40 = vsel %vm459_vm0, %v3021_v1, -inf  ;;  %v3031_v32 = vsub.f32 %v2955_v51, %v555_v62 }
 0x158   : > { %v2473_v11 = vpop.eup %2472  ;;  %v3045_v30 = vsub.f32 %v2953_v50, %v549_v24 }
 0x159   : > { %v533_v13 = vmul.f32 0.6931472, %v2473_v11  ;;  %v519_v14 = vpop.xlane.xlu0 %518  ;;  %v581_v10 = vsel %vm459_vm0, %v3031_v32, -inf }
 0x15a   : > { %v2475_v48 = vpop.eup %2474  ;;  %2476 = vlog2.f32 %v519_v14  ;;  %v582_v17 = vmax.f32 %v578_v40, %v581_v10 }
 0x15b   : > { %v537_v18 = vmul.f32 0.6931472, %v2475_v48  ;;  %v548_v20 = vadd.f32 %v533_v13, %v2975_v0 }
 0x15c   : > { %v583_v19 = vmax.f32 %v580_v15, %v582_v17 }
 0x15d   : > { %v550_v22 = vadd.f32 %v537_v18, %v2997_v21  ;;  %v3039_v27 = vsub.f32 %v2935_v36, %v548_v20 }
 0x15e   : > { %v584_v51 = vrot.slane %v583_v19, 4 }
 0x15f   : > { %v3042_v28 = vsub.f32 %v2963_v58, %v550_v22  ;;  %v564_v9 = vsel %vm459_vm0, %v3039_v27, -inf  ;;  %v565_v58 = vsel %vm459_vm0, %v3045_v30, -inf }
 0x160   : > { %v2477_v25 = vpop.eup %2476  ;;  %v585_v26 = vmax.f32 %v583_v19, %v584_v51 }
 0x161   : > { %v539_v29 = vmul.f32 0.6931472, %v2477_v25  ;;  %v566_v21 = vsel %vm459_vm0, %v3042_v28, -inf }
 0x162   : > { %v586_v31 = vrot.slane %v585_v26, 2  ;;  %v567_v35 = vmax.f32 %v564_v9, %v566_v21 }
 0x163   : > { %v551_v0 = vadd.f32 %v539_v29, %v3001_v23 }
 0x164   : > { %v587_v33 = vmax.f32 %v585_v26, %v586_v31 }
 0x165   : > { %v3053_v36 = vsub.f32 %v2965_v59, %v551_v0 }
 0x166   : > { %v588_v34 = vrot.slane %v587_v33, 1 }
 0x167   : > { %v568_v50 = vsel %vm459_vm0, %v3053_v36, -inf }
 0x168   : > { %v569_v37 = vmax.f32 %v565_v58, %v568_v50  ;;  %v3059_v23 = vmax.f32 %v587_v33, %v588_v34 }
 0x16a   : > { %v570_v38 = vmax.f32 %v567_v35, %v569_v37  ;;  %v594_v39 = vsub.f32 %v3018_v4, %v3059_v23  ;;  %v595_v41 = vsub.f32 %v3021_v1, %v3059_v23  ;;  %v596_v59 = vsub.f32 %v3015_v3, %v3059_v23 }
 0x16b   : > { %v597_v42 = vsub.f32 %v3031_v32, %v3059_v23 }
 0x16c   : > { %v571_v43 = vrot.slane %v570_v38, 4  ;;  %v606_v44 = vmul.f32 1.442695, %v594_v39  ;;  %v608_v45 = vmul.f32 1.442695, %v595_v41 }
 0x16d   : > { %v610_v46 = vmul.f32 1.442695, %v596_v59  ;;  %v612_v47 = vmul.f32 1.442695, %v597_v42 }
 0x16e   : > { %v572_v49 = vmax.f32 %v570_v38, %v571_v43  ;;  %2478 = vpow2.f32 %v606_v44 }
 0x16f   : > { %2480 = vpow2.f32 %v608_v45 }
 0x170   : > { %v573_v52 = vrot.slane %v572_v49, 2  ;;  %2482 = vpow2.f32 %v610_v46 }
 0x171   : > { %2484 = vpow2.f32 %v612_v47 }
 0x172   : > { %v574_v53 = vmax.f32 %v572_v49, %v573_v52 }
 0x174   : > { %v575_v54 = vrot.slane %v574_v53, 1  ;;  %v2479_v55 = vpop.eup %2478 }
 0x175   : > { %v2481_v56 = vpop.eup %2480  ;;  %v627_v57 = vsel %vm459_vm0, %v2479_v55, 0.0 }
 0x176   : > { %v3070_v60 = vmax.f32 %v574_v53, %v575_v54  ;;  %v2483_v61 = vpop.eup %2482  ;;  %v628_v63 = vsel %vm459_vm0, %v2481_v56, 0.0 }
 0x177   : > { %v2485_v2 = vpop.eup %2484  ;;  %v629_v7 = vadd.f32 %v628_v63, %v627_v57  ;;  %v630_v11 = vsel %vm459_vm0, %v2483_v61, 0.0 }
 0x178   : > { %v590_v62 = vsub.f32 %v3039_v27, %v3070_v60  ;;  %v591_v8 = vsub.f32 %v3045_v30, %v3070_v60  ;;  %v592_v12 = vsub.f32 %v3042_v28, %v3070_v60  ;;  %v593_v6 = vsub.f32 %v3053_v36, %v3070_v60 }
 0x179   : > { %v631_v40 = vadd.f32 %v630_v11, %v629_v7  ;;  %v632_v48 = vsel %vm459_vm0, %v2485_v2, 0.0 }
 0x17a   : > { %v598_v13 = vmul.f32 1.442695, %v590_v62  ;;  %v600_v14 = vmul.f32 1.442695, %v591_v8  ;;  %v602_v10 = vmul.f32 1.442695, %v592_v12 }
 0x17b   : > { %v604_v15 = vmul.f32 1.442695, %v593_v6  ;;  %v633_v16 = vadd.f32 %v632_v48, %v631_v40 }
 0x17c   : > { %2486 = vpow2.f32 %v598_v13 }
 0x17d   : > { %2488 = vpow2.f32 %v600_v14  ;;  %v634_v17 = vrot.slane %v633_v16, 4 }
 0x17e   : > { %2490 = vpow2.f32 %v602_v10 }
 0x17f   : > { %2492 = vpow2.f32 %v604_v15  ;;  %v635_v18 = vadd.f32 %v634_v17, %v633_v16 }
 0x181   : > { %v636_v20 = vrot.slane %v635_v18, 2 }
 0x182   : > { %v2487_v19 = vpop.eup %2486 }
 0x183   : > { %v2489_v22 = vpop.eup %2488  ;;  %v614_v24 = vsel %vm459_vm0, %v2487_v19, 0.0  ;;  %v637_v26 = vadd.f32 %v636_v20, %v635_v18 }
 0x184   : > { %v2491_v51 = vpop.eup %2490  ;;  %v615_v25 = vsel %vm459_vm0, %v2489_v22, 0.0 }
 0x185   : > { %v2493_v29 = vpop.eup %2492  ;;  %v616_v31 = vadd.f32 %v615_v25, %v614_v24  ;;  %v617_v0 = vsel %vm459_vm0, %v2491_v51, 0.0  ;;  %v638_v33 = vrot.slane %v637_v26, 1 }
 0x186   : > { %v619_v21 = vsel %vm459_vm0, %v2493_v29, 0.0 }
 0x187   : > { %v618_v9 = vadd.f32 %v617_v0, %v616_v31  ;;  %v639_v58 = vadd.f32 %v638_v33, %v637_v26 }
 0x189   : > { %v620_v34 = vadd.f32 %v619_v21, %v618_v9  ;;  %2494 = vlog2.f32 %v639_v58 }
 0x18b   : > { %v621_v50 = vrot.slane %v620_v34, 4 }
 0x18d   : > { %v622_v35 = vadd.f32 %v621_v50, %v620_v34 }
 0x18f   : > { %v623_v37 = vrot.slane %v622_v35, 2  ;;  %v2495_v38 = vpop.eup %2494 }
 0x190   : > { %v643_v39 = vmul.f32 0.6931472, %v2495_v38 }
 0x191   : > { %v624_v41 = vadd.f32 %v623_v37, %v622_v35 }
 0x192   : > { %v645_v59 = vadd.f32 %v643_v39, %v3059_v23 }
 0x193   : > { %v625_v42 = vrot.slane %v624_v41, 1 }
 0x194   : > { %v3089_v43 = vsub.f32 %v3015_v3, %v645_v59  ;;  %v3092_v44 = vsub.f32 %v3021_v1, %v645_v59  ;;  %v3095_v45 = vsub.f32 %v3018_v4, %v645_v59  ;;  %v3104_v3 = vsub.f32 %v3031_v32, %v645_v59 }
 0x195   : > { %v626_v46 = vadd.f32 %v625_v42, %v624_v41 }
 0x196   : > { %v672_v47 = vsel %vm459_vm0, %v3089_v43, -inf  ;;  %v669_v49 = vsel %vm459_vm0, %v3092_v44, -inf  ;;  %v666_v23 = vsel %vm459_vm0, %v3095_v45, -inf  ;;  %v675_v52 = vsel %vm459_vm0, %v3104_v3, -inf }
 0x197   : > { %673 = vmax.xlane.f32.xlu0 %v672_v47  ;;  %670 = vmax.xlane.f32.xlu2 %v669_v49  ;;  %2496 = vlog2.f32 %v626_v46 }
 0x198   : > { %667 = vmax.xlane.f32.xlu1 %v666_v23 }
 0x19d   : > { %v2497_v1 = vpop.eup %2496 }
 0x19e   : > { %v641_v4 = vmul.f32 0.6931472, %v2497_v1 }
 0x1a0   : > { %676 = vmax.xlane.f32.xlu1 %v675_v52  ;;  %v644_v53 = vadd.f32 %v641_v4, %v3070_v60 }
 0x1a2   : > { %v3110_v54 = vsub.f32 %v3042_v28, %v644_v53  ;;  %v3113_v55 = vsub.f32 %v3045_v30, %v644_v53  ;;  %v3116_v56 = vsub.f32 %v3039_v27, %v644_v53  ;;  %v3125_v28 = vsub.f32 %v3053_v36, %v644_v53 }
 0x1a4   : > { %v657_v32 = vsel %vm459_vm0, %v3113_v55, -inf  ;;  %v654_v57 = vsel %vm459_vm0, %v3116_v56, -inf  ;;  %v660_v61 = vsel %vm459_vm0, %v3110_v54, -inf  ;;  %v663_v30 = vsel %vm459_vm0, %v3125_v28, -inf }
 0x1a5   : > { %658 = vmax.xlane.f32.xlu0 %v657_v32  ;;  %655 = vmax.xlane.f32.xlu2 %v654_v57 }
 0x1a8   : > { %661 = vmax.xlane.f32.xlu1 %v660_v61 }
 0x1ad   : > { %664 = vmax.xlane.f32.xlu2 %v663_v30 }
 0x20a   : > { %v3129_v27 = vpop.xlane.xlu0 %673  ;;  %v3131_v60 = vpop.xlane.xlu2 %670 }
 0x20b   : > { %v684_v63 = vsub.f32 %v3089_v43, %v3129_v27  ;;  %v3135_v2 = vpop.xlane.xlu1 %667  ;;  %v683_v7 = vsub.f32 %v3092_v44, %v3131_v60 }
 0x20c   : > { %v682_v36 = vsub.f32 %v3095_v45, %v3135_v2 }
 0x20d   : > { %v698_v62 = vmul.f32 1.442695, %v684_v63  ;;  %v696_v8 = vmul.f32 1.442695, %v683_v7 }
 0x20e   : > { %v694_v11 = vmul.f32 1.442695, %v682_v36 }
 0x20f   : > { %2498 = vpow2.f32 %v698_v62 }
 0x210   : > { %2500 = vpow2.f32 %v694_v11 }
 0x211   : > { %2502 = vpow2.f32 %v696_v8 }
 0x213   : > { %v3141_v12 = vpop.xlane.xlu1 %676 }
 0x214   : > { %v685_v6 = vsub.f32 %v3104_v3, %v3141_v12 }
 0x215   : > { %v2499_v40 = vpop.eup %2498 }
 0x216   : > { %v2501_v13 = vpop.eup %2500  ;;  %v700_v14 = vmul.f32 1.442695, %v685_v6  ;;  %v720_v48 = vsel %vm459_vm0, %v2499_v40, 0.0 }
 0x217   : > { %v2503_v10 = vpop.eup %2502  ;;  %v714_v15 = vsel %vm459_vm0, %v2501_v13, 0.0  ;;  %721 = vadd.xlane.f32.xlu2 %v720_v48 }
 0x218   : > { %2504 = vpow2.f32 %v700_v14  ;;  %715 = vadd.xlane.f32.xlu0 %v714_v15  ;;  %v717_v16 = vsel %vm459_vm0, %v2503_v10, 0.0  ;;  %v3148_v17 = vpop.xlane.xlu0 %658  ;;  %v3150_v18 = vpop.xlane.xlu2 %655 }
 0x219   : > { %718 = vadd.xlane.f32.xlu1 %v717_v16  ;;  %v679_v19 = vsub.f32 %v3113_v55, %v3148_v17  ;;  %v678_v20 = vsub.f32 %v3116_v56, %v3150_v18 }
 0x21b   : > { %v3156_v22 = vpop.xlane.xlu1 %661  ;;  %v688_v24 = vmul.f32 1.442695, %v679_v19  ;;  %v686_v51 = vmul.f32 1.442695, %v678_v20 }
 0x21c   : > { %v680_v25 = vsub.f32 %v3110_v54, %v3156_v22 }
 0x21d   : > { %2506 = vpow2.f32 %v688_v24 }
 0x21e   : > { %v2505_v26 = vpop.eup %2504  ;;  %v690_v29 = vmul.f32 1.442695, %v680_v25  ;;  %2508 = vpow2.f32 %v686_v51 }
 0x21f   : > { %v723_v31 = vsel %vm459_vm0, %v2505_v26, 0.0 }
 0x220   : > { %2510 = vpow2.f32 %v690_v29  ;;  %724 = vadd.xlane.f32.xlu0 %v723_v31  ;;  %v3161_v0 = vpop.xlane.xlu2 %664 }
 0x221   : > { %v681_v33 = vsub.f32 %v3125_v28, %v3161_v0 }
 0x223   : > { %v2507_v9 = vpop.eup %2506  ;;  %v692_v21 = vmul.f32 1.442695, %v681_v33 }
 0x224   : > { %v2509_v58 = vpop.eup %2508  ;;  %v705_v34 = vsel %vm459_vm0, %v2507_v9, 0.0 }
 0x225   : > { %2512 = vpow2.f32 %v692_v21  ;;  %706 = vadd.xlane.f32.xlu2 %v705_v34  ;;  %v702_v50 = vsel %vm459_vm0, %v2509_v58, 0.0 }
 0x226   : > { %v2511_v35 = vpop.eup %2510  ;;  %703 = vadd.xlane.f32.xlu1 %v702_v50 }
 0x227   : > { %v708_v37 = vsel %vm459_vm0, %v2511_v35, 0.0 }
 0x228   : > { %709 = vadd.xlane.f32.xlu0 %v708_v37 }
 0x22b   : > { %v2513_v38 = vpop.eup %2512 }
 0x22c   : > { %v711_v39 = vsel %vm459_vm0, %v2513_v38, 0.0 }
 0x22e   : > { %712 = vadd.xlane.f32.xlu1 %v711_v39 }
 0x28a   : > { %v722_v41 = vpop.xlane.xlu2 %721 }
 0x28b   : > { %v716_v59 = vpop.xlane.xlu0 %715  ;;  %2514 = vlog2.f32 %v722_v41 }
 0x28c   : > { %2516 = vlog2.f32 %v716_v59  ;;  %v719_v42 = vpop.xlane.xlu1 %718 }
 0x28d   : > { %2518 = vlog2.f32 %v719_v42 }
 0x291   : > { %v2515_v46 = vpop.eup %2514 }
 0x292   : > { %v2517_v47 = vpop.eup %2516  ;;  %v739_v1 = vmul.f32 0.6931472, %v2515_v46 }
 0x293   : > { %v2519_v49 = vpop.eup %2518  ;;  %v735_v23 = vmul.f32 0.6931472, %v2517_v47  ;;  %v725_v4 = vpop.xlane.xlu0 %724 }
 0x294   : > { %2520 = vlog2.f32 %v725_v4  ;;  %v737_v52 = vmul.f32 0.6931472, %v2519_v49  ;;  %v748_v32 = vadd.f32 %v739_v1, %v3129_v27 }
 0x295   : > { %v746_v53 = vadd.f32 %v735_v23, %v3135_v2 }
 0x296   : > { %v747_v61 = vadd.f32 %v737_v52, %v3131_v60  ;;  %v3176_v36 = vsub.f32 %v3089_v43, %v748_v32 }
 0x297   : > { %v3173_v7 = vsub.f32 %v3095_v45, %v746_v53 }
 0x298   : > { %v707_v57 = vpop.xlane.xlu2 %706  ;;  %v3179_v2 = vsub.f32 %v3092_v44, %v747_v61  ;;  %v773_v6 = vsel %vm459_vm0, %v3176_v36, -inf }
 0x299   : > { %v704_v30 = vpop.xlane.xlu1 %703  ;;  %2522 = vlog2.f32 %v707_v57  ;;  %v771_v60 = vsel %vm459_vm0, %v3173_v7, -inf }
 0x29a   : > { %v2521_v63 = vpop.eup %2520  ;;  %2524 = vlog2.f32 %v704_v30  ;;  %v772_v40 = vsel %vm459_vm0, %v3179_v2, -inf }
 0x29b   : > { %v741_v62 = vmul.f32 0.6931472, %v2521_v63  ;;  %v710_v8 = vpop.xlane.xlu0 %709 }
 0x29c   : > { %2526 = vlog2.f32 %v710_v8 }
 0x29d   : > { %v749_v27 = vadd.f32 %v741_v62, %v3141_v12  ;;  %v774_v12 = vmax.f32 %v771_v60, %v773_v6 }
 0x29f   : > { %v2523_v11 = vpop.eup %2522  ;;  %v3187_v45 = vsub.f32 %v3104_v3, %v749_v27 }
 0x2a0   : > { %v2525_v43 = vpop.eup %2524  ;;  %v729_v16 = vmul.f32 0.6931472, %v2523_v11 }
 0x2a1   : > { %v775_v44 = vsel %vm459_vm0, %v3187_v45, -inf  ;;  %v713_v13 = vpop.xlane.xlu1 %712  ;;  %v727_v10 = vmul.f32 0.6931472, %v2525_v43 }
 0x2a2   : > { %v2527_v14 = vpop.eup %2526  ;;  %v776_v48 = vmax.f32 %v772_v40, %v775_v44  ;;  %2528 = vlog2.f32 %v713_v13  ;;  %v743_v51 = vadd.f32 %v729_v16, %v3148_v17 }
 0x2a3   : > { %v731_v15 = vmul.f32 0.6931472, %v2527_v14  ;;  %v742_v24 = vadd.f32 %v727_v10, %v3150_v18 }
 0x2a4   : > { %v777_v19 = vmax.f32 %v774_v12, %v776_v48  ;;  %v3203_v21 = vsub.f32 %v3113_v55, %v743_v51 }
 0x2a5   : > { %v744_v3 = vadd.f32 %v731_v15, %v3156_v22  ;;  %v3200_v9 = vsub.f32 %v3116_v56, %v742_v24 }
 0x2a6   : > { %v778_v20 = vrot.slane %v777_v19, 4  ;;  %v759_v56 = vsel %vm459_vm0, %v3203_v21, -inf }
 0x2a7   : > { %v3197_v33 = vsub.f32 %v3110_v54, %v744_v3  ;;  %v758_v54 = vsel %vm459_vm0, %v3200_v9, -inf }
 0x2a8   : > { %v2529_v25 = vpop.eup %2528  ;;  %v779_v26 = vmax.f32 %v777_v19, %v778_v20 }
 0x2a9   : > { %v733_v29 = vmul.f32 0.6931472, %v2529_v25  ;;  %v760_v34 = vsel %vm459_vm0, %v3197_v33, -inf }
 0x2aa   : > { %v780_v31 = vrot.slane %v779_v26, 2  ;;  %v761_v35 = vmax.f32 %v758_v54, %v760_v34 }
 0x2ab   : > { %v745_v58 = vadd.f32 %v733_v29, %v3161_v0 }
 0x2ac   : > { %v781_v22 = vmax.f32 %v779_v26, %v780_v31 }
 0x2ad   : > { %v3207_v18 = vsub.f32 %v3125_v28, %v745_v58 }
 0x2ae   : > { %v782_v17 = vrot.slane %v781_v22, 1 }
 0x2af   : > { %v762_v55 = vsel %vm459_vm0, %v3207_v18, -inf }
 0x2b0   : > { %v3217_v50 = vmax.f32 %v781_v22, %v782_v17  ;;  %v763_v0 = vmax.f32 %v759_v56, %v762_v55 }
 0x2b2   : > { %v788_v28 = vsub.f32 %v3173_v7, %v3217_v50  ;;  %v789_v37 = vsub.f32 %v3179_v2, %v3217_v50  ;;  %v790_v38 = vsub.f32 %v3176_v36, %v3217_v50  ;;  %v791_v39 = vsub.f32 %v3187_v45, %v3217_v50 }
 0x2b3   : > { %v764_v41 = vmax.f32 %v761_v35, %v763_v0 }
 0x2b4   : > { %v800_v59 = vmul.f32 1.442695, %v788_v28  ;;  %v802_v42 = vmul.f32 1.442695, %v789_v37  ;;  %v804_v46 = vmul.f32 1.442695, %v790_v38 }
 0x2b5   : > { %v806_v47 = vmul.f32 1.442695, %v791_v39  ;;  %v765_v49 = vrot.slane %v764_v41, 4 }
 0x2b6   : > { %2530 = vpow2.f32 %v800_v59 }
 0x2b7   : > { %2532 = vpow2.f32 %v802_v42  ;;  %v766_v23 = vmax.f32 %v764_v41, %v765_v49 }
 0x2b8   : > { %2534 = vpow2.f32 %v804_v46 }
 0x2b9   : > { %2536 = vpow2.f32 %v806_v47  ;;  %v767_v1 = vrot.slane %v766_v23, 2 }
 0x2bb   : > { %v768_v4 = vmax.f32 %v766_v23, %v767_v1 }
 0x2bc   : > { %v2531_v52 = vpop.eup %2530 }
 0x2bd   : > { %v2533_v53 = vpop.eup %2532  ;;  %v821_v32 = vsel %vm459_vm0, %v2531_v52, 0.0  ;;  %v769_v57 = vrot.slane %v768_v4, 1 }
 0x2be   : > { %v2535_v61 = vpop.eup %2534  ;;  %v822_v30 = vsel %vm459_vm0, %v2533_v53, 0.0 }
 0x2bf   : > { %v2537_v63 = vpop.eup %2536  ;;  %v823_v62 = vadd.f32 %v822_v30, %v821_v32  ;;  %v770_v8 = vmax.f32 %v768_v4, %v769_v57  ;;  %v824_v27 = vsel %vm459_vm0, %v2535_v61, 0.0 }
 0x2c0   : > { %v826_v40 = vsel %vm459_vm0, %v2537_v63, 0.0 }
 0x2c1   : > { %v825_v11 = vadd.f32 %v824_v27, %v823_v62  ;;  %v784_v60 = vsub.f32 %v3200_v9, %v770_v8  ;;  %v785_v6 = vsub.f32 %v3203_v21, %v770_v8  ;;  %v786_v43 = vsub.f32 %v3197_v33, %v770_v8 }
 0x2c2   : > { %v787_v44 = vsub.f32 %v3207_v18, %v770_v8 }
 0x2c3   : > { %v827_v13 = vadd.f32 %v826_v40, %v825_v11  ;;  %v792_v14 = vmul.f32 1.442695, %v784_v60  ;;  %v794_v12 = vmul.f32 1.442695, %v785_v6  ;;  %v796_v48 = vmul.f32 1.442695, %v786_v43 }
 0x2c4   : > { %v798_v10 = vmul.f32 1.442695, %v787_v44 }
 0x2c5   : > { %v828_v15 = vrot.slane %v827_v13, 4  ;;  %2538 = vpow2.f32 %v792_v14 }
 0x2c6   : > { %2540 = vpow2.f32 %v794_v12 }
 0x2c7   : > { %2542 = vpow2.f32 %v796_v48  ;;  %v829_v16 = vadd.f32 %v828_v15, %v827_v13 }
 0x2c8   : > { %2544 = vpow2.f32 %v798_v10 }
 0x2c9   : > { %v830_v19 = vrot.slane %v829_v16, 2 }
 0x2cb   : > { %v2539_v20 = vpop.eup %2538  ;;  %v831_v3 = vadd.f32 %v830_v19, %v829_v16 }
 0x2cc   : > { %v2541_v24 = vpop.eup %2540  ;;  %v808_v51 = vsel %vm459_vm0, %v2539_v20, 0.0 }
 0x2cd   : > { %v2543_v25 = vpop.eup %2542  ;;  %v809_v26 = vsel %vm459_vm0, %v2541_v24, 0.0  ;;  %v832_v29 = vrot.slane %v831_v3, 1 }
 0x2ce   : > { %v2545_v31 = vpop.eup %2544  ;;  %v810_v58 = vadd.f32 %v809_v26, %v808_v51  ;;  %v811_v22 = vsel %vm459_vm0, %v2543_v25, 0.0 }
 0x2cf   : > { %v833_v17 = vadd.f32 %v832_v29, %v831_v3  ;;  %v813_v54 = vsel %vm459_vm0, %v2545_v31, 0.0 }
 0x2d0   : > { %v812_v34 = vadd.f32 %v811_v22, %v810_v58 }
 0x2d1   : > { %2546 = vlog2.f32 %v833_v17 }
 0x2d2   : > { %v814_v56 = vadd.f32 %v813_v54, %v812_v34 }
 0x2d4   : > { %v815_v55 = vrot.slane %v814_v56, 4 }
 0x2d6   : > { %v816_v0 = vadd.f32 %v815_v55, %v814_v56 }
 0x2d7   : > { %v2547_v35 = vpop.eup %2546 }
 0x2d8   : > { %v837_v28 = vmul.f32 0.6931472, %v2547_v35  ;;  %v817_v37 = vrot.slane %v816_v0, 2 }
 0x2da   : > { %v839_v38 = vadd.f32 %v837_v28, %v3217_v50  ;;  %v818_v39 = vadd.f32 %v817_v37, %v816_v0 }
 0x2dc   : > { %v3241_v41 = vsub.f32 %v3176_v36, %v839_v38  ;;  %v3244_v59 = vsub.f32 %v3179_v2, %v839_v38  ;;  %v3247_v42 = vsub.f32 %v3173_v7, %v839_v38  ;;  %v819_v46 = vrot.slane %v818_v39, 1 }
 0x2dd   : > { %v3256_v2 = vsub.f32 %v3187_v45, %v839_v38 }
 0x2de   : > { %v866_v47 = vsel %vm459_vm0, %v3241_v41, -inf  ;;  %v863_v49 = vsel %vm459_vm0, %v3244_v59, -inf  ;;  %v860_v50 = vsel %vm459_vm0, %v3247_v42, -inf  ;;  %v820_v36 = vadd.f32 %v819_v46, %v818_v39 }
 0x2df   : > { %867 = vmax.xlane.f32.xlu1 %v866_v47  ;;  %864 = vmax.xlane.f32.xlu0 %v863_v49  ;;  %v869_v23 = vsel %vm459_vm0, %v3256_v2, -inf }
 0x2e0   : > { %861 = vmax.xlane.f32.xlu2 %v860_v50  ;;  %2548 = vlog2.f32 %v820_v36 }
 0x2e6   : > { %v2549_v7 = vpop.eup %2548 }
 0x2e7   : > { %v835_v1 = vmul.f32 0.6931472, %v2549_v7 }
 0x2e8   : > { %870 = vmax.xlane.f32.xlu2 %v869_v23 }
 0x2e9   : > { %v838_v4 = vadd.f32 %v835_v1, %v770_v8 }
 0x2eb   : > { %v3261_v52 = vsub.f32 %v3197_v33, %v838_v4  ;;  %v3264_v53 = vsub.f32 %v3203_v21, %v838_v4  ;;  %v3267_v32 = vsub.f32 %v3200_v9, %v838_v4  ;;  %v3276_v33 = vsub.f32 %v3207_v18, %v838_v4 }
 0x2ed   : > { %v854_v45 = vsel %vm459_vm0, %v3261_v52, -inf  ;;  %v851_v57 = vsel %vm459_vm0, %v3264_v53, -inf  ;;  %v848_v61 = vsel %vm459_vm0, %v3267_v32, -inf  ;;  %v857_v21 = vsel %vm459_vm0, %v3276_v33, -inf }
 0x2ee   : > { %852 = vmax.xlane.f32.xlu1 %v851_v57  ;;  %849 = vmax.xlane.f32.xlu0 %v848_v61 }
 0x2f0   : > { %855 = vmax.xlane.f32.xlu2 %v854_v45 }
 0x2f6   : > { %858 = vmax.xlane.f32.xlu0 %v857_v21 }
 0x352   : > { %v3280_v9 = vpop.xlane.xlu1 %867  ;;  %v3282_v30 = vpop.xlane.xlu0 %864 }
 0x353   : > { %v878_v63 = vsub.f32 %v3241_v41, %v3280_v9  ;;  %v877_v62 = vsub.f32 %v3244_v59, %v3282_v30  ;;  %v3288_v8 = vpop.xlane.xlu2 %861 }
 0x354   : > { %v876_v18 = vsub.f32 %v3247_v42, %v3288_v8 }
 0x355   : > { %v892_v27 = vmul.f32 1.442695, %v878_v63  ;;  %v890_v11 = vmul.f32 1.442695, %v877_v62 }
 0x356   : > { %v888_v60 = vmul.f32 1.442695, %v876_v18 }
 0x357   : > { %2550 = vpow2.f32 %v892_v27 }
 0x358   : > { %2552 = vpow2.f32 %v890_v11 }
 0x359   : > { %2554 = vpow2.f32 %v888_v60 }
 0x35b   : > { %v3292_v6 = vpop.xlane.xlu2 %870 }
 0x35c   : > { %v879_v43 = vsub.f32 %v3256_v2, %v3292_v6 }
 0x35d   : > { %v2551_v40 = vpop.eup %2550 }
 0x35e   : > { %v2553_v44 = vpop.eup %2552  ;;  %v894_v13 = vmul.f32 1.442695, %v879_v43  ;;  %v914_v14 = vsel %vm459_vm0, %v2551_v40, 0.0 }
 0x35f   : > { %v2555_v12 = vpop.eup %2554  ;;  %v911_v48 = vsel %vm459_vm0, %v2553_v44, 0.0  ;;  %915 = vadd.xlane.f32.xlu0 %v914_v14 }
 0x360   : > { %2556 = vpow2.f32 %v894_v13  ;;  %912 = vadd.xlane.f32.xlu2 %v911_v48  ;;  %v908_v10 = vsel %vm459_vm0, %v2555_v12, 0.0 }
 0x361   : > { %909 = vadd.xlane.f32.xlu1 %v908_v10  ;;  %v3299_v15 = vpop.xlane.xlu1 %852  ;;  %v3301_v16 = vpop.xlane.xlu0 %849 }
 0x362   : > { %v873_v19 = vsub.f32 %v3264_v53, %v3299_v15  ;;  %v872_v20 = vsub.f32 %v3267_v32, %v3301_v16 }
 0x363   : > { %v3307_v3 = vpop.xlane.xlu2 %855 }
 0x364   : > { %v874_v24 = vsub.f32 %v3261_v52, %v3307_v3  ;;  %v882_v51 = vmul.f32 1.442695, %v873_v19  ;;  %v880_v25 = vmul.f32 1.442695, %v872_v20 }
 0x366   : > { %v2557_v26 = vpop.eup %2556  ;;  %v884_v29 = vmul.f32 1.442695, %v874_v24  ;;  %2558 = vpow2.f32 %v882_v51 }
 0x367   : > { %v917_v31 = vsel %vm459_vm0, %v2557_v26, 0.0  ;;  %2560 = vpow2.f32 %v880_v25 }
 0x368   : > { %2562 = vpow2.f32 %v884_v29 }
 0x369   : > { %918 = vadd.xlane.f32.xlu1 %v917_v31  ;;  %v3312_v58 = vpop.xlane.xlu0 %858 }
 0x36a   : > { %v875_v22 = vsub.f32 %v3276_v33, %v3312_v58 }
 0x36c   : > { %v2559_v17 = vpop.eup %2558  ;;  %v886_v34 = vmul.f32 1.442695, %v875_v22 }
 0x36d   : > { %v2561_v54 = vpop.eup %2560  ;;  %v899_v56 = vsel %vm459_vm0, %v2559_v17, 0.0 }
 0x36e   : > { %v2563_v55 = vpop.eup %2562  ;;  %2564 = vpow2.f32 %v886_v34  ;;  %900 = vadd.xlane.f32.xlu0 %v899_v56  ;;  %v896_v0 = vsel %vm459_vm0, %v2561_v54, 0.0 }
 0x36f   : > { %897 = vadd.xlane.f32.xlu2 %v896_v0  ;;  %v902_v35 = vsel %vm459_vm0, %v2563_v55, 0.0 }
 0x371   : > { %903 = vadd.xlane.f32.xlu1 %v902_v35 }
 0x374   : > { %v2565_v28 = vpop.eup %2564 }
 0x375   : > { %v905_v37 = vsel %vm459_vm0, %v2565_v28, 0.0 }
 0x377   : > { %906 = vadd.xlane.f32.xlu2 %v905_v37 }
 0x3d2   : > { %v916_v38 = vpop.xlane.xlu0 %915 }
 0x3d3   : > { %2566 = vlog2.f32 %v916_v38  ;;  %v913_v39 = vpop.xlane.xlu2 %912 }
 0x3d4   : > { %v910_v46 = vpop.xlane.xlu1 %909  ;;  %2568 = vlog2.f32 %v913_v39 }
 0x3d5   : > { %2570 = vlog2.f32 %v910_v46 }
 0x3d9   : > { %v2567_v47 = vpop.eup %2566 }
 0x3da   : > { %v2569_v49 = vpop.eup %2568  ;;  %v933_v36 = vmul.f32 0.6931472, %v2567_v47 }
 0x3db   : > { %v2571_v50 = vpop.eup %2570  ;;  %v931_v1 = vmul.f32 0.6931472, %v2569_v49 }
 0x3dc   : > { %v929_v7 = vmul.f32 0.6931472, %v2571_v50  ;;  %v919_v23 = vpop.xlane.xlu1 %918  ;;  %v942_v4 = vadd.f32 %v933_v36, %v3280_v9 }
 0x3dd   : > { %2572 = vlog2.f32 %v919_v23  ;;  %v941_v57 = vadd.f32 %v931_v1, %v3282_v30 }
 0x3de   : > { %v940_v45 = vadd.f32 %v929_v7, %v3288_v8  ;;  %v3324_v62 = vsub.f32 %v3241_v41, %v942_v4 }
 0x3df   : > { %v3330_v9 = vsub.f32 %v3244_v59, %v941_v57 }
 0x3e0   : > { %v3327_v18 = vsub.f32 %v3247_v42, %v940_v45  ;;  %v967_v30 = vsel %vm459_vm0, %v3324_v62, -inf }
 0x3e1   : > { %v901_v61 = vpop.xlane.xlu0 %900  ;;  %v966_v40 = vsel %vm459_vm0, %v3330_v9, -inf }
 0x3e2   : > { %2574 = vlog2.f32 %v901_v61  ;;  %v898_v63 = vpop.xlane.xlu2 %897  ;;  %v965_v60 = vsel %vm459_vm0, %v3327_v18, -inf }
 0x3e3   : > { %v2573_v21 = vpop.eup %2572  ;;  %2576 = vlog2.f32 %v898_v63  ;;  %v968_v13 = vmax.f32 %v965_v60, %v967_v30 }
 0x3e4   : > { %v935_v27 = vmul.f32 0.6931472, %v2573_v21  ;;  %v904_v11 = vpop.xlane.xlu1 %903 }
 0x3e5   : > { %2578 = vlog2.f32 %v904_v11 }
 0x3e6   : > { %v943_v8 = vadd.f32 %v935_v27, %v3292_v6 }
 0x3e8   : > { %v3338_v41 = vsub.f32 %v3256_v2, %v943_v8  ;;  %v2575_v42 = vpop.eup %2574 }
 0x3e9   : > { %v2577_v43 = vpop.eup %2576  ;;  %v923_v19 = vmul.f32 0.6931472, %v2575_v42 }
 0x3ea   : > { %v969_v59 = vsel %vm459_vm0, %v3338_v41, -inf  ;;  %v921_v14 = vmul.f32 0.6931472, %v2577_v43  ;;  %v907_v12 = vpop.xlane.xlu2 %906 }
 0x3eb   : > { %v2579_v44 = vpop.eup %2578  ;;  %v970_v6 = vmax.f32 %v966_v40, %v969_v59  ;;  %2580 = vlog2.f32 %v907_v12  ;;  %v937_v25 = vadd.f32 %v923_v19, %v3299_v15 }
 0x3ec   : > { %v925_v48 = vmul.f32 0.6931472, %v2579_v44  ;;  %v936_v24 = vadd.f32 %v921_v14, %v3301_v16 }
 0x3ed   : > { %v971_v10 = vmax.f32 %v968_v13, %v970_v6  ;;  %v3354_v54 = vsub.f32 %v3264_v53, %v937_v25 }
 0x3ee   : > { %v938_v2 = vadd.f32 %v925_v48, %v3307_v3  ;;  %v3351_v22 = vsub.f32 %v3267_v32, %v936_v24 }
 0x3ef   : > { %v972_v20 = vrot.slane %v971_v10, 4  ;;  %v953_v32 = vsel %vm459_vm0, %v3354_v54, -inf }
 0x3f0   : > { %v3348_v31 = vsub.f32 %v3261_v52, %v938_v2  ;;  %v952_v15 = vsel %vm459_vm0, %v3351_v22, -inf }
 0x3f1   : > { %v973_v51 = vmax.f32 %v971_v10, %v972_v20  ;;  %v2581_v26 = vpop.eup %2580 }
 0x3f2   : > { %v927_v17 = vmul.f32 0.6931472, %v2581_v26  ;;  %v954_v16 = vsel %vm459_vm0, %v3348_v31, -inf }
 0x3f3   : > { %v974_v29 = vrot.slane %v973_v51, 2  ;;  %v955_v0 = vmax.f32 %v952_v15, %v954_v16 }
 0x3f4   : > { %v939_v3 = vadd.f32 %v927_v17, %v3312_v58 }
 0x3f5   : > { %v975_v34 = vmax.f32 %v973_v51, %v974_v29 }
 0x3f6   : > { %v3362_v52 = vsub.f32 %v3276_v33, %v939_v3 }
 0x3f7   : > { %v976_v56 = vrot.slane %v975_v34, 1 }
 0x3f8   : > { %v956_v53 = vsel %vm459_vm0, %v3362_v52, -inf }
 0x3f9   : > { %v3364_v55 = vmax.f32 %v975_v34, %v976_v56  ;;  %v957_v58 = vmax.f32 %v953_v32, %v956_v53 }
 0x3fb   : > { %v982_v35 = vsub.f32 %v3327_v18, %v3364_v55  ;;  %v983_v28 = vsub.f32 %v3330_v9, %v3364_v55  ;;  %v984_v33 = vsub.f32 %v3324_v62, %v3364_v55  ;;  %v985_v37 = vsub.f32 %v3338_v41, %v3364_v55 }
 0x3fc   : > { %v958_v38 = vmax.f32 %v955_v0, %v957_v58 }
 0x3fd   : > { %v994_v39 = vmul.f32 1.442695, %v982_v35  ;;  %v996_v46 = vmul.f32 1.442695, %v983_v28  ;;  %v998_v47 = vmul.f32 1.442695, %v984_v33 }
 0x3fe   : > { %v1000_v49 = vmul.f32 1.442695, %v985_v37  ;;  %v959_v50 = vrot.slane %v958_v38, 4 }
 0x3ff   : > { %2582 = vpow2.f32 %v994_v39 }
 0x400   : > { %2584 = vpow2.f32 %v996_v46  ;;  %v960_v36 = vmax.f32 %v958_v38, %v959_v50 }
 0x401   : > { %2586 = vpow2.f32 %v998_v47 }
 0x402   : > { %2588 = vpow2.f32 %v1000_v49  ;;  %v961_v7 = vrot.slane %v960_v36, 2 }
 0x404   : > { %v962_v23 = vmax.f32 %v960_v36, %v961_v7 }
 0x405   : > { %v2583_v1 = vpop.eup %2582 }
 0x406   : > { %v2585_v4 = vpop.eup %2584  ;;  %v1015_v45 = vsel %vm459_vm0, %v2583_v1, 0.0  ;;  %v963_v57 = vrot.slane %v962_v23, 1 }
 0x407   : > { %v2587_v61 = vpop.eup %2586  ;;  %v1016_v21 = vsel %vm459_vm0, %v2585_v4, 0.0 }
 0x408   : > { %v2589_v63 = vpop.eup %2588  ;;  %v1017_v27 = vadd.f32 %v1016_v21, %v1015_v45  ;;  %v964_v11 = vmax.f32 %v962_v23, %v963_v57  ;;  %v1018_v8 = vsel %vm459_vm0, %v2587_v61, 0.0 }
 0x409   : > { %v1020_v40 = vsel %vm459_vm0, %v2589_v63, 0.0 }
 0x40a   : > { %v1019_v30 = vadd.f32 %v1018_v8, %v1017_v27  ;;  %v978_v60 = vsub.f32 %v3351_v22, %v964_v11  ;;  %v979_v42 = vsub.f32 %v3354_v54, %v964_v11  ;;  %v980_v43 = vsub.f32 %v3348_v31, %v964_v11 }
 0x40b   : > { %v981_v59 = vsub.f32 %v3362_v52, %v964_v11 }
 0x40c   : > { %v1021_v44 = vadd.f32 %v1020_v40, %v1019_v30  ;;  %v986_v13 = vmul.f32 1.442695, %v978_v60  ;;  %v988_v6 = vmul.f32 1.442695, %v979_v42  ;;  %v990_v14 = vmul.f32 1.442695, %v980_v43 }
 0x40d   : > { %v992_v12 = vmul.f32 1.442695, %v981_v59 }
 0x40e   : > { %v1022_v48 = vrot.slane %v1021_v44, 4  ;;  %2590 = vpow2.f32 %v986_v13 }
 0x40f   : > { %2592 = vpow2.f32 %v988_v6 }
 0x410   : > { %2594 = vpow2.f32 %v990_v14  ;;  %v1023_v10 = vadd.f32 %v1022_v48, %v1021_v44 }
 0x411   : > { %2596 = vpow2.f32 %v992_v12 }
 0x412   : > { %v1024_v19 = vrot.slane %v1023_v10, 2 }
 0x414   : > { %v2591_v20 = vpop.eup %2590  ;;  %v1025_v2 = vadd.f32 %v1024_v19, %v1023_v10 }
 0x415   : > { %v2593_v24 = vpop.eup %2592  ;;  %v1002_v51 = vsel %vm459_vm0, %v2591_v20, 0.0 }
 0x416   : > { %v2595_v25 = vpop.eup %2594  ;;  %v1003_v26 = vsel %vm459_vm0, %v2593_v24, 0.0  ;;  %v1026_v29 = vrot.slane %v1025_v2, 1 }
 0x417   : > { %v2597_v17 = vpop.eup %2596  ;;  %v1004_v34 = vadd.f32 %v1003_v26, %v1002_v51  ;;  %v1005_v3 = vsel %vm459_vm0, %v2595_v25, 0.0 }
 0x418   : > { %v1027_v56 = vadd.f32 %v1026_v29, %v1025_v2  ;;  %v1007_v15 = vsel %vm459_vm0, %v2597_v17, 0.0 }
 0x419   : > { %v1006_v16 = vadd.f32 %v1005_v3, %v1004_v34 }
 0x41a   : > { %2598 = vlog2.f32 %v1027_v56 }
 0x41b   : > { %v1008_v32 = vadd.f32 %v1007_v15, %v1006_v16 }
 0x41d   : > { %v1009_v53 = vrot.slane %v1008_v32, 4 }
 0x41f   : > { %v1010_v0 = vadd.f32 %v1009_v53, %v1008_v32 }
 0x420   : > { %v2599_v58 = vpop.eup %2598 }
 0x421   : > { %v1031_v35 = vmul.f32 0.6931472, %v2599_v58  ;;  %v1011_v28 = vrot.slane %v1010_v0, 2 }
 0x423   : > { %v1033_v33 = vadd.f32 %v1031_v35, %v3364_v55  ;;  %v1012_v37 = vadd.f32 %v1011_v28, %v1010_v0 }
 0x425   : > { %v3392_v38 = vsub.f32 %v3324_v62, %v1033_v33  ;;  %v3395_v39 = vsub.f32 %v3330_v9, %v1033_v33  ;;  %v3398_v46 = vsub.f32 %v3327_v18, %v1033_v33  ;;  %v1013_v47 = vrot.slane %v1012_v37, 1 }
 0x426   : > { %v3407_v9 = vsub.f32 %v3338_v41, %v1033_v33 }
 0x427   : > { %v1060_v49 = vsel %vm459_vm0, %v3392_v38, -inf  ;;  %v1057_v50 = vsel %vm459_vm0, %v3395_v39, -inf  ;;  %v1054_v55 = vsel %vm459_vm0, %v3398_v46, -inf  ;;  %v1014_v62 = vadd.f32 %v1013_v47, %v1012_v37 }
 0x428   : > { %1061 = vmax.xlane.f32.xlu2 %v1060_v49  ;;  %1058 = vmax.xlane.f32.xlu1 %v1057_v50  ;;  %v1063_v36 = vsel %vm459_vm0, %v3407_v9, -inf }
 0x429   : > { %1055 = vmax.xlane.f32.xlu0 %v1054_v55  ;;  %2600 = vlog2.f32 %v1014_v62 }
 0x42f   : > { %v2601_v18 = vpop.eup %2600 }
 0x430   : > { %v1029_v7 = vmul.f32 0.6931472, %v2601_v18 }
 0x431   : > { %1064 = vmax.xlane.f32.xlu0 %v1063_v36 }
 0x432   : > { %v1032_v23 = vadd.f32 %v1029_v7, %v964_v11 }
 0x434   : > { %v3412_v1 = vsub.f32 %v3348_v31, %v1032_v23  ;;  %v3415_v4 = vsub.f32 %v3354_v54, %v1032_v23  ;;  %v3418_v45 = vsub.f32 %v3351_v22, %v1032_v23  ;;  %v3427_v31 = vsub.f32 %v3362_v52, %v1032_v23 }
 0x436   : > { %v1048_v41 = vsel %vm459_vm0, %v3412_v1, -inf  ;;  %v1045_v57 = vsel %vm459_vm0, %v3415_v4, -inf  ;;  %v1042_v61 = vsel %vm459_vm0, %v3418_v45, -inf  ;;  %v1051_v54 = vsel %vm459_vm0, %v3427_v31, -inf }
 0x437   : > { %1046 = vmax.xlane.f32.xlu2 %v1045_v57  ;;  %1043 = vmax.xlane.f32.xlu1 %v1042_v61 }
 0x439   : > { %1049 = vmax.xlane.f32.xlu0 %v1048_v41 }
 0x43f   : > { %1052 = vmax.xlane.f32.xlu1 %v1051_v54 }
 0x49b   : > { %v3431_v22 = vpop.xlane.xlu1 %1058  ;;  %v3433_v21 = vpop.xlane.xlu2 %1061 }
 0x49c   : > { %v1071_v63 = vsub.f32 %v3395_v39, %v3431_v22  ;;  %v3437_v27 = vpop.xlane.xlu0 %1055  ;;  %v1072_v11 = vsub.f32 %v3392_v38, %v3433_v21 }
 0x49d   : > { %v1070_v52 = vsub.f32 %v3398_v46, %v3437_v27 }
 0x49e   : > { %v1084_v8 = vmul.f32 1.442695, %v1071_v63  ;;  %v1086_v30 = vmul.f32 1.442695, %v1072_v11 }
 0x49f   : > { %v1082_v60 = vmul.f32 1.442695, %v1070_v52 }
 0x4a0   : > { %2602 = vpow2.f32 %v1084_v8 }
 0x4a1   : > { %2604 = vpow2.f32 %v1082_v60 }
 0x4a2   : > { %2606 = vpow2.f32 %v1086_v30 }
 0x4a4   : > { %v3443_v42 = vpop.xlane.xlu0 %1064 }
 0x4a5   : > { %v1073_v43 = vsub.f32 %v3407_v9, %v3443_v42 }
 0x4a6   : > { %v2603_v40 = vpop.eup %2602 }
 0x4a7   : > { %v2605_v59 = vpop.eup %2604  ;;  %v1088_v44 = vmul.f32 1.442695, %v1073_v43  ;;  %v1105_v13 = vsel %vm459_vm0, %v2603_v40, 0.0 }
 0x4a8   : > { %v2607_v6 = vpop.eup %2606  ;;  %1106 = vadd.xlane.f32.xlu0 %v1105_v13  ;;  %v1102_v14 = vsel %vm459_vm0, %v2605_v59, 0.0 }
 0x4a9   : > { %2608 = vpow2.f32 %v1088_v44  ;;  %1103 = vadd.xlane.f32.xlu2 %v1102_v14  ;;  %v1108_v12 = vsel %vm459_vm0, %v2607_v6, 0.0 }
 0x4aa   : > { %1109 = vadd.xlane.f32.xlu1 %v1108_v12  ;;  %v3450_v48 = vpop.xlane.xlu1 %1043  ;;  %v3452_v10 = vpop.xlane.xlu2 %1046 }
 0x4ab   : > { %v1066_v20 = vsub.f32 %v3418_v45, %v3450_v48  ;;  %v1067_v2 = vsub.f32 %v3415_v4, %v3452_v10 }
 0x4ac   : > { %v3454_v19 = vpop.xlane.xlu0 %1049 }
 0x4ad   : > { %v1068_v24 = vsub.f32 %v3412_v1, %v3454_v19  ;;  %v1074_v51 = vmul.f32 1.442695, %v1066_v20  ;;  %v1076_v25 = vmul.f32 1.442695, %v1067_v2 }
 0x4af   : > { %v2609_v26 = vpop.eup %2608  ;;  %v1078_v29 = vmul.f32 1.442695, %v1068_v24  ;;  %2610 = vpow2.f32 %v1074_v51 }
 0x4b0   : > { %v1111_v17 = vsel %vm459_vm0, %v2609_v26, 0.0 }
 0x4b1   : > { %2612 = vpow2.f32 %v1078_v29  ;;  %1112 = vadd.xlane.f32.xlu2 %v1111_v17 }
 0x4b2   : > { %2614 = vpow2.f32 %v1076_v25  ;;  %v3463_v34 = vpop.xlane.xlu1 %1052 }
 0x4b3   : > { %v1069_v3 = vsub.f32 %v3427_v31, %v3463_v34 }
 0x4b5   : > { %v2611_v56 = vpop.eup %2610  ;;  %v1080_v16 = vmul.f32 1.442695, %v1069_v3 }
 0x4b6   : > { %v1090_v32 = vsel %vm459_vm0, %v2611_v56, 0.0 }
 0x4b7   : > { %v2613_v15 = vpop.eup %2612  ;;  %2616 = vpow2.f32 %v1080_v16  ;;  %1091 = vadd.xlane.f32.xlu0 %v1090_v32 }
 0x4b8   : > { %v2615_v53 = vpop.eup %2614  ;;  %v1096_v0 = vsel %vm459_vm0, %v2613_v15, 0.0 }
 0x4b9   : > { %1097 = vadd.xlane.f32.xlu2 %v1096_v0  ;;  %v1093_v58 = vsel %vm459_vm0, %v2615_v53, 0.0 }
 0x4ba   : > { %1094 = vadd.xlane.f32.xlu1 %v1093_v58 }
 0x4bd   : > { %v2617_v35 = vpop.eup %2616 }
 0x4be   : > { %v1099_v28 = vsel %vm459_vm0, %v2617_v35, 0.0 }
 0x4bf   : > { %1100 = vadd.xlane.f32.xlu0 %v1099_v28 }
 0x51b   : > { %v1107_v33 = vpop.xlane.xlu0 %1106 }
 0x51c   : > { %2618 = vlog2.f32 %v1107_v33  ;;  %v1104_v37 = vpop.xlane.xlu2 %1103 }
 0x51d   : > { %v1110_v47 = vpop.xlane.xlu1 %1109  ;;  %2620 = vlog2.f32 %v1104_v37 }
 0x51e   : > { %2622 = vlog2.f32 %v1110_v47 }
 0x522   : > { %v2619_v49 = vpop.eup %2618 }
 0x523   : > { %v2621_v50 = vpop.eup %2620  ;;  %v1125_v7 = vmul.f32 0.6931472, %v2619_v49 }
 0x524   : > { %v2623_v55 = vpop.eup %2622  ;;  %v1123_v62 = vmul.f32 0.6931472, %v2621_v50  ;;  %v1113_v18 = vpop.xlane.xlu2 %1112 }
 0x525   : > { %v1127_v36 = vmul.f32 0.6931472, %v2623_v55  ;;  %2624 = vlog2.f32 %v1113_v18  ;;  %v1135_v57 = vadd.f32 %v1125_v7, %v3431_v22 }
 0x526   : > { %v1134_v41 = vadd.f32 %v1123_v62, %v3437_v27 }
 0x527   : > { %v1136_v23 = vadd.f32 %v1127_v36, %v3433_v21  ;;  %v3481_v60 = vsub.f32 %v3395_v39, %v1135_v57 }
 0x528   : > { %v3478_v11 = vsub.f32 %v3398_v46, %v1134_v41 }
 0x529   : > { %v3475_v63 = vsub.f32 %v3392_v38, %v1136_v23  ;;  %v1160_v43 = vsel %vm459_vm0, %v3481_v60, -inf }
 0x52a   : > { %v1092_v54 = vpop.xlane.xlu0 %1091  ;;  %v1159_v38 = vsel %vm459_vm0, %v3478_v11, -inf }
 0x52b   : > { %v2625_v61 = vpop.eup %2624  ;;  %2626 = vlog2.f32 %v1092_v54  ;;  %v1161_v22 = vsel %vm459_vm0, %v3475_v63, -inf }
 0x52c   : > { %v1129_v52 = vmul.f32 0.6931472, %v2625_v61  ;;  %v1098_v8 = vpop.xlane.xlu2 %1097  ;;  %v1162_v59 = vmax.f32 %v1159_v38, %v1161_v22 }
 0x52d   : > { %v1095_v30 = vpop.xlane.xlu1 %1094  ;;  %2628 = vlog2.f32 %v1098_v8 }
 0x52e   : > { %v1137_v21 = vadd.f32 %v1129_v52, %v3443_v42  ;;  %2630 = vlog2.f32 %v1095_v30 }
 0x530   : > { %v3489_v46 = vsub.f32 %v3407_v9, %v1137_v21 }
 0x531   : > { %v2627_v27 = vpop.eup %2626 }
 0x532   : > { %v1163_v39 = vsel %vm459_vm0, %v3489_v46, -inf  ;;  %v1115_v44 = vmul.f32 0.6931472, %v2627_v27  ;;  %v1101_v13 = vpop.xlane.xlu0 %1100 }
 0x533   : > { %v2629_v40 = vpop.eup %2628  ;;  %v1164_v42 = vmax.f32 %v1160_v43, %v1163_v39  ;;  %2632 = vlog2.f32 %v1101_v13 }
 0x534   : > { %v2631_v6 = vpop.eup %2630  ;;  %v1119_v14 = vmul.f32 0.6931472, %v2629_v40  ;;  %v1130_v9 = vadd.f32 %v1115_v44, %v3450_v48 }
 0x535   : > { %v1165_v12 = vmax.f32 %v1162_v59, %v1164_v42  ;;  %v1117_v20 = vmul.f32 0.6931472, %v2631_v6 }
 0x536   : > { %v1132_v24 = vadd.f32 %v1119_v14, %v3454_v19  ;;  %v3499_v17 = vsub.f32 %v3418_v45, %v1130_v9 }
 0x537   : > { %v1166_v2 = vrot.slane %v1165_v12, 4  ;;  %v1131_v25 = vadd.f32 %v1117_v20, %v3452_v10 }
 0x538   : > { %v3502_v3 = vsub.f32 %v3412_v1, %v1132_v24  ;;  %v1146_v19 = vsel %vm459_vm0, %v3499_v17, -inf }
 0x539   : > { %v1167_v51 = vmax.f32 %v1165_v12, %v1166_v2  ;;  %v2633_v26 = vpop.eup %2632  ;;  %v3505_v15 = vsub.f32 %v3415_v4, %v1131_v25 }
 0x53a   : > { %v1121_v56 = vmul.f32 0.6931472, %v2633_v26  ;;  %v1148_v10 = vsel %vm459_vm0, %v3502_v3, -inf }
 0x53b   : > { %v1168_v29 = vrot.slane %v1167_v51, 2  ;;  %v1147_v1 = vsel %vm459_vm0, %v3505_v15, -inf  ;;  %v1149_v0 = vmax.f32 %v1146_v19, %v1148_v10 }
 0x53c   : > { %v1133_v48 = vadd.f32 %v1121_v56, %v3463_v34 }
 0x53d   : > { %v1169_v16 = vmax.f32 %v1167_v51, %v1168_v29 }
 0x53e   : > { %v3513_v45 = vsub.f32 %v3427_v31, %v1133_v48 }
 0x53f   : > { %v1170_v32 = vrot.slane %v1169_v16, 1 }
 0x540   : > { %v1150_v4 = vsel %vm459_vm0, %v3513_v45, -inf }
 0x541   : > { %v3515_v53 = vmax.f32 %v1169_v16, %v1170_v32  ;;  %v1151_v34 = vmax.f32 %v1147_v1, %v1150_v4 }
 0x543   : > { %v1176_v58 = vsub.f32 %v3478_v11, %v3515_v53  ;;  %v1177_v35 = vsub.f32 %v3481_v60, %v3515_v53  ;;  %v1178_v31 = vsub.f32 %v3475_v63, %v3515_v53  ;;  %v1179_v28 = vsub.f32 %v3489_v46, %v3515_v53 }
 0x544   : > { %v1152_v33 = vmax.f32 %v1149_v0, %v1151_v34 }
 0x545   : > { %v1188_v37 = vmul.f32 1.442695, %v1176_v58  ;;  %v1190_v47 = vmul.f32 1.442695, %v1177_v35  ;;  %v1192_v49 = vmul.f32 1.442695, %v1178_v31 }
 0x546   : > { %v1194_v50 = vmul.f32 1.442695, %v1179_v28  ;;  %v1153_v55 = vrot.slane %v1152_v33, 4 }
 0x547   : > { %2634 = vpow2.f32 %v1188_v37 }
 0x548   : > { %2636 = vpow2.f32 %v1190_v47  ;;  %v1154_v62 = vmax.f32 %v1152_v33, %v1153_v55 }
 0x549   : > { %2638 = vpow2.f32 %v1192_v49 }
 0x54a   : > { %2640 = vpow2.f32 %v1194_v50  ;;  %v1155_v18 = vrot.slane %v1154_v62, 2 }
 0x54c   : > { %v1156_v36 = vmax.f32 %v1154_v62, %v1155_v18 }
 0x54d   : > { %v2635_v7 = vpop.eup %2634 }
 0x54e   : > { %v2637_v23 = vpop.eup %2636  ;;  %v1209_v41 = vsel %vm459_vm0, %v2635_v7, 0.0  ;;  %v1157_v57 = vrot.slane %v1156_v36, 1 }
 0x54f   : > { %v2639_v61 = vpop.eup %2638  ;;  %v1210_v54 = vsel %vm459_vm0, %v2637_v23, 0.0 }
 0x550   : > { %v2641_v52 = vpop.eup %2640  ;;  %v1211_v8 = vadd.f32 %v1210_v54, %v1209_v41  ;;  %v1158_v30 = vmax.f32 %v1156_v36, %v1157_v57  ;;  %v1212_v21 = vsel %vm459_vm0, %v2639_v61, 0.0 }
 0x551   : > { %v1214_v39 = vsel %vm459_vm0, %v2641_v52, 0.0 }
 0x552   : > { %v1213_v22 = vadd.f32 %v1212_v21, %v1211_v8  ;;  %v1172_v38 = vsub.f32 %v3499_v17, %v1158_v30  ;;  %v1173_v27 = vsub.f32 %v3505_v15, %v1158_v30  ;;  %v1174_v43 = vsub.f32 %v3502_v3, %v1158_v30 }
 0x553   : > { %v1175_v40 = vsub.f32 %v3513_v45, %v1158_v30 }
 0x554   : > { %v1215_v59 = vadd.f32 %v1214_v39, %v1213_v22  ;;  %v1180_v42 = vmul.f32 1.442695, %v1172_v38  ;;  %v1182_v44 = vmul.f32 1.442695, %v1173_v27  ;;  %v1184_v13 = vmul.f32 1.442695, %v1174_v43 }
 0x555   : > { %v1186_v6 = vmul.f32 1.442695, %v1175_v40 }
 0x556   : > { %v1216_v14 = vrot.slane %v1215_v59, 4  ;;  %2642 = vpow2.f32 %v1180_v42 }
 0x557   : > { %2644 = vpow2.f32 %v1182_v44 }
 0x558   : > { %2646 = vpow2.f32 %v1184_v13  ;;  %v1217_v12 = vadd.f32 %v1216_v14, %v1215_v59 }
 0x559   : > { %2648 = vpow2.f32 %v1186_v6 }
 0x55a   : > { %v1218_v20 = vrot.slane %v1217_v12, 2 }
 0x55c   : > { %v2643_v2 = vpop.eup %2642  ;;  %v1219_v9 = vadd.f32 %v1218_v20, %v1217_v12 }
 0x55d   : > { %v2645_v24 = vpop.eup %2644  ;;  %v1196_v51 = vsel %vm459_vm0, %v2643_v2, 0.0 }
 0x55e   : > { %v2647_v25 = vpop.eup %2646  ;;  %v1197_v26 = vsel %vm459_vm0, %v2645_v24, 0.0  ;;  %v1220_v29 = vrot.slane %v1219_v9, 1 }
 0x55f   : > { %v2649_v56 = vpop.eup %2648  ;;  %v1198_v16 = vadd.f32 %v1197_v26, %v1196_v51  ;;  %v1199_v48 = vsel %vm459_vm0, %v2647_v25, 0.0 }
 0x560   : > { %v1221_v32 = vadd.f32 %v1220_v29, %v1219_v9  ;;  %v1201_v10 = vsel %vm459_vm0, %v2649_v56, 0.0 }
 0x561   : > { %v1200_v19 = vadd.f32 %v1199_v48, %v1198_v16 }
 0x562   : > { %2650 = vlog2.f32 %v1221_v32 }
 0x563   : > { %v1202_v1 = vadd.f32 %v1201_v10, %v1200_v19 }
 0x565   : > { %v1203_v4 = vrot.slane %v1202_v1, 4 }
 0x567   : > { %v1204_v0 = vadd.f32 %v1203_v4, %v1202_v1 }
 0x568   : > { %v2651_v34 = vpop.eup %2650 }
 0x569   : > { %v1225_v58 = vmul.f32 0.6931472, %v2651_v34  ;;  %v1205_v35 = vrot.slane %v1204_v0, 2 }
 0x56b   : > { %v1227_v31 = vadd.f32 %v1225_v58, %v3515_v53  ;;  %v1206_v28 = vadd.f32 %v1205_v35, %v1204_v0 }
 0x56d   : > { %v3543_v33 = vsub.f32 %v3475_v63, %v1227_v31  ;;  %v3546_v37 = vsub.f32 %v3481_v60, %v1227_v31  ;;  %v3549_v47 = vsub.f32 %v3478_v11, %v1227_v31  ;;  %v1207_v49 = vrot.slane %v1206_v28, 1 }
 0x56e   : > { %v3558_v60 = vsub.f32 %v3489_v46, %v1227_v31 }
 0x56f   : > { %v1254_v50 = vsel %vm459_vm0, %v3543_v33, -inf  ;;  %v1251_v55 = vsel %vm459_vm0, %v3546_v37, -inf  ;;  %v1248_v53 = vsel %vm459_vm0, %v3549_v47, -inf  ;;  %v1208_v63 = vadd.f32 %v1207_v49, %v1206_v28 }
 0x570   : > { %1255 = vmax.xlane.f32.xlu0 %v1254_v50  ;;  %1252 = vmax.xlane.f32.xlu2 %v1251_v55  ;;  %v1257_v62 = vsel %vm459_vm0, %v3558_v60, -inf }
 0x571   : > { %1249 = vmax.xlane.f32.xlu1 %v1248_v53  ;;  %2652 = vlog2.f32 %v1208_v63 }
 0x577   : > { %v2653_v11 = vpop.eup %2652 }
 0x578   : > { %v1223_v18 = vmul.f32 0.6931472, %v2653_v11 }
 0x579   : > { %1258 = vmax.xlane.f32.xlu1 %v1257_v62 }
 0x57a   : > { %v1226_v36 = vadd.f32 %v1223_v18, %v1158_v30 }
 0x57c   : > { %v3563_v7 = vsub.f32 %v3502_v3, %v1226_v36  ;;  %v3566_v23 = vsub.f32 %v3505_v15, %v1226_v36  ;;  %v3569_v41 = vsub.f32 %v3499_v17, %v1226_v36  ;;  %v3578_v3 = vsub.f32 %v3513_v45, %v1226_v36 }
 0x57e   : > { %v1242_v46 = vsel %vm459_vm0, %v3563_v7, -inf  ;;  %v1239_v57 = vsel %vm459_vm0, %v3566_v23, -inf  ;;  %v1236_v61 = vsel %vm459_vm0, %v3569_v41, -inf  ;;  %v1245_v15 = vsel %vm459_vm0, %v3578_v3, -inf }
 0x57f   : > { %1240 = vmax.xlane.f32.xlu0 %v1239_v57  ;;  %1237 = vmax.xlane.f32.xlu2 %v1236_v61 }
 0x581   : > { %1243 = vmax.xlane.f32.xlu1 %v1242_v46 }
 0x587   : > { %1246 = vmax.xlane.f32.xlu2 %v1245_v15 }
 0x5e3   : > { %v3582_v17 = vpop.xlane.xlu0 %1255  ;;  %v3584_v54 = vpop.xlane.xlu2 %1252 }
 0x5e4   : > { %v1266_v52 = vsub.f32 %v3543_v33, %v3582_v17  ;;  %v3588_v8 = vpop.xlane.xlu1 %1249  ;;  %v1265_v30 = vsub.f32 %v3546_v37, %v3584_v54 }
 0x5e5   : > { %v1264_v45 = vsub.f32 %v3549_v47, %v3588_v8 }
 0x5e6   : > { %v1280_v21 = vmul.f32 1.442695, %v1266_v52  ;;  %v1278_v22 = vmul.f32 1.442695, %v1265_v30 }
 0x5e7   : > { %v1276_v38 = vmul.f32 1.442695, %v1264_v45 }
 0x5e8   : > { %2654 = vpow2.f32 %v1280_v21 }
 0x5e9   : > { %2656 = vpow2.f32 %v1276_v38 }
 0x5ea   : > { %2658 = vpow2.f32 %v1278_v22 }
 0x5ec   : > { %v3594_v27 = vpop.xlane.xlu1 %1258 }
 0x5ed   : > { %v1267_v43 = vsub.f32 %v3558_v60, %v3594_v27 }
 0x5ee   : > { %v2655_v39 = vpop.eup %2654 }
 0x5ef   : > { %v2657_v40 = vpop.eup %2656  ;;  %v1282_v59 = vmul.f32 1.442695, %v1267_v43  ;;  %v1302_v42 = vsel %vm459_vm0, %v2655_v39, 0.0 }
 0x5f0   : > { %v2659_v44 = vpop.eup %2658  ;;  %v1296_v13 = vsel %vm459_vm0, %v2657_v40, 0.0  ;;  %1303 = vadd.xlane.f32.xlu2 %v1302_v42 }
 0x5f1   : > { %2660 = vpow2.f32 %v1282_v59  ;;  %1297 = vadd.xlane.f32.xlu0 %v1296_v13  ;;  %v1299_v6 = vsel %vm459_vm0, %v2659_v44, 0.0 }
 0x5f2   : > { %1300 = vadd.xlane.f32.xlu1 %v1299_v6  ;;  %v3601_v14 = vpop.xlane.xlu0 %1240  ;;  %v3603_v12 = vpop.xlane.xlu2 %1237 }
 0x5f3   : > { %v1261_v2 = vsub.f32 %v3566_v23, %v3601_v14  ;;  %v1260_v9 = vsub.f32 %v3569_v41, %v3603_v12 }
 0x5f4   : > { %v3605_v20 = vpop.xlane.xlu1 %1243 }
 0x5f5   : > { %v1262_v24 = vsub.f32 %v3563_v7, %v3605_v20  ;;  %v1270_v51 = vmul.f32 1.442695, %v1261_v2  ;;  %v1268_v25 = vmul.f32 1.442695, %v1260_v9 }
 0x5f7   : > { %v2661_v26 = vpop.eup %2660  ;;  %v1272_v29 = vmul.f32 1.442695, %v1262_v24  ;;  %2662 = vpow2.f32 %v1270_v51 }
 0x5f8   : > { %v1305_v56 = vsel %vm459_vm0, %v2661_v26, 0.0 }
 0x5f9   : > { %2664 = vpow2.f32 %v1272_v29  ;;  %1306 = vadd.xlane.f32.xlu0 %v1305_v56 }
 0x5fa   : > { %2666 = vpow2.f32 %v1268_v25  ;;  %v3614_v16 = vpop.xlane.xlu2 %1246 }
 0x5fb   : > { %v1263_v48 = vsub.f32 %v3578_v3, %v3614_v16 }
 0x5fd   : > { %v2663_v32 = vpop.eup %2662  ;;  %v1274_v19 = vmul.f32 1.442695, %v1263_v48 }
 0x5fe   : > { %v1287_v1 = vsel %vm459_vm0, %v2663_v32, 0.0 }
 0x5ff   : > { %v2665_v10 = vpop.eup %2664  ;;  %2668 = vpow2.f32 %v1274_v19  ;;  %1288 = vadd.xlane.f32.xlu2 %v1287_v1 }
 0x600   : > { %v2667_v4 = vpop.eup %2666  ;;  %v1290_v0 = vsel %vm459_vm0, %v2665_v10, 0.0 }
 0x601   : > { %1291 = vadd.xlane.f32.xlu0 %v1290_v0  ;;  %v1284_v34 = vsel %vm459_vm0, %v2667_v4, 0.0 }
 0x602   : > { %1285 = vadd.xlane.f32.xlu1 %v1284_v34 }
 0x605   : > { %v2669_v58 = vpop.eup %2668 }
 0x606   : > { %v1293_v35 = vsel %vm459_vm0, %v2669_v58, 0.0 }
 0x60a   : > { %1294 = vadd.xlane.f32.xlu1 %v1293_v35 }
 0x663   : > { %v1304_v31 = vpop.xlane.xlu2 %1303 }
 0x664   : > { %v1298_v28 = vpop.xlane.xlu0 %1297  ;;  %2670 = vlog2.f32 %v1304_v31 }
 0x665   : > { %2672 = vlog2.f32 %v1298_v28  ;;  %v1301_v49 = vpop.xlane.xlu1 %1300 }
 0x666   : > { %2674 = vlog2.f32 %v1301_v49 }
 0x66a   : > { %v2671_v50 = vpop.eup %2670 }
 0x66b   : > { %v2673_v55 = vpop.eup %2672  ;;  %v1321_v11 = vmul.f32 0.6931472, %v2671_v50 }
 0x66c   : > { %v2675_v53 = vpop.eup %2674  ;;  %v1317_v63 = vmul.f32 0.6931472, %v2673_v55  ;;  %v1307_v62 = vpop.xlane.xlu0 %1306 }
 0x66d   : > { %2676 = vlog2.f32 %v1307_v62  ;;  %v1319_v18 = vmul.f32 0.6931472, %v2675_v53  ;;  %v1330_v46 = vadd.f32 %v1321_v11, %v3582_v17 }
 0x66e   : > { %v1328_v36 = vadd.f32 %v1317_v63, %v3588_v8 }
 0x66f   : > { %v1329_v57 = vadd.f32 %v1319_v18, %v3584_v54  ;;  %v3629_v52 = vsub.f32 %v3543_v33, %v1330_v46 }
 0x670   : > { %v3626_v15 = vsub.f32 %v3549_v47, %v1328_v36 }
 0x671   : > { %v3632_v38 = vsub.f32 %v3546_v37, %v1329_v57  ;;  %v1355_v47 = vsel %vm459_vm0, %v3629_v52, -inf }
 0x672   : > { %v1289_v21 = vpop.xlane.xlu2 %1288  ;;  %v1353_v17 = vsel %vm459_vm0, %v3626_v15, -inf }
 0x673   : > { %v2677_v61 = vpop.eup %2676  ;;  %v1354_v54 = vsel %vm459_vm0, %v3632_v38, -inf  ;;  %v1356_v39 = vmax.f32 %v1353_v17, %v1355_v47 }
 0x674   : > { %v1323_v30 = vmul.f32 0.6931472, %v2677_v61  ;;  %v1292_v45 = vpop.xlane.xlu0 %1291 }
 0x675   : > { %2678 = vlog2.f32 %v1292_v45  ;;  %v1286_v22 = vpop.xlane.xlu1 %1285 }
 0x676   : > { %v1331_v8 = vadd.f32 %v1323_v30, %v3594_v27  ;;  %2680 = vlog2.f32 %v1286_v22 }
 0x677   : > { %2682 = vlog2.f32 %v1289_v21 }
 0x678   : > { %v3640_v33 = vsub.f32 %v3558_v60, %v1331_v8 }
 0x67a   : > { %v1357_v37 = vsel %vm459_vm0, %v3640_v33, -inf }
 0x67b   : > { %v2679_v43 = vpop.eup %2678  ;;  %v1358_v27 = vmax.f32 %v1354_v54, %v1357_v37 }
 0x67c   : > { %v2681_v40 = vpop.eup %2680  ;;  %v1313_v44 = vmul.f32 0.6931472, %v2679_v43 }
 0x67d   : > { %v2683_v59 = vpop.eup %2682  ;;  %v1359_v42 = vmax.f32 %v1356_v39, %v1358_v27  ;;  %v1309_v13 = vmul.f32 0.6931472, %v2681_v40  ;;  %v1295_v6 = vpop.xlane.xlu1 %1294 }
 0x67e   : > { %2684 = vlog2.f32 %v1295_v6  ;;  %v1311_v9 = vmul.f32 0.6931472, %v2683_v59  ;;  %v1326_v24 = vadd.f32 %v1313_v44, %v3605_v20 }
 0x67f   : > { %v1360_v2 = vrot.slane %v1359_v42, 4  ;;  %v1324_v51 = vadd.f32 %v1309_v13, %v3603_v12 }
 0x680   : > { %v1325_v29 = vadd.f32 %v1311_v9, %v3601_v14  ;;  %v3650_v48 = vsub.f32 %v3563_v7, %v1326_v24 }
 0x681   : > { %v1361_v60 = vmax.f32 %v1359_v42, %v1360_v2  ;;  %v3653_v32 = vsub.f32 %v3569_v41, %v1324_v51 }
 0x682   : > { %v3657_v4 = vsub.f32 %v3566_v23, %v1325_v29  ;;  %v1342_v12 = vsel %vm459_vm0, %v3650_v48, -inf }
 0x683   : > { %v1362_v25 = vrot.slane %v1361_v60, 2  ;;  %v1340_v14 = vsel %vm459_vm0, %v3653_v32, -inf }
 0x684   : > { %v2685_v26 = vpop.eup %2684  ;;  %v1343_v34 = vmax.f32 %v1340_v14, %v1342_v12  ;;  %v1341_v58 = vsel %vm459_vm0, %v3657_v4, -inf }
 0x685   : > { %v1363_v56 = vmax.f32 %v1361_v60, %v1362_v25  ;;  %v1315_v19 = vmul.f32 0.6931472, %v2685_v26 }
 0x687   : > { %v1364_v10 = vrot.slane %v1363_v56, 1  ;;  %v1327_v1 = vadd.f32 %v1315_v19, %v3614_v16 }
 0x689   : > { %v3659_v20 = vmax.f32 %v1363_v56, %v1364_v10  ;;  %v3666_v7 = vsub.f32 %v3578_v3, %v1327_v1 }
 0x68b   : > { %v1370_v41 = vsub.f32 %v3626_v15, %v3659_v20  ;;  %v1371_v16 = vsub.f32 %v3632_v38, %v3659_v20  ;;  %v1372_v23 = vsub.f32 %v3629_v52, %v3659_v20  ;;  %v1373_v0 = vsub.f32 %v3640_v33, %v3659_v20 }
 0x68c   : > { %v1344_v3 = vsel %vm459_vm0, %v3666_v7, -inf }
 0x68d   : > { %v1382_v35 = vmul.f32 1.442695, %v1370_v41  ;;  %v1384_v31 = vmul.f32 1.442695, %v1371_v16  ;;  %v1386_v28 = vmul.f32 1.442695, %v1372_v23  ;;  %v1345_v49 = vmax.f32 %v1341_v58, %v1344_v3 }
 0x68e   : > { %v1388_v50 = vmul.f32 1.442695, %v1373_v0 }
 0x68f   : > { %2686 = vpow2.f32 %v1382_v35  ;;  %v1346_v55 = vmax.f32 %v1343_v34, %v1345_v49 }
 0x690   : > { %2688 = vpow2.f32 %v1384_v31 }
 0x691   : > { %2690 = vpow2.f32 %v1386_v28  ;;  %v1347_v53 = vrot.slane %v1346_v55, 4 }
 0x692   : > { %2692 = vpow2.f32 %v1388_v50 }
 0x693   : > { %v1348_v63 = vmax.f32 %v1346_v55, %v1347_v53 }
 0x695   : > { %v2687_v11 = vpop.eup %2686  ;;  %v1349_v62 = vrot.slane %v1348_v63, 2 }
 0x696   : > { %v2689_v18 = vpop.eup %2688  ;;  %v1403_v36 = vsel %vm459_vm0, %v2687_v11, 0.0 }
 0x697   : > { %v2691_v46 = vpop.eup %2690  ;;  %v1404_v57 = vsel %vm459_vm0, %v2689_v18, 0.0  ;;  %v1350_v61 = vmax.f32 %v1348_v63, %v1349_v62 }
 0x698   : > { %v2693_v30 = vpop.eup %2692  ;;  %v1405_v45 = vadd.f32 %v1404_v57, %v1403_v36  ;;  %v1406_v21 = vsel %vm459_vm0, %v2691_v46, 0.0 }
 0x699   : > { %v1351_v22 = vrot.slane %v1350_v61, 1  ;;  %v1408_v17 = vsel %vm459_vm0, %v2693_v30, 0.0 }
 0x69a   : > { %v1407_v8 = vadd.f32 %v1406_v21, %v1405_v45 }
 0x69b   : > { %v1352_v47 = vmax.f32 %v1350_v61, %v1351_v22 }
 0x69c   : > { %v1409_v54 = vadd.f32 %v1408_v17, %v1407_v8 }
 0x69d   : > { %v1366_v37 = vsub.f32 %v3653_v32, %v1352_v47  ;;  %v1367_v43 = vsub.f32 %v3657_v4, %v1352_v47  ;;  %v1368_v39 = vsub.f32 %v3650_v48, %v1352_v47  ;;  %v1369_v27 = vsub.f32 %v3666_v7, %v1352_v47 }
 0x69e   : > { %v1410_v40 = vrot.slane %v1409_v54, 4 }
 0x69f   : > { %v1374_v59 = vmul.f32 1.442695, %v1366_v37  ;;  %v1376_v42 = vmul.f32 1.442695, %v1367_v43  ;;  %v1378_v44 = vmul.f32 1.442695, %v1368_v39 }
 0x6a0   : > { %v1380_v13 = vmul.f32 1.442695, %v1369_v27  ;;  %v1411_v6 = vadd.f32 %v1410_v40, %v1409_v54 }
 0x6a1   : > { %2694 = vpow2.f32 %v1374_v59 }
 0x6a2   : > { %2696 = vpow2.f32 %v1376_v42  ;;  %v1412_v2 = vrot.slane %v1411_v6, 2 }
 0x6a3   : > { %2698 = vpow2.f32 %v1378_v44 }
 0x6a4   : > { %2700 = vpow2.f32 %v1380_v13  ;;  %v1413_v9 = vadd.f32 %v1412_v2, %v1411_v6 }
 0x6a6   : > { %v1414_v60 = vrot.slane %v1413_v9, 1 }
 0x6a7   : > { %v2695_v24 = vpop.eup %2694 }
 0x6a8   : > { %v2697_v51 = vpop.eup %2696  ;;  %v1390_v25 = vsel %vm459_vm0, %v2695_v24, 0.0  ;;  %v1415_v26 = vadd.f32 %v1414_v60, %v1413_v9 }
 0x6a9   : > { %v2699_v29 = vpop.eup %2698  ;;  %v1391_v56 = vsel %vm459_vm0, %v2697_v51, 0.0 }
 0x6aa   : > { %v2701_v19 = vpop.eup %2700  ;;  %v1392_v10 = vadd.f32 %v1391_v56, %v1390_v25  ;;  %2702 = vlog2.f32 %v1415_v26  ;;  %v1393_v1 = vsel %vm459_vm0, %v2699_v29, 0.0 }
 0x6ab   : > { %v1395_v14 = vsel %vm459_vm0, %v2701_v19, 0.0 }
 0x6ac   : > { %v1394_v12 = vadd.f32 %v1393_v1, %v1392_v10 }
 0x6ae   : > { %v1396_v41 = vadd.f32 %v1395_v14, %v1394_v12 }
 0x6b0   : > { %v2703_v16 = vpop.eup %2702  ;;  %v1397_v23 = vrot.slane %v1396_v41, 4 }
 0x6b1   : > { %v1419_v0 = vmul.f32 0.6931472, %v2703_v16 }
 0x6b2   : > { %v1398_v34 = vadd.f32 %v1397_v23, %v1396_v41 }
 0x6b3   : > { %v1421_v58 = vadd.f32 %v1419_v0, %v3659_v20 }
 0x6b4   : > { %v1399_v3 = vrot.slane %v1398_v34, 2 }
 0x6b5   : > { %v3694_v35 = vsub.f32 %v3629_v52, %v1421_v58  ;;  %v3697_v31 = vsub.f32 %v3632_v38, %v1421_v58  ;;  %v3700_v28 = vsub.f32 %v3626_v15, %v1421_v58  ;;  %v3709_v38 = vsub.f32 %v3640_v33, %v1421_v58 }
 0x6b6   : > { %v1400_v49 = vadd.f32 %v1399_v3, %v1398_v34 }
 0x6b7   : > { %v1448_v50 = vsel %vm459_vm0, %v3694_v35, -inf  ;;  %v1445_v55 = vsel %vm459_vm0, %v3697_v31, -inf  ;;  %v1442_v20 = vsel %vm459_vm0, %v3700_v28, -inf  ;;  %v1451_v15 = vsel %vm459_vm0, %v3709_v38, -inf }
 0x6b8   : > { %1449 = vmax.xlane.f32.xlu1 %v1448_v50  ;;  %1446 = vmax.xlane.f32.xlu0 %v1445_v55  ;;  %v1401_v52 = vrot.slane %v1400_v49, 1 }
 0x6b9   : > { %1443 = vmax.xlane.f32.xlu2 %v1442_v20 }
 0x6ba   : > { %v1402_v53 = vadd.f32 %v1401_v52, %v1400_v49 }
 0x6bc   : > { %2704 = vlog2.f32 %v1402_v53 }
 0x6c1   : > { %1452 = vmax.xlane.f32.xlu2 %v1451_v15 }
 0x6c2   : > { %v2705_v63 = vpop.eup %2704 }
 0x6c3   : > { %v1417_v11 = vmul.f32 0.6931472, %v2705_v63 }
 0x6c5   : > { %v1420_v62 = vadd.f32 %v1417_v11, %v1352_v47 }
 0x6c7   : > { %v3714_v18 = vsub.f32 %v3650_v48, %v1420_v62  ;;  %v3717_v36 = vsub.f32 %v3657_v4, %v1420_v62  ;;  %v3720_v46 = vsub.f32 %v3653_v32, %v1420_v62  ;;  %v3729_v48 = vsub.f32 %v3666_v7, %v1420_v62 }
 0x6c9   : > { %v1436_v33 = vsel %vm459_vm0, %v3714_v18, -inf  ;;  %v1433_v57 = vsel %vm459_vm0, %v3717_v36, -inf  ;;  %v1430_v61 = vsel %vm459_vm0, %v3720_v46, -inf  ;;  %v1439_v4 = vsel %vm459_vm0, %v3729_v48, -inf }
 0x6ca   : > { %1437 = vmax.xlane.f32.xlu2 %v1436_v33  ;;  %1434 = vmax.xlane.f32.xlu1 %v1433_v57 }
 0x6cb   : > { %1431 = vmax.xlane.f32.xlu0 %v1430_v61 }
 0x6d3   : > { %1440 = vmax.xlane.f32.xlu0 %v1439_v4 }
 0x72b   : > { %v3733_v32 = vpop.xlane.xlu1 %1449  ;;  %v3735_v30 = vpop.xlane.xlu0 %1446 }
 0x72c   : > { %v1460_v45 = vsub.f32 %v3694_v35, %v3733_v32  ;;  %v1459_v21 = vsub.f32 %v3697_v31, %v3735_v30  ;;  %v3741_v22 = vpop.xlane.xlu2 %1443 }
 0x72d   : > { %v1458_v7 = vsub.f32 %v3700_v28, %v3741_v22 }
 0x72e   : > { %v1474_v8 = vmul.f32 1.442695, %v1460_v45  ;;  %v1472_v17 = vmul.f32 1.442695, %v1459_v21 }
 0x72f   : > { %v1470_v47 = vmul.f32 1.442695, %v1458_v7 }
 0x730   : > { %2706 = vpow2.f32 %v1474_v8 }
 0x731   : > { %2708 = vpow2.f32 %v1472_v17 }
 0x732   : > { %2710 = vpow2.f32 %v1470_v47 }
 0x734   : > { %v3745_v54 = vpop.xlane.xlu2 %1452 }
 0x735   : > { %v1461_v37 = vsub.f32 %v3709_v38, %v3745_v54 }
 0x736   : > { %v2707_v43 = vpop.eup %2706 }
 0x737   : > { %v2709_v39 = vpop.eup %2708  ;;  %v1476_v27 = vmul.f32 1.442695, %v1461_v37  ;;  %v1496_v40 = vsel %vm459_vm0, %v2707_v43, 0.0 }
 0x738   : > { %v2711_v59 = vpop.eup %2710  ;;  %v1493_v42 = vsel %vm459_vm0, %v2709_v39, 0.0  ;;  %1497 = vadd.xlane.f32.xlu0 %v1496_v40 }
 0x739   : > { %2712 = vpow2.f32 %v1476_v27  ;;  %1494 = vadd.xlane.f32.xlu2 %v1493_v42  ;;  %v1490_v44 = vsel %vm459_vm0, %v2711_v59, 0.0 }
 0x73a   : > { %1491 = vadd.xlane.f32.xlu1 %v1490_v44 }
 0x73d   : > { %v3752_v13 = vpop.xlane.xlu1 %1434  ;;  %v3754_v6 = vpop.xlane.xlu2 %1437 }
 0x73e   : > { %v1455_v2 = vsub.f32 %v3717_v36, %v3752_v13  ;;  %v3758_v9 = vpop.xlane.xlu0 %1431  ;;  %v1456_v60 = vsub.f32 %v3714_v18, %v3754_v6 }
 0x73f   : > { %v2713_v24 = vpop.eup %2712  ;;  %v1454_v51 = vsub.f32 %v3720_v46, %v3758_v9 }
 0x740   : > { %v1464_v25 = vmul.f32 1.442695, %v1455_v2  ;;  %v1466_v26 = vmul.f32 1.442695, %v1456_v60  ;;  %v1499_v29 = vsel %vm459_vm0, %v2713_v24, 0.0 }
 0x741   : > { %v1462_v56 = vmul.f32 1.442695, %v1454_v51 }
 0x742   : > { %2714 = vpow2.f32 %v1464_v25  ;;  %1500 = vadd.xlane.f32.xlu1 %v1499_v29 }
 0x743   : > { %2716 = vpow2.f32 %v1462_v56 }
 0x744   : > { %2718 = vpow2.f32 %v1466_v26 }
 0x746   : > { %v3765_v19 = vpop.xlane.xlu0 %1440 }
 0x747   : > { %v1457_v10 = vsub.f32 %v3729_v48, %v3765_v19 }
 0x748   : > { %v2715_v1 = vpop.eup %2714 }
 0x749   : > { %v2717_v12 = vpop.eup %2716  ;;  %v1468_v14 = vmul.f32 1.442695, %v1457_v10  ;;  %v1481_v41 = vsel %vm459_vm0, %v2715_v1, 0.0 }
 0x74a   : > { %v2719_v16 = vpop.eup %2718  ;;  %1482 = vadd.xlane.f32.xlu0 %v1481_v41  ;;  %v1478_v23 = vsel %vm459_vm0, %v2717_v12, 0.0 }
 0x74b   : > { %2720 = vpow2.f32 %v1468_v14  ;;  %1479 = vadd.xlane.f32.xlu2 %v1478_v23  ;;  %v1484_v0 = vsel %vm459_vm0, %v2719_v16, 0.0 }
 0x74c   : > { %1485 = vadd.xlane.f32.xlu1 %v1484_v0 }
 0x751   : > { %v2721_v34 = vpop.eup %2720 }
 0x752   : > { %v1487_v58 = vsel %vm459_vm0, %v2721_v34, 0.0 }
 0x753   : > { %1488 = vadd.xlane.f32.xlu2 %v1487_v58 }
 0x7ab   : > { %v1498_v3 = vpop.xlane.xlu0 %1497 }
 0x7ac   : > { %2722 = vlog2.f32 %v1498_v3  ;;  %v1495_v49 = vpop.xlane.xlu2 %1494 }
 0x7ad   : > { %v1492_v50 = vpop.xlane.xlu1 %1491  ;;  %2724 = vlog2.f32 %v1495_v49 }
 0x7ae   : > { %2726 = vlog2.f32 %v1492_v50 }
 0x7b2   : > { %v2723_v55 = vpop.eup %2722 }
 0x7b3   : > { %v2725_v20 = vpop.eup %2724  ;;  %v1515_v53 = vmul.f32 0.6931472, %v2723_v55 }
 0x7b4   : > { %v2727_v52 = vpop.eup %2726  ;;  %v1513_v11 = vmul.f32 0.6931472, %v2725_v20 }
 0x7b5   : > { %v1511_v15 = vmul.f32 0.6931472, %v2727_v52  ;;  %v1501_v63 = vpop.xlane.xlu1 %1500  ;;  %v1524_v62 = vadd.f32 %v1515_v53, %v3733_v32 }
 0x7b6   : > { %2728 = vlog2.f32 %v1501_v63  ;;  %v1523_v57 = vadd.f32 %v1513_v11, %v3735_v30 }
 0x7b7   : > { %v1522_v33 = vadd.f32 %v1511_v15, %v3741_v22  ;;  %v3777_v4 = vsub.f32 %v3694_v35, %v1524_v62 }
 0x7b8   : > { %v3783_v17 = vsub.f32 %v3697_v31, %v1523_v57 }
 0x7b9   : > { %v3780_v45 = vsub.f32 %v3700_v28, %v1522_v33  ;;  %v1549_v30 = vsel %vm459_vm0, %v3777_v4, -inf }
 0x7ba   : > { %v1548_v22 = vsel %vm459_vm0, %v3783_v17, -inf }
 0x7bb   : > { %v1547_v35 = vsel %vm459_vm0, %v3780_v45, -inf }
 0x7bc   : > { %v2729_v61 = vpop.eup %2728 }
 0x7bd   : > { %v1517_v21 = vmul.f32 0.6931472, %v2729_v61  ;;  %v1483_v7 = vpop.xlane.xlu0 %1482 }
 0x7be   : > { %2730 = vlog2.f32 %v1483_v7  ;;  %v1480_v8 = vpop.xlane.xlu2 %1479 }
 0x7bf   : > { %v1525_v32 = vadd.f32 %v1517_v21, %v3745_v54  ;;  %v1486_v47 = vpop.xlane.xlu1 %1485  ;;  %2732 = vlog2.f32 %v1480_v8  ;;  %v1550_v54 = vmax.f32 %v1547_v35, %v1549_v30 }
 0x7c0   : > { %2734 = vlog2.f32 %v1486_v47 }
 0x7c1   : > { %v3791_v28 = vsub.f32 %v3709_v38, %v1525_v32 }
 0x7c3   : > { %v1551_v31 = vsel %vm459_vm0, %v3791_v28, -inf }
 0x7c4   : > { %v2731_v37 = vpop.eup %2730  ;;  %v1552_v43 = vmax.f32 %v1548_v22, %v1551_v31 }
 0x7c5   : > { %v2733_v39 = vpop.eup %2732  ;;  %v1505_v60 = vmul.f32 0.6931472, %v2731_v37 }
 0x7c6   : > { %v2735_v27 = vpop.eup %2734  ;;  %v1553_v40 = vmax.f32 %v1550_v54, %v1552_v43  ;;  %v1503_v59 = vmul.f32 0.6931472, %v2733_v39  ;;  %v1489_v42 = vpop.xlane.xlu2 %1488 }
 0x7c7   : > { %v1507_v44 = vmul.f32 0.6931472, %v2735_v27  ;;  %2736 = vlog2.f32 %v1489_v42  ;;  %v1519_v29 = vadd.f32 %v1505_v60, %v3752_v13 }
 0x7c8   : > { %v1554_v2 = vrot.slane %v1553_v40, 4  ;;  %v1518_v51 = vadd.f32 %v1503_v59, %v3758_v9 }
 0x7c9   : > { %v1520_v24 = vadd.f32 %v1507_v44, %v3754_v6  ;;  %v3808_v16 = vsub.f32 %v3717_v36, %v1519_v29 }
 0x7ca   : > { %v1555_v38 = vmax.f32 %v1553_v40, %v1554_v2  ;;  %v3804_v1 = vsub.f32 %v3720_v46, %v1518_v51 }
 0x7cb   : > { %v3801_v10 = vsub.f32 %v3714_v18, %v1520_v24  ;;  %v1535_v0 = vsel %vm459_vm0, %v3808_v16, -inf }
 0x7cc   : > { %v1556_v25 = vrot.slane %v1555_v38, 2  ;;  %v1534_v13 = vsel %vm459_vm0, %v3804_v1, -inf }
 0x7cd   : > { %v2737_v26 = vpop.eup %2736  ;;  %v1536_v9 = vsel %vm459_vm0, %v3801_v10, -inf }
 0x7ce   : > { %v1557_v56 = vmax.f32 %v1555_v38, %v1556_v25  ;;  %v1509_v12 = vmul.f32 0.6931472, %v2737_v26  ;;  %v1537_v34 = vmax.f32 %v1534_v13, %v1536_v9 }
 0x7d0   : > { %v1558_v14 = vrot.slane %v1557_v56, 1  ;;  %v1521_v41 = vadd.f32 %v1509_v12, %v3765_v19 }
 0x7d2   : > { %v3810_v6 = vmax.f32 %v1557_v56, %v1558_v14  ;;  %v3817_v18 = vsub.f32 %v3729_v48, %v1521_v41 }
 0x7d4   : > { %v1564_v46 = vsub.f32 %v3780_v45, %v3810_v6  ;;  %v1565_v19 = vsub.f32 %v3783_v17, %v3810_v6  ;;  %v1566_v36 = vsub.f32 %v3777_v4, %v3810_v6  ;;  %v1567_v23 = vsub.f32 %v3791_v28, %v3810_v6 }
 0x7d5   : > { %v1538_v48 = vsel %vm459_vm0, %v3817_v18, -inf }
 0x7d6   : > { %v1576_v58 = vmul.f32 1.442695, %v1564_v46  ;;  %v1578_v3 = vmul.f32 1.442695, %v1565_v19  ;;  %v1580_v49 = vmul.f32 1.442695, %v1566_v36  ;;  %v1539_v50 = vmax.f32 %v1535_v0, %v1538_v48 }
 0x7d7   : > { %v1582_v55 = vmul.f32 1.442695, %v1567_v23 }
 0x7d8   : > { %2738 = vpow2.f32 %v1576_v58  ;;  %v1540_v20 = vmax.f32 %v1537_v34, %v1539_v50 }
 0x7d9   : > { %2740 = vpow2.f32 %v1578_v3 }
 0x7da   : > { %2742 = vpow2.f32 %v1580_v49  ;;  %v1541_v52 = vrot.slane %v1540_v20, 4 }
 0x7db   : > { %2744 = vpow2.f32 %v1582_v55 }
 0x7dc   : > { %v1542_v53 = vmax.f32 %v1540_v20, %v1541_v52 }
 0x7de   : > { %v2739_v15 = vpop.eup %2738  ;;  %v1543_v63 = vrot.slane %v1542_v53, 2 }
 0x7df   : > { %v2741_v11 = vpop.eup %2740  ;;  %v1597_v62 = vsel %vm459_vm0, %v2739_v15, 0.0 }
 0x7e0   : > { %v2743_v33 = vpop.eup %2742  ;;  %v1598_v57 = vsel %vm459_vm0, %v2741_v11, 0.0  ;;  %v1544_v61 = vmax.f32 %v1542_v53, %v1543_v63 }
 0x7e1   : > { %v2745_v21 = vpop.eup %2744  ;;  %v1599_v7 = vadd.f32 %v1598_v57, %v1597_v62  ;;  %v1600_v8 = vsel %vm459_vm0, %v2743_v33, 0.0 }
 0x7e2   : > { %v1545_v32 = vrot.slane %v1544_v61, 1  ;;  %v1602_v30 = vsel %vm459_vm0, %v2745_v21, 0.0 }
 0x7e3   : > { %v1601_v47 = vadd.f32 %v1600_v8, %v1599_v7 }
 0x7e4   : > { %v1546_v35 = vmax.f32 %v1544_v61, %v1545_v32 }
 0x7e5   : > { %v1603_v22 = vadd.f32 %v1602_v30, %v1601_v47 }
 0x7e6   : > { %v1560_v31 = vsub.f32 %v3804_v1, %v1546_v35  ;;  %v1561_v37 = vsub.f32 %v3808_v16, %v1546_v35  ;;  %v1562_v54 = vsub.f32 %v3801_v10, %v1546_v35  ;;  %v1563_v43 = vsub.f32 %v3817_v18, %v1546_v35 }
 0x7e7   : > { %v1604_v39 = vrot.slane %v1603_v22, 4 }
 0x7e8   : > { %v1568_v27 = vmul.f32 1.442695, %v1560_v31  ;;  %v1570_v40 = vmul.f32 1.442695, %v1561_v37  ;;  %v1572_v59 = vmul.f32 1.442695, %v1562_v54 }
 0x7e9   : > { %v1574_v42 = vmul.f32 1.442695, %v1563_v43  ;;  %v1605_v44 = vadd.f32 %v1604_v39, %v1603_v22 }
 0x7ea   : > { %2746 = vpow2.f32 %v1568_v27 }
 0x7eb   : > { %2748 = vpow2.f32 %v1570_v40  ;;  %v1606_v2 = vrot.slane %v1605_v44, 2 }
 0x7ec   : > { %2750 = vpow2.f32 %v1572_v59 }
 0x7ed   : > { %2752 = vpow2.f32 %v1574_v42  ;;  %v1607_v60 = vadd.f32 %v1606_v2, %v1605_v44 }
 0x7ef   : > { %v1608_v38 = vrot.slane %v1607_v60, 1 }
 0x7f0   : > { %v2747_v24 = vpop.eup %2746 }
 0x7f1   : > { %v2749_v51 = vpop.eup %2748  ;;  %v1584_v25 = vsel %vm459_vm0, %v2747_v24, 0.0  ;;  %v1609_v26 = vadd.f32 %v1608_v38, %v1607_v60 }
 0x7f2   : > { %v2751_v29 = vpop.eup %2750  ;;  %v1585_v56 = vsel %vm459_vm0, %v2749_v51, 0.0 }
 0x7f3   : > { %v2753_v12 = vpop.eup %2752  ;;  %v1586_v14 = vadd.f32 %v1585_v56, %v1584_v25  ;;  %2754 = vlog2.f32 %v1609_v26  ;;  %v1587_v41 = vsel %vm459_vm0, %v2751_v29, 0.0 }
 0x7f4   : > { %v1589_v13 = vsel %vm459_vm0, %v2753_v12, 0.0 }
 0x7f5   : > { %v1588_v9 = vadd.f32 %v1587_v41, %v1586_v14 }
 0x7f7   : > { %v1590_v46 = vadd.f32 %v1589_v13, %v1588_v9 }
 0x7f9   : > { %v2755_v19 = vpop.eup %2754  ;;  %v1591_v36 = vrot.slane %v1590_v46, 4 }
 0x7fa   : > { %v1613_v23 = vmul.f32 0.6931472, %v2755_v19 }
 0x7fb   : > { %v1592_v0 = vadd.f32 %v1591_v36, %v1590_v46 }
 0x7fc   : > { %v1615_v34 = vadd.f32 %v1613_v23, %v3810_v6 }
 0x7fd   : > { %v1593_v48 = vrot.slane %v1592_v0, 2 }
 0x7fe   : > { %v3845_v58 = vsub.f32 %v3777_v4, %v1615_v34  ;;  %v3848_v3 = vsub.f32 %v3783_v17, %v1615_v34  ;;  %v3851_v49 = vsub.f32 %v3780_v45, %v1615_v34  ;;  %v3860_v17 = vsub.f32 %v3791_v28, %v1615_v34 }
 0x7ff   : > { %v1594_v50 = vadd.f32 %v1593_v48, %v1592_v0 }
 0x800   : > { %v1642_v55 = vsel %vm459_vm0, %v3845_v58, -inf  ;;  %v1639_v20 = vsel %vm459_vm0, %v3848_v3, -inf  ;;  %v1636_v6 = vsel %vm459_vm0, %v3851_v49, -inf  ;;  %v1645_v45 = vsel %vm459_vm0, %v3860_v17, -inf }
 0x801   : > { %1643 = vmax.xlane.f32.xlu2 %v1642_v55  ;;  %1640 = vmax.xlane.f32.xlu1 %v1639_v20  ;;  %v1595_v4 = vrot.slane %v1594_v50, 1 }
 0x802   : > { %1637 = vmax.xlane.f32.xlu0 %v1636_v6 }
 0x803   : > { %v1596_v52 = vadd.f32 %v1595_v4, %v1594_v50 }
 0x805   : > { %2756 = vlog2.f32 %v1596_v52 }
 0x80a   : > { %1646 = vmax.xlane.f32.xlu0 %v1645_v45 }
 0x80b   : > { %v2757_v53 = vpop.eup %2756 }
 0x80c   : > { %v1611_v15 = vmul.f32 0.6931472, %v2757_v53 }
 0x80e   : > { %v1614_v63 = vadd.f32 %v1611_v15, %v1546_v35 }
 0x810   : > { %v3865_v11 = vsub.f32 %v3801_v10, %v1614_v63  ;;  %v3868_v62 = vsub.f32 %v3808_v16, %v1614_v63  ;;  %v3871_v33 = vsub.f32 %v3804_v1, %v1614_v63  ;;  %v3880_v10 = vsub.f32 %v3817_v18, %v1614_v63 }
 0x812   : > { %v1630_v28 = vsel %vm459_vm0, %v3865_v11, -inf  ;;  %v1627_v57 = vsel %vm459_vm0, %v3868_v62, -inf  ;;  %v1624_v61 = vsel %vm459_vm0, %v3871_v33, -inf  ;;  %v1633_v16 = vsel %vm459_vm0, %v3880_v10, -inf }
 0x813   : > { %1631 = vmax.xlane.f32.xlu0 %v1630_v28  ;;  %1628 = vmax.xlane.f32.xlu2 %v1627_v57 }
 0x814   : > { %1625 = vmax.xlane.f32.xlu1 %v1624_v61 }
 0x81c   : > { %1634 = vmax.xlane.f32.xlu1 %v1633_v16 }
 0x874   : > { %v3884_v1 = vpop.xlane.xlu1 %1640  ;;  %v3886_v21 = vpop.xlane.xlu2 %1643 }
 0x875   : > { %v1653_v7 = vsub.f32 %v3848_v3, %v3884_v1  ;;  %v3890_v8 = vpop.xlane.xlu0 %1637  ;;  %v1654_v32 = vsub.f32 %v3845_v58, %v3886_v21 }
 0x876   : > { %v1652_v18 = vsub.f32 %v3851_v49, %v3890_v8 }
 0x877   : > { %v1666_v47 = vmul.f32 1.442695, %v1653_v7  ;;  %v1668_v30 = vmul.f32 1.442695, %v1654_v32 }
 0x878   : > { %v1664_v35 = vmul.f32 1.442695, %v1652_v18 }
 0x879   : > { %2758 = vpow2.f32 %v1666_v47 }
 0x87a   : > { %2760 = vpow2.f32 %v1664_v35 }
 0x87b   : > { %2762 = vpow2.f32 %v1668_v30 }
 0x87d   : > { %v3896_v22 = vpop.xlane.xlu0 %1646 }
 0x87e   : > { %v1655_v31 = vsub.f32 %v3860_v17, %v3896_v22 }
 0x87f   : > { %v2759_v37 = vpop.eup %2758 }
 0x880   : > { %v2761_v54 = vpop.eup %2760  ;;  %v1670_v43 = vmul.f32 1.442695, %v1655_v31  ;;  %v1687_v39 = vsel %vm459_vm0, %v2759_v37, 0.0 }
 0x881   : > { %v2763_v27 = vpop.eup %2762  ;;  %1688 = vadd.xlane.f32.xlu0 %v1687_v39  ;;  %v1684_v40 = vsel %vm459_vm0, %v2761_v54, 0.0 }
 0x882   : > { %2764 = vpow2.f32 %v1670_v43  ;;  %1685 = vadd.xlane.f32.xlu2 %v1684_v40  ;;  %v1690_v59 = vsel %vm459_vm0, %v2763_v27, 0.0 }
 0x883   : > { %1691 = vadd.xlane.f32.xlu1 %v1690_v59 }
 0x886   : > { %v3903_v42 = vpop.xlane.xlu0 %1631  ;;  %v3905_v44 = vpop.xlane.xlu2 %1628 }
 0x887   : > { %v1650_v2 = vsub.f32 %v3865_v11, %v3903_v42  ;;  %v3909_v60 = vpop.xlane.xlu1 %1625  ;;  %v1649_v38 = vsub.f32 %v3868_v62, %v3905_v44 }
 0x888   : > { %v2765_v24 = vpop.eup %2764  ;;  %v1648_v51 = vsub.f32 %v3871_v33, %v3909_v60 }
 0x889   : > { %v1660_v25 = vmul.f32 1.442695, %v1650_v2  ;;  %v1658_v26 = vmul.f32 1.442695, %v1649_v38  ;;  %v1693_v29 = vsel %vm459_vm0, %v2765_v24, 0.0 }
 0x88a   : > { %v1656_v56 = vmul.f32 1.442695, %v1648_v51  ;;  %1694 = vadd.xlane.f32.xlu2 %v1693_v29 }
 0x88b   : > { %2766 = vpow2.f32 %v1660_v25 }
 0x88c   : > { %2768 = vpow2.f32 %v1656_v56 }
 0x88d   : > { %2770 = vpow2.f32 %v1658_v26 }
 0x88f   : > { %v3916_v12 = vpop.xlane.xlu1 %1634 }
 0x890   : > { %v1651_v14 = vsub.f32 %v3880_v10, %v3916_v12 }
 0x891   : > { %v2767_v41 = vpop.eup %2766 }
 0x892   : > { %v2769_v9 = vpop.eup %2768  ;;  %v1662_v13 = vmul.f32 1.442695, %v1651_v14  ;;  %v1678_v46 = vsel %vm459_vm0, %v2767_v41, 0.0 }
 0x893   : > { %v2771_v19 = vpop.eup %2770  ;;  %1679 = vadd.xlane.f32.xlu2 %v1678_v46  ;;  %v1672_v36 = vsel %vm459_vm0, %v2769_v9, 0.0 }
 0x894   : > { %2772 = vpow2.f32 %v1662_v13  ;;  %1673 = vadd.xlane.f32.xlu0 %v1672_v36  ;;  %v1675_v23 = vsel %vm459_vm0, %v2771_v19, 0.0 }
 0x895   : > { %1676 = vadd.xlane.f32.xlu1 %v1675_v23 }
 0x89a   : > { %v2773_v0 = vpop.eup %2772 }
 0x89b   : > { %v1681_v34 = vsel %vm459_vm0, %v2773_v0, 0.0 }
 0x89c   : > { %1682 = vadd.xlane.f32.xlu0 %v1681_v34 }
 0x8f4   : > { %v1689_v48 = vpop.xlane.xlu0 %1688 }
 0x8f5   : > { %2774 = vlog2.f32 %v1689_v48  ;;  %v1686_v50 = vpop.xlane.xlu2 %1685 }
 0x8f6   : > { %v1692_v55 = vpop.xlane.xlu1 %1691  ;;  %2776 = vlog2.f32 %v1686_v50 }
 0x8f7   : > { %2778 = vlog2.f32 %v1692_v55 }
 0x8fb   : > { %v2775_v20 = vpop.eup %2774 }
 0x8fc   : > { %v2777_v6 = vpop.eup %2776  ;;  %v1707_v15 = vmul.f32 0.6931472, %v2775_v20 }
 0x8fd   : > { %v2779_v4 = vpop.eup %2778  ;;  %v1705_v52 = vmul.f32 0.6931472, %v2777_v6  ;;  %v1695_v45 = vpop.xlane.xlu2 %1694 }
 0x8fe   : > { %v1709_v53 = vmul.f32 0.6931472, %v2779_v4  ;;  %2780 = vlog2.f32 %v1695_v45  ;;  %v1717_v57 = vadd.f32 %v1707_v15, %v3884_v1 }
 0x8ff   : > { %v1716_v28 = vadd.f32 %v1705_v52, %v3890_v8 }
 0x900   : > { %v1718_v63 = vadd.f32 %v1709_v53, %v3886_v21  ;;  %v3934_v47 = vsub.f32 %v3848_v3, %v1717_v57 }
 0x901   : > { %v3931_v7 = vsub.f32 %v3851_v49, %v1716_v28 }
 0x902   : > { %v3928_v16 = vsub.f32 %v3845_v58, %v1718_v63  ;;  %v1742_v3 = vsel %vm459_vm0, %v3934_v47, -inf }
 0x903   : > { %v1741_v58 = vsel %vm459_vm0, %v3931_v7, -inf }
 0x904   : > { %v2781_v61 = vpop.eup %2780  ;;  %v1743_v1 = vsel %vm459_vm0, %v3928_v16, -inf }
 0x905   : > { %v1711_v32 = vmul.f32 0.6931472, %v2781_v61 }
 0x906   : > { %v1680_v18 = vpop.xlane.xlu2 %1679 }
 0x907   : > { %v1719_v30 = vadd.f32 %v1711_v32, %v3896_v22  ;;  %v1674_v35 = vpop.xlane.xlu0 %1673  ;;  %2782 = vlog2.f32 %v1680_v18  ;;  %v1744_v22 = vmax.f32 %v1741_v58, %v1743_v1 }
 0x908   : > { %2784 = vlog2.f32 %v1674_v35  ;;  %v1677_v21 = vpop.xlane.xlu1 %1676 }
 0x909   : > { %v3942_v49 = vsub.f32 %v3860_v17, %v1719_v30  ;;  %2786 = vlog2.f32 %v1677_v21 }
 0x90b   : > { %v1745_v8 = vsel %vm459_vm0, %v3942_v49, -inf }
 0x90c   : > { %v1746_v31 = vmax.f32 %v1742_v3, %v1745_v8 }
 0x90d   : > { %v2783_v37 = vpop.eup %2782 }
 0x90e   : > { %v2785_v54 = vpop.eup %2784  ;;  %v1747_v43 = vmax.f32 %v1744_v22, %v1746_v31  ;;  %v1701_v39 = vmul.f32 0.6931472, %v2783_v37 }
 0x90f   : > { %v2787_v27 = vpop.eup %2786  ;;  %v1697_v40 = vmul.f32 0.6931472, %v2785_v54  ;;  %v1683_v59 = vpop.xlane.xlu0 %1682 }
 0x910   : > { %v1748_v2 = vrot.slane %v1747_v43, 4  ;;  %2788 = vlog2.f32 %v1683_v59  ;;  %v1699_v17 = vmul.f32 0.6931472, %v2787_v27  ;;  %v1714_v51 = vadd.f32 %v1701_v39, %v3903_v42 }
 0x911   : > { %v1712_v24 = vadd.f32 %v1697_v40, %v3909_v60 }
 0x912   : > { %v1749_v38 = vmax.f32 %v1747_v43, %v1748_v2  ;;  %v1713_v26 = vadd.f32 %v1699_v17, %v3905_v44  ;;  %v3955_v41 = vsub.f32 %v3865_v11, %v1714_v51 }
 0x913   : > { %v3952_v14 = vsub.f32 %v3871_v33, %v1712_v24 }
 0x914   : > { %v1750_v25 = vrot.slane %v1749_v38, 2  ;;  %v3958_v46 = vsub.f32 %v3868_v62, %v1713_v26  ;;  %v1730_v44 = vsel %vm459_vm0, %v3955_v41, -inf }
 0x915   : > { %v1728_v42 = vsel %vm459_vm0, %v3952_v14, -inf }
 0x916   : > { %v2789_v29 = vpop.eup %2788  ;;  %v1751_v56 = vmax.f32 %v1749_v38, %v1750_v25  ;;  %v1729_v23 = vsel %vm459_vm0, %v3958_v46, -inf  ;;  %v1731_v0 = vmax.f32 %v1728_v42, %v1730_v44 }
 0x917   : > { %v1703_v9 = vmul.f32 0.6931472, %v2789_v29 }
 0x918   : > { %v1752_v13 = vrot.slane %v1751_v56, 1 }
 0x919   : > { %v1715_v60 = vadd.f32 %v1703_v9, %v3916_v12 }
 0x91a   : > { %v3961_v19 = vmax.f32 %v1751_v56, %v1752_v13 }
 0x91b   : > { %v3968_v33 = vsub.f32 %v3880_v10, %v1715_v60 }
 0x91c   : > { %v1758_v11 = vsub.f32 %v3931_v7, %v3961_v19  ;;  %v1759_v62 = vsub.f32 %v3934_v47, %v3961_v19  ;;  %v1760_v12 = vsub.f32 %v3928_v16, %v3961_v19  ;;  %v1761_v36 = vsub.f32 %v3942_v49, %v3961_v19 }
 0x91d   : > { %v1732_v10 = vsel %vm459_vm0, %v3968_v33, -inf }
 0x91e   : > { %v1770_v34 = vmul.f32 1.442695, %v1758_v11  ;;  %v1772_v48 = vmul.f32 1.442695, %v1759_v62  ;;  %v1774_v50 = vmul.f32 1.442695, %v1760_v12  ;;  %v1733_v55 = vmax.f32 %v1729_v23, %v1732_v10 }
 0x91f   : > { %v1776_v20 = vmul.f32 1.442695, %v1761_v36 }
 0x920   : > { %2790 = vpow2.f32 %v1770_v34  ;;  %v1734_v6 = vmax.f32 %v1731_v0, %v1733_v55 }
 0x921   : > { %2792 = vpow2.f32 %v1772_v48 }
 0x922   : > { %2794 = vpow2.f32 %v1774_v50  ;;  %v1735_v4 = vrot.slane %v1734_v6, 4 }
 0x923   : > { %2796 = vpow2.f32 %v1776_v20 }
 0x924   : > { %v1736_v52 = vmax.f32 %v1734_v6, %v1735_v4 }
 0x926   : > { %v2791_v45 = vpop.eup %2790  ;;  %v1737_v53 = vrot.slane %v1736_v52, 2 }
 0x927   : > { %v2793_v15 = vpop.eup %2792  ;;  %v1791_v63 = vsel %vm459_vm0, %v2791_v45, 0.0 }
 0x928   : > { %v2795_v28 = vpop.eup %2794  ;;  %v1792_v57 = vsel %vm459_vm0, %v2793_v15, 0.0  ;;  %v1738_v61 = vmax.f32 %v1736_v52, %v1737_v53 }
 0x929   : > { %v2797_v32 = vpop.eup %2796  ;;  %v1793_v18 = vadd.f32 %v1792_v57, %v1791_v63  ;;  %v1794_v30 = vsel %vm459_vm0, %v2795_v28, 0.0 }
 0x92a   : > { %v1739_v35 = vrot.slane %v1738_v61, 1  ;;  %v1796_v1 = vsel %vm459_vm0, %v2797_v32, 0.0 }
 0x92b   : > { %v1795_v21 = vadd.f32 %v1794_v30, %v1793_v18 }
 0x92c   : > { %v1740_v58 = vmax.f32 %v1738_v61, %v1739_v35 }
 0x92d   : > { %v1797_v3 = vadd.f32 %v1796_v1, %v1795_v21 }
 0x92e   : > { %v1754_v8 = vsub.f32 %v3952_v14, %v1740_v58  ;;  %v1755_v22 = vsub.f32 %v3958_v46, %v1740_v58  ;;  %v1756_v31 = vsub.f32 %v3955_v41, %v1740_v58  ;;  %v1757_v37 = vsub.f32 %v3968_v33, %v1740_v58 }
 0x92f   : > { %v1798_v54 = vrot.slane %v1797_v3, 4 }
 0x930   : > { %v1762_v43 = vmul.f32 1.442695, %v1754_v8  ;;  %v1764_v39 = vmul.f32 1.442695, %v1755_v22  ;;  %v1766_v27 = vmul.f32 1.442695, %v1756_v31 }
 0x931   : > { %v1768_v40 = vmul.f32 1.442695, %v1757_v37  ;;  %v1799_v59 = vadd.f32 %v1798_v54, %v1797_v3 }
 0x932   : > { %2798 = vpow2.f32 %v1762_v43 }
 0x933   : > { %2800 = vpow2.f32 %v1764_v39  ;;  %v1800_v2 = vrot.slane %v1799_v59, 2 }
 0x934   : > { %2802 = vpow2.f32 %v1766_v27 }
 0x935   : > { %2804 = vpow2.f32 %v1768_v40  ;;  %v1801_v17 = vadd.f32 %v1800_v2, %v1799_v59 }
 0x937   : > { %v1802_v38 = vrot.slane %v1801_v17, 1 }
 0x938   : > { %v2799_v24 = vpop.eup %2798 }
 0x939   : > { %v2801_v51 = vpop.eup %2800  ;;  %v1778_v25 = vsel %vm459_vm0, %v2799_v24, 0.0  ;;  %v1803_v26 = vadd.f32 %v1802_v38, %v1801_v17 }
 0x93a   : > { %v2803_v29 = vpop.eup %2802  ;;  %v1779_v56 = vsel %vm459_vm0, %v2801_v51, 0.0 }
 0x93b   : > { %v2805_v9 = vpop.eup %2804  ;;  %v1780_v13 = vadd.f32 %v1779_v56, %v1778_v25  ;;  %2806 = vlog2.f32 %v1803_v26  ;;  %v1781_v60 = vsel %vm459_vm0, %v2803_v29, 0.0 }
 0x93c   : > { %v1783_v44 = vsel %vm459_vm0, %v2805_v9, 0.0 }
 0x93d   : > { %v1782_v42 = vadd.f32 %v1781_v60, %v1780_v13 }
 0x93f   : > { %v1784_v11 = vadd.f32 %v1783_v44, %v1782_v42 }
 0x941   : > { %v2807_v62 = vpop.eup %2806  ;;  %v1785_v12 = vrot.slane %v1784_v11, 4 }
 0x942   : > { %v1807_v36 = vmul.f32 0.6931472, %v2807_v62 }
 0x943   : > { %v1786_v23 = vadd.f32 %v1785_v12, %v1784_v11 }
 0x944   : > { %v1809_v0 = vadd.f32 %v1807_v36, %v3961_v19 }
 0x945   : > { %v1787_v10 = vrot.slane %v1786_v23, 2 }
 0x946   : > { %v3996_v34 = vsub.f32 %v3928_v16, %v1809_v0  ;;  %v3999_v48 = vsub.f32 %v3934_v47, %v1809_v0  ;;  %v4002_v50 = vsub.f32 %v3931_v7, %v1809_v0  ;;  %v4011_v47 = vsub.f32 %v3942_v49, %v1809_v0 }
 0x947   : > { %v1788_v55 = vadd.f32 %v1787_v10, %v1786_v23 }
 0x948   : > { %v1836_v20 = vsel %vm459_vm0, %v3996_v34, -inf  ;;  %v1833_v6 = vsel %vm459_vm0, %v3999_v48, -inf  ;;  %v1830_v19 = vsel %vm459_vm0, %v4002_v50, -inf  ;;  %v1839_v7 = vsel %vm459_vm0, %v4011_v47, -inf }
 0x949   : > { %1837 = vmax.xlane.f32.xlu0 %v1836_v20  ;;  %1834 = vmax.xlane.f32.xlu2 %v1833_v6  ;;  %v1789_v16 = vrot.slane %v1788_v55, 1 }
 0x94a   : > { %1831 = vmax.xlane.f32.xlu1 %v1830_v19 }
 0x94b   : > { %v1790_v4 = vadd.f32 %v1789_v16, %v1788_v55 }
 0x94d   : > { %2808 = vlog2.f32 %v1790_v4 }
 0x952   : > { %1840 = vmax.xlane.f32.xlu1 %v1839_v7 }
 0x953   : > { %v2809_v52 = vpop.eup %2808 }
 0x954   : > { %v1805_v45 = vmul.f32 0.6931472, %v2809_v52 }
 0x956   : > { %v1808_v53 = vadd.f32 %v1805_v45, %v1740_v58 }
 0x958   : > { %v4016_v15 = vsub.f32 %v3955_v41, %v1808_v53  ;;  %v4019_v63 = vsub.f32 %v3958_v46, %v1808_v53  ;;  %v4022_v28 = vsub.f32 %v3952_v14, %v1808_v53  ;;  %v4031_v41 = vsub.f32 %v3968_v33, %v1808_v53 }
 0x95a   : > { %v1824_v49 = vsel %vm459_vm0, %v4016_v15, -inf  ;;  %v1821_v57 = vsel %vm459_vm0, %v4019_v63, -inf  ;;  %v1818_v61 = vsel %vm459_vm0, %v4022_v28, -inf  ;;  %v1827_v46 = vsel %vm459_vm0, %v4031_v41, -inf }
 0x95b   : > { %1825 = vmax.xlane.f32.xlu1 %v1824_v49  ;;  %1822 = vmax.xlane.f32.xlu0 %v1821_v57 }
 0x95c   : > { %1819 = vmax.xlane.f32.xlu2 %v1818_v61 }
 0x964   : > { %1828 = vmax.xlane.f32.xlu2 %v1827_v46 }
 0x9bc   : > { %v4035_v14 = vpop.xlane.xlu0 %1837  ;;  %v4037_v32 = vpop.xlane.xlu2 %1834 }
 0x9bd   : > { %v1848_v18 = vsub.f32 %v3996_v34, %v4035_v14  ;;  %v4041_v30 = vpop.xlane.xlu1 %1831  ;;  %v1847_v35 = vsub.f32 %v3999_v48, %v4037_v32 }
 0x9be   : > { %v1846_v33 = vsub.f32 %v4002_v50, %v4041_v30 }
 0x9bf   : > { %v1862_v21 = vmul.f32 1.442695, %v1848_v18  ;;  %v1860_v1 = vmul.f32 1.442695, %v1847_v35 }
 0x9c0   : > { %v1858_v58 = vmul.f32 1.442695, %v1846_v33 }
 0x9c1   : > { %2810 = vpow2.f32 %v1862_v21 }
 0x9c2   : > { %2812 = vpow2.f32 %v1858_v58 }
 0x9c3   : > { %2814 = vpow2.f32 %v1860_v1 }
 0x9c5   : > { %v4047_v3 = vpop.xlane.xlu1 %1840 }
 0x9c6   : > { %v1849_v8 = vsub.f32 %v4011_v47, %v4047_v3 }
 0x9c7   : > { %v2811_v22 = vpop.eup %2810 }
 0x9c8   : > { %v2813_v31 = vpop.eup %2812  ;;  %v1864_v37 = vmul.f32 1.442695, %v1849_v8  ;;  %v1884_v54 = vsel %vm459_vm0, %v2811_v22, 0.0 }
 0x9c9   : > { %v2815_v43 = vpop.eup %2814  ;;  %v1878_v39 = vsel %vm459_vm0, %v2813_v31, 0.0  ;;  %1885 = vadd.xlane.f32.xlu2 %v1884_v54 }
 0x9ca   : > { %2816 = vpow2.f32 %v1864_v37  ;;  %1879 = vadd.xlane.f32.xlu0 %v1878_v39  ;;  %v1881_v27 = vsel %vm459_vm0, %v2815_v43, 0.0 }
 0x9cb   : > { %1882 = vadd.xlane.f32.xlu1 %v1881_v27 }
 0x9ce   : > { %v4054_v40 = vpop.xlane.xlu1 %1825  ;;  %v4056_v59 = vpop.xlane.xlu0 %1822 }
 0x9cf   : > { %v1844_v2 = vsub.f32 %v4016_v15, %v4054_v40  ;;  %v1843_v17 = vsub.f32 %v4019_v63, %v4056_v59  ;;  %v4062_v38 = vpop.xlane.xlu2 %1819 }
 0x9d0   : > { %v2817_v24 = vpop.eup %2816  ;;  %v1842_v51 = vsub.f32 %v4022_v28, %v4062_v38 }
 0x9d1   : > { %v1854_v25 = vmul.f32 1.442695, %v1844_v2  ;;  %v1852_v26 = vmul.f32 1.442695, %v1843_v17  ;;  %v1887_v29 = vsel %vm459_vm0, %v2817_v24, 0.0 }
 0x9d2   : > { %v1850_v56 = vmul.f32 1.442695, %v1842_v51  ;;  %1888 = vadd.xlane.f32.xlu0 %v1887_v29 }
 0x9d3   : > { %2818 = vpow2.f32 %v1854_v25 }
 0x9d4   : > { %2820 = vpow2.f32 %v1852_v26 }
 0x9d5   : > { %2822 = vpow2.f32 %v1850_v56 }
 0x9d7   : > { %v4067_v9 = vpop.xlane.xlu2 %1828 }
 0x9d8   : > { %v1845_v13 = vsub.f32 %v4031_v41, %v4067_v9 }
 0x9d9   : > { %v2819_v60 = vpop.eup %2818 }
 0x9da   : > { %v2821_v42 = vpop.eup %2820  ;;  %v1856_v44 = vmul.f32 1.442695, %v1845_v13  ;;  %v1872_v11 = vsel %vm459_vm0, %v2819_v60, 0.0 }
 0x9db   : > { %v2823_v62 = vpop.eup %2822  ;;  %1873 = vadd.xlane.f32.xlu0 %v1872_v11  ;;  %v1869_v12 = vsel %vm459_vm0, %v2821_v42, 0.0 }
 0x9dc   : > { %2824 = vpow2.f32 %v1856_v44  ;;  %1870 = vadd.xlane.f32.xlu2 %v1869_v12  ;;  %v1866_v36 = vsel %vm459_vm0, %v2823_v62, 0.0 }
 0x9dd   : > { %1867 = vadd.xlane.f32.xlu1 %v1866_v36 }
 0x9e2   : > { %v2825_v23 = vpop.eup %2824 }
 0x9e3   : > { %v1875_v0 = vsel %vm459_vm0, %v2825_v23, 0.0  ;;  %v2098_v23 = vld [vmem:[%s4222_s3 + $0x8] sm:$0xff] }
 0x9e5   : > { %1876 = vadd.xlane.f32.xlu1 %v1875_v0 }
 0xa3c   : > { %v1886_v10 = vpop.xlane.xlu2 %1885 }
 0xa3d   : > { %v1880_v55 = vpop.xlane.xlu0 %1879  ;;  %2826 = vlog2.f32 %v1886_v10 }
 0xa3e   : > { %2828 = vlog2.f32 %v1880_v55  ;;  %v1883_v20 = vpop.xlane.xlu1 %1882 }
 0xa3f   : > { %2830 = vlog2.f32 %v1883_v20 }
 0xa43   : > { %v2827_v6 = vpop.eup %2826 }
 0xa44   : > { %v2829_v19 = vpop.eup %2828  ;;  %v1903_v7 = vmul.f32 0.6931472, %v2827_v6 }
 0xa45   : > { %v2831_v16 = vpop.eup %2830  ;;  %v1899_v4 = vmul.f32 0.6931472, %v2829_v19  ;;  %v1889_v52 = vpop.xlane.xlu0 %1888 }
 0xa46   : > { %2832 = vlog2.f32 %v1889_v52  ;;  %v1901_v45 = vmul.f32 0.6931472, %v2831_v16  ;;  %v1912_v49 = vadd.f32 %v1903_v7, %v4035_v14 }
 0xa47   : > { %v1910_v53 = vadd.f32 %v1899_v4, %v4041_v30 }
 0xa48   : > { %v1911_v57 = vadd.f32 %v1901_v45, %v4037_v32  ;;  %v1920_v18 = vsub.f32 %v3996_v34, %v1912_v49 }
 0xa49   : > { %v1918_v46 = vsub.f32 %v4002_v50, %v1910_v53 }
 0xa4a   : > { %v1919_v21 = vsub.f32 %v3999_v48, %v1911_v57  ;;  %v1937_v14 = vsel %vm459_vm0, %v1920_v18, -inf }
 0xa4b   : > { %v1935_v30 = vsel %vm459_vm0, %v1918_v46, -inf }
 0xa4c   : > { %v2833_v61 = vpop.eup %2832  ;;  %v1936_v50 = vsel %vm459_vm0, %v1919_v21, -inf  ;;  %v1938_v22 = vmax.f32 %v1935_v30, %v1937_v14 }
 0xa4d   : > { %v1905_v35 = vmul.f32 0.6931472, %v2833_v61 }
 0xa4e   : > { %v1874_v33 = vpop.xlane.xlu0 %1873 }
 0xa4f   : > { %v1913_v1 = vadd.f32 %v1905_v35, %v4047_v3  ;;  %2834 = vlog2.f32 %v1874_v33  ;;  %v1871_v58 = vpop.xlane.xlu2 %1870 }
 0xa50   : > { %v1868_v8 = vpop.xlane.xlu1 %1867  ;;  %2836 = vlog2.f32 %v1871_v58 }
 0xa51   : > { %v1921_v32 = vsub.f32 %v4011_v47, %v1913_v1  ;;  %2838 = vlog2.f32 %v1868_v8 }
 0xa53   : > { %v1939_v34 = vsel %vm459_vm0, %v1921_v32, -inf }
 0xa54   : > { %v1940_v31 = vmax.f32 %v1936_v50, %v1939_v34 }
 0xa55   : > { %v2835_v48 = vpop.eup %2834 }
 0xa56   : > { %v2837_v37 = vpop.eup %2836  ;;  %v1941_v3 = vmax.f32 %v1938_v22, %v1940_v31  ;;  %v1895_v43 = vmul.f32 0.6931472, %v2835_v48 }
 0xa57   : > { %v2839_v54 = vpop.eup %2838  ;;  %v1893_v24 = vmul.f32 0.6931472, %v2837_v37 }
 0xa58   : > { %v1942_v39 = vrot.slane %v1941_v3, 4  ;;  %v1891_v27 = vmul.f32 0.6931472, %v2839_v54  ;;  %v1877_v2 = vpop.xlane.xlu1 %1876  ;;  %v1908_v47 = vadd.f32 %v1895_v43, %v4054_v40 }
 0xa59   : > { %2840 = vlog2.f32 %v1877_v2  ;;  %v1907_v29 = vadd.f32 %v1893_v24, %v4056_v59  ;;  %v2100_v59 = vld [vmem:[%s4222_s3 + $0x18] sm:$0xff] }
 0xa5a   : > { %v1943_v17 = vmax.f32 %v1941_v3, %v1942_v39  ;;  %v1906_v25 = vadd.f32 %v1891_v27, %v4062_v38  ;;  %v1916_v13 = vsub.f32 %v4016_v15, %v1908_v47  ;;  %v2099_v38 = vld [vmem:[%s4222_s3 + $0x10] sm:$0xff]  ;;  %v2097_v15 = vld [vmem:[%s4222_s3] sm:$0xff] }
 0xa5b   : > { %v1915_v62 = vsub.f32 %v4019_v63, %v1907_v29  ;;  %v2101_v16 = vpack.c.bf16 %v2098_v23, %v2097_v15 }
 0xa5c   : > { %v1944_v51 = vrot.slane %v1943_v17, 2  ;;  %v1914_v42 = vsub.f32 %v4022_v28, %v1906_v25  ;;  %v1924_v40 = vsel %vm459_vm0, %v1916_v13, -inf }
 0xa5d   : > { %v1923_v6 = vsel %vm459_vm0, %v1915_v62, -inf }
 0xa5e   : > { %v1945_v26 = vmax.f32 %v1943_v17, %v1944_v51  ;;  %v1922_v36 = vsel %vm459_vm0, %v1914_v42, -inf }
 0xa5f   : > { %v2841_v56 = vpop.eup %2840  ;;  %v1925_v4 = vmax.f32 %v1922_v36, %v1924_v40 }
 0xa60   : > { %v1946_v60 = vrot.slane %v1945_v26, 1  ;;  %v1897_v44 = vmul.f32 0.6931472, %v2841_v56 }
 0xa62   : > { %v1947_v11 = vmax.f32 %v1945_v26, %v1946_v60  ;;  %v1909_v12 = vadd.f32 %v1897_v44, %v4067_v9  ;;  %v2102_v9 = vpack.c.bf16 %v2100_v59, %v2099_v38 }
 0xa64   : > { %v1954_v28 = vsub.f32 %v1920_v18, %v1947_v11  ;;  %v1917_v63 = vsub.f32 %v4031_v41, %v1909_v12  ;;  %v1955_v0 = vsub.f32 %v1921_v32, %v1947_v11  ;;  %v1952_v10 = vsub.f32 %v1918_v46, %v1947_v11  ;;  %2399 = vmatpush.bf16.msra.mxu3 %v2102_v9 }
 0xa65   : > { %v1953_v55 = vsub.f32 %v1919_v21, %v1947_v11  ;;  %2149 = vmatpush.bf16.msra.mxu0 %v2102_v9 }
 0xa66   : > { %v1968_v20 = vmul.f32 1.442695, %v1954_v28  ;;  %v1926_v19 = vsel %vm459_vm0, %v1917_v63, -inf  ;;  %v1964_v52 = vmul.f32 1.442695, %v1952_v10 }
 0xa67   : > { %v1927_v7 = vmax.f32 %v1923_v6, %v1926_v19  ;;  %v1966_v41 = vmul.f32 1.442695, %v1953_v55  ;;  %v1970_v45 = vmul.f32 1.442695, %v1955_v0 }
 0xa68   : > { %2842 = vpow2.f32 %v1968_v20  ;;  %2400 = vmatpush.bf16.msra.mxu3 %v2101_v16 }
 0xa69   : > { %v1928_v53 = vmax.f32 %v1925_v4, %v1927_v7  ;;  %2844 = vpow2.f32 %v1964_v52  ;;  %2150 = vmatpush.bf16.msra.mxu0 %v2101_v16 }
 0xa6a   : > { %2846 = vpow2.f32 %v1966_v41 }
 0xa6b   : > { %v1929_v49 = vrot.slane %v1928_v53, 4  ;;  %2848 = vpow2.f32 %v1970_v45 }
 0xa6d   : > { %v1930_v57 = vmax.f32 %v1928_v53, %v1929_v49 }
 0xa6e   : > { %v4111_v61 = vpop.eup %2842 }
 0xa6f   : > { %v1931_v46 = vrot.slane %v1930_v57, 2  ;;  %v2845_v18 = vpop.eup %2844  ;;  %v1988_v14 = vsel %vm459_vm0, %v4111_v61, 0.0 }
 0xa70   : > { %v2847_v35 = vpop.eup %2846  ;;  %v1985_v21 = vsel %vm459_vm0, %v2845_v18, 0.0 }
 0xa71   : > { %v1932_v33 = vmax.f32 %v1930_v57, %v1931_v46  ;;  %v1986_v1 = vsel %vm459_vm0, %v2847_v35, 0.0  ;;  %v2849_v58 = vpop.eup %2848 }
 0xa72   : > { %v1987_v30 = vadd.f32 %v1986_v1, %v1985_v21  ;;  %v1990_v34 = vsel %vm459_vm0, %v2849_v58, 0.0 }
 0xa73   : > { %v1933_v8 = vrot.slane %v1932_v33, 1 }
 0xa74   : > { %v1989_v50 = vadd.f32 %v1988_v14, %v1987_v30 }
 0xa75   : > { %v1934_v32 = vmax.f32 %v1932_v33, %v1933_v8 }
 0xa76   : > { %v1991_v31 = vadd.f32 %v1990_v34, %v1989_v50 }
 0xa77   : > { %v1950_v22 = vsub.f32 %v1916_v13, %v1934_v32  ;;  %v1948_v48 = vsub.f32 %v1914_v42, %v1934_v32  ;;  %v1949_v37 = vsub.f32 %v1915_v62, %v1934_v32  ;;  %v1951_v3 = vsub.f32 %v1917_v63, %v1934_v32 }
 0xa78   : > { %v1992_v54 = vrot.slane %v1991_v31, 4 }
 0xa79   : > { %v1956_v43 = vmul.f32 1.442695, %v1948_v48  ;;  %v1958_v39 = vmul.f32 1.442695, %v1949_v37  ;;  %v1960_v27 = vmul.f32 1.442695, %v1950_v22 }
 0xa7a   : > { %v1993_v2 = vadd.f32 %v1992_v54, %v1991_v31  ;;  %v1962_v17 = vmul.f32 1.442695, %v1951_v3 }
 0xa7b   : > { %2850 = vpow2.f32 %v1956_v43  ;;  %v2870_v43 = vmov 0.0  }
 0xa7c   : > { %v1994_v24 = vrot.slane %v1993_v2, 2  ;;  %2852 = vpow2.f32 %v1958_v39  ;;  %v2043_v39 = vsel %vm2038_vm7, 1.0, %v2870_v43 }
 0xa7d   : > { %2854 = vpow2.f32 %v1960_v27 }
 0xa7e   : > { %v1995_v47 = vadd.f32 %v1994_v24, %v1993_v2  ;;  %2856 = vpow2.f32 %v1962_v17 }
 0xa80   : > { %v1996_v51 = vrot.slane %v1995_v47, 1 }
 0xa81   : > { %v4118_v25 = vpop.eup %2850 }
 0xa82   : > { %v1997_v26 = vadd.f32 %v1996_v51, %v1995_v47  ;;  %v4120_v29 = vpop.eup %2852  ;;  %v1972_v56 = vsel %vm459_vm0, %v4118_v25, 0.0 }
 0xa83   : > { %v4124_v13 = vpop.eup %2854  ;;  %v1973_v60 = vsel %vm459_vm0, %v4120_v29, 0.0 }
 0xa84   : > { %2858 = vrcp.f32 %v1997_v26  ;;  %v4128_v42 = vpop.eup %2856  ;;  %v1974_v44 = vadd.f32 %v1973_v60, %v1972_v56  ;;  %v1975_v11 = vsel %vm459_vm0, %v4124_v13, 0.0  ;;  %v2027_v36 = vand.u32 2147483648, %v1997_v26 }
 0xa85   : > { %v1977_v12 = vsel %vm459_vm0, %v4128_v42, 0.0  ;;  %v2025_v23 = vand.u32 2147483647, %v1997_v26  ;;  %vm2021_vm2 = vweird.f32 %v1997_v26 }
 0xa86   : > { %v1976_v62 = vadd.f32 %v1975_v11, %v1974_v44  ;;  %v2028_v55 = vor.u32 1.1754944e-38, %v2027_v36 }
 0xa87   : > { %vm2026_vm4 = vcmp.eq.f32.partialorder %v2025_v23, 8.507059e+37 }
 0xa88   : > { %v1978_v38 = vadd.f32 %v1977_v12, %v1976_v62 }
 0xa8a   : > { %v2859_v40 = vpop.eup %2858  ;;  %v1979_v15 = vrot.slane %v1978_v38, 4 }
 0xa8b   : > { %v2017_v59 = vmul.f32 %v2859_v40, %v1997_v26  ;;  %vm2022_vm1 = vweird.f32 %v2859_v40 }
 0xa8c   : > { %v1980_v63 = vadd.f32 %v1979_v15, %v1978_v38  ;;  %vm2023_vm3 = vmor %vm2021_vm2, %vm2022_vm1  ;;  %v2094_v15 = vld [vmem:[%s4221_s2 + $0x18] sm:$0xff] }
 0xa8d   : > { %v2018_v28 = vsub.f32 1.0, %v2017_v59  ;;  %v2093_v59 = vld [vmem:[%s4221_s2 + $0x10] sm:$0xff] }
 0xa8e   : > { %v1981_v0 = vrot.slane %v1980_v63, 2 }
 0xa8f   : > { %v2019_v9 = vmul.f32 %v2859_v40, %v2018_v28 }
 0xa90   : > { %v1982_v20 = vadd.f32 %v1981_v0, %v1980_v63 }
 0xa91   : > { %v2020_v10 = vadd.f32 %v2859_v40, %v2019_v9 }
 0xa92   : > { %v1983_v16 = vrot.slane %v1982_v20, 1 }
 0xa93   : > { %v2024_v6 = vsel %vm2023_vm3, %v2859_v40, %v2020_v10 }
 0xa94   : > { %v2029_v19 = vsel %vm2026_vm4, %v2028_v55, %v2024_v6  ;;  %v1984_v45 = vadd.f32 %v1983_v16, %v1982_v20  ;;  %v2096_v55 = vpack.c.bf16 %v2094_v15, %v2093_v59 }
 0xa95   : > { %v2030_v4 = vmul.f32 %v2845_v18, %v2029_v19  ;;  %v2031_v7 = vmul.f32 %v2847_v35, %v2029_v19  ;;  %v2032_v52 = vmul.f32 %v4111_v61, %v2029_v19  ;;  %v2033_v41 = vmul.f32 %v2849_v58, %v2029_v19  ;;  %v2091_v61 = vld [vmem:[%s4221_s2] sm:$0xff]  ;;  %v2092_v18 = vld [vmem:[%s4221_s2 + $0x8] sm:$0xff] }
 0xa96   : > { %2860 = vrcp.f32 %v1984_v45  ;;  %v4142_v32 = vpack.c.bf16 %v2092_v18, %v2091_v61  ;;  %v2009_v34 = vand.u32 2147483648, %v1984_v45  ;;  %v2007_v31 = vand.u32 2147483647, %v1984_v45 }
 0xa97   : > { %v2107_v53 = vpack.c.bf16 %v2030_v4, %v2030_v4  ;;  %v2108_v49 = vpack.c.bf16 %v2031_v7, %v2031_v7  ;;  %v2109_v57 = vpack.c.bf16 %v2032_v52, %v2032_v52  ;;  %v2110_v46 = vpack.c.bf16 %v2033_v41, %v2033_v41 }
 0xa98   : > { %vm2003_vm6 = vweird.f32 %v1984_v45  ;;  %v2010_v37 = vor.u32 1.1754944e-38, %v2009_v34  ;;  %vm2008_vm9 = vcmp.eq.f32.partialorder %v2007_v31, 8.507059e+37  ;;  %v2048_v47 = vsel %vm459_vm0, %v2030_v4, 0.0 }
 0xa99   : > { %v2123_v33 = vunpack.c.l.b16 %v2107_v53  ;;  %v2124_v21 = vunpack.c.l.b16 %v2108_v49  ;;  %v2125_v1 = vunpack.c.l.b16 %v2109_v57  ;;  %v2126_v8 = vunpack.c.l.b16 %v2110_v46 }
 0xa9a   : > { %v2057_v51 = vsel %vm459_vm0, %v2033_v41, 0.0  ;;  %v2054_v5 = vsel %vm459_vm0, %v2032_v52, 0.0  ;;  %v2051_v26 = vsel %vm459_vm0, %v2031_v7, 0.0 }
 0xa9b   : > { %v2129_v30 = vpack.c.b16 %v2124_v21, %v2123_v33  ;;  %v2130_v14 = vpack.c.b16 %v2126_v8, %v2125_v1 }
 0xa9c   : > { %v2861_v35 = vpop.eup %2860 }
 0xa9d   : > { %2390 = vmatmul.msk.bf16.vlgmr.msra.gmra.mxu3 %vm459_vm0, %v2129_v30  ;;  %2228 = vmatpush.bf16.msra.mxu2 %v2130_v14  ;;  %v1999_v58 = vmul.f32 %v2861_v35, %v1984_v45  ;;  %vm2004_vm5 = vweird.f32 %v2861_v35 }
 0xa9e   : > { %vm2005_vm8 = vmor %vm2003_vm6, %vm2004_vm5 }
 0xa9f   : > { %v2000_v50 = vsub.f32 1.0, %v1999_v58 }
 0xaa1   : > { %2229 = vmatpush.bf16.msra.mxu2 %v2129_v30  ;;  %v2001_v22 = vmul.f32 %v2861_v35, %v2000_v50 }
 0xaa3   : > { %v2002_v48 = vadd.f32 %v2861_v35, %v2001_v22 }
 0xaa4   : > { %2394 = vmatmul.msk.bf16.vlgmr.msra.gmra.mxu2 %vm459_vm0, %v4142_v32 }
 0xaa5   : > { %v2006_v3 = vsel %vm2005_vm8, %v2861_v35, %v2002_v48 }
 0xaa6   : > { %v2011_v54 = vsel %vm2008_vm9, %v2010_v37, %v2006_v3 }
 0xaa7   : > { %v2012_v27 = vmul.f32 %v4118_v25, %v2011_v54  ;;  %v2013_v2 = vmul.f32 %v4120_v29, %v2011_v54  ;;  %v2014_v17 = vmul.f32 %v4124_v13, %v2011_v54  ;;  %v2015_v24 = vmul.f32 %v4128_v42, %v2011_v54 }
 0xaa9   : > { %v2103_v56 = vpack.c.bf16 %v2012_v27, %v2012_v27  ;;  %v2104_v60 = vpack.c.bf16 %v2013_v2, %v2013_v2  ;;  %v2105_v44 = vpack.c.bf16 %v2014_v17, %v2014_v17  ;;  %v2106_v11 = vpack.c.bf16 %v2015_v24, %v2015_v24 }
 0xaaa   : > { %v2047_v25 = vsel %vm459_vm0, %v2012_v27, 0.0  ;;  %v2056_v29 = vsel %vm459_vm0, %v2015_v24, 0.0  ;;  %v2053_v13 = vsel %vm459_vm0, %v2014_v17, 0.0  ;;  %v2050_v42 = vsel %vm459_vm0, %v2013_v2, 0.0 }
 0xaab   : > { %v2119_v62 = vunpack.c.l.b16 %v2103_v56  ;;  %v2120_v12 = vunpack.c.l.b16 %v2104_v60  ;;  %v2121_v40 = vunpack.c.l.b16 %v2105_v44  ;;  %v2122_v38 = vunpack.c.l.b16 %v2106_v11 }
 0xaac   : > { %v2049_v28 = vadd.f32 %v2048_v47, %v2047_v25  ;;  %v2058_v36 = vadd.f32 %v2057_v51, %v2056_v29  ;;  %v2055_v63 = vadd.f32 %v2054_v5, %v2053_v13  ;;  %v2052_v9 = vadd.f32 %v2051_v26, %v2050_v42 }
 0xaad   : > { %2391 = vmatmul.msk.bf16.gmra.mxu3 %vm459_vm0, %v2130_v14  ;;  %v2127_v23 = vpack.c.b16 %v2120_v12, %v2119_v62  ;;  %v2128_v0 = vpack.c.b16 %v2122_v38, %v2121_v40 }
 0xaae   : > { %v2059_v10 = vmul.f32 %v2049_v28, %v2043_v39  ;;  %v2061_v20 = vmul.f32 0.0, %v2055_v63  ;;  %v2060_v6 = vmul.f32 %v2052_v9, %v2043_v39  ;;  %v2062_v16 = vmul.f32 0.0, %v2058_v36 }
 0xaaf   : > { %2388 = vmatmul.msk.bf16.vlgmr.msra.gmra.mxu0 %vm459_vm0, %v2127_v23  ;;  %2186 = vmatpush.bf16.msra.mxu1 %v2128_v0 }
 0xab0   : > { %v2063_v19 = vsel %vm459_vm0, %v2059_v10, 0.0  ;;  %v4169_v4 = vsel %vm459_vm0, %v2060_v6, 0.0  ;;  %v2069_v52 = vsel %vm459_vm0, %v2061_v20, 0.0  ;;  %v2072_v45 = vsel %vm459_vm0, %v2062_v16, 0.0 }
 0xab1   : > { %2064 = vadd.xlane.f32.xlu1 %v2063_v19  ;;  %v2080_v7 = vadd.f32 %v4169_v4, %v2063_v19 }
 0xab3   : > { %2187 = vmatpush.bf16.msra.mxu1 %v2127_v23  ;;  %v2081_v41 = vadd.f32 %v2080_v7, %v2069_v52 }
 0xab4   : > { %2395 = vmatmul.msk.bf16.gmra.mxu2 %vm459_vm0, %v2096_v55 }
 0xab5   : > { %v2082_v53 = vadd.f32 %v2081_v41, %v2072_v45 }
 0xab6   : > { %2392 = vmatmul.msk.bf16.vlgmr.msra.gmra.mxu1 %vm459_vm0, %v4142_v32 }
 0xab7   : > { %v2083_v49 = vrot.slane %v2082_v53, 4 }
 0xab9   : > { %2073 = vadd.xlane.f32.xlu1 %v2072_v45  ;;  %v2084_v57 = vadd.f32 %v2083_v49, %v2082_v53 }
 0xabb   : > { %v2085_v46 = vrot.slane %v2084_v57, 2 }
 0xabd   : > { %v2086_v33 = vadd.f32 %v2085_v46, %v2084_v57 }
 0xabf   : > { %2389 = vmatmul.msk.bf16.gmra.mxu0 %vm459_vm0, %v2128_v0  ;;  %v2087_v21 = vrot.slane %v2086_v33, 1 }
 0xac1   : > { %v2088_v1 = vadd.f32 %v2087_v21, %v2086_v33 }
 0xac3   : > { %2090 = vst.msk [vmem:[%s220_s9] sm:$0x1] %vm2089_vm10, %v2088_v1 }
 0xac6   : > { %2393 = vmatmul.msk.bf16.gmra.mxu1 %vm459_vm0, %v2096_v55 }
 0xb20   : > { %v2162_v8 = vpop.f32.mrf.mxu3 }
 0xb24   : > { %v2065_v30 = vpop.xlane.xlu1 %2064 }
 0xb25   : > { %2076 = vst.msk [vmem:[%s4192_s13] sm:$0xff] %vm2075_vm11, %v2065_v30 }
 0xb27   : > { %v2231_v14 = vpop.f32.mrf.mxu2 }
 0xb28   : > { %v2164_v61 = vpop.f32.mrf.mxu3  ;;  %v2241_v48 = vmul.f32 %v2231_v14, %v2162_v8 }
 0xb2a   : > { %v2245_v43 = vsel %vm459_vm0, %v2241_v48, 0.0 }
 0xb2c   : > { %v2074_v18 = vpop.xlane.xlu1 %2073  ;;  %v2152_v35 = vpop.f32.mrf.mxu0 }
 0xb2d   : > { %2079 = vst.msk [vmem:[%s4192_s13 + $0x18] sm:$0xff] %vm2075_vm11, %v2074_v18 }
 0xb2f   : > { %v2233_v58 = vpop.f32.mrf.mxu2 }
 0xb30   : > { %v2167_v32 = vpop.f32.mrf.mxu3  ;;  %v2242_v22 = vmul.f32 %v2233_v58, %v2164_v61 }
 0xb32   : > { %v2246_v3 = vsel %vm459_vm0, %v2242_v22, 0.0 }
 0xb33   : > { %v2189_v50 = vpop.f32.mrf.mxu1  ;;  %v2247_v27 = vadd.f32 %v2246_v3, %v2245_v43 }
 0xb34   : > { %v2154_v31 = vpop.f32.mrf.mxu0  ;;  %v2199_v44 = vmul.f32 %v2189_v50, %v2152_v35 }
 0xb36   : > { %v2203_v29 = vsel %vm459_vm0, %v2199_v44, 0.0 }
 0xb37   : > { %v2236_v34 = vpop.f32.mrf.mxu2 }
 0xb38   : > { %v2243_v37 = vmul.f32 %v2236_v34, %v2167_v32  ;;  %v2169_v2 = vpop.f32.mrf.mxu3 }
 0xb3a   : > { %v2248_v39 = vsel %vm459_vm0, %v2243_v37, 0.0 }
 0xb3b   : > { %v2191_v54 = vpop.f32.mrf.mxu1  ;;  %v2249_v47 = vadd.f32 %v2248_v39, %v2247_v27 }
 0xb3c   : > { %v2157_v5 = vpop.f32.mrf.mxu0  ;;  %v2200_v60 = vmul.f32 %v2191_v54, %v2154_v31 }
 0xb3e   : > { %v2204_v25 = vsel %vm459_vm0, %v2200_v60, 0.0 }
 0xb3f   : > { %v2238_v17 = vpop.f32.mrf.mxu2  ;;  %v2205_v42 = vadd.f32 %v2204_v25, %v2203_v29 }
 0xb40   : > { %v2244_v24 = vmul.f32 %v2238_v17, %v2169_v2 }
 0xb42   : > { %v2250_v51 = vsel %vm459_vm0, %v2244_v24, 0.0 }
 0xb43   : > { %v2251_v26 = vadd.f32 %v2250_v51, %v2249_v47  ;;  %v2194_v56 = vpop.f32.mrf.mxu1 }
 0xb44   : > { %v2201_v11 = vmul.f32 %v2194_v56, %v2157_v5  ;;  %v2159_v62 = vpop.f32.mrf.mxu0 }
 0xb45   : > { %2252 = vadd.xlane.f32.xlu0 %v2251_v26 }
 0xb46   : > { %v2206_v13 = vsel %vm459_vm0, %v2201_v11, 0.0 }
 0xb47   : > { %v2207_v38 = vadd.f32 %v2206_v13, %v2205_v42 }
 0xb4b   : > { %v2196_v12 = vpop.f32.mrf.mxu1 }
 0xb4c   : > { %v2202_v40 = vmul.f32 %v2196_v12, %v2159_v62 }
 0xb4d   : > { %2070 = vadd.xlane.f32.xlu0 %v2069_v52 }
 0xb4e   : > { %v2208_v59 = vsel %vm459_vm0, %v2202_v40, 0.0 }
 0xb4f   : > { %v2209_v15 = vadd.f32 %v2208_v59, %v2207_v38 }
 0xb51   : > { %2210 = vadd.xlane.f32.xlu2 %v2209_v15 }
 0xb59   : > { %2067 = vadd.xlane.f32.xlu2 %v4169_v4 }
 0xbb8   : > { %v2253_v28 = vpop.xlane.xlu0 %2252 }
 0xbb9   : > { %v2254_v36 = vrot.slane %v2253_v28, 4 }
 0xbbb   : > { %v2255_v9 = vadd.f32 %v2254_v36, %v2253_v28 }
 0xbbd   : > { %v2256_v23 = vrot.slane %v2255_v9, 2 }
 0xbbf   : > { %v2257_v20 = vadd.f32 %v2256_v23, %v2255_v9 }
 0xbc0   : > { %v2071_v63 = vpop.xlane.xlu0 %2070 }
 0xbc1   : > { %2078 = vst.msk [vmem:[%s4192_s13 + $0x10] sm:$0xff] %vm2075_vm11, %v2071_v63  ;;  %v2258_v7 = vrot.slane %v2257_v20, 1 }
 0xbc3   : > { %v2259_v41 = vadd.f32 %v2258_v7, %v2257_v20 }
 0xbc4   : > { %v2211_v0 = vpop.xlane.xlu2 %2210 }
 0xbc5   : > { %v2212_v10 = vrot.slane %v2211_v0, 4 }
 0xbc7   : > { %v2213_v55 = vadd.f32 %v2212_v10, %v2211_v0 }
 0xbc9   : > { %v2214_v6 = vrot.slane %v2213_v55, 2 }
 0xbcb   : > { %v2215_v19 = vadd.f32 %v2214_v6, %v2213_v55 }
 0xbcc   : > { %v2068_v16 = vpop.xlane.xlu2 %2067 }
 0xbcd   : > { %2077 = vst.msk [vmem:[%s4192_s13 + $0x8] sm:$0xff] %vm2075_vm11, %v2068_v16  ;;  %v2216_v52 = vrot.slane %v2215_v19, 1 }
 0xbcf   : > { %v2217_v4 = vadd.f32 %v2216_v52, %v2215_v19 }
 0xbd1   : > { %2401 = vpush %v2217_v4 }
 0xbd2   : > { %2403 = vpush %v2259_v41 }
 0xc02   : > { %s2402_s14 = spop %2401 }
 0xc03   : > { %s2404_s15 = spop %2403 }
 0xc04   : > { %s2261_s19 = sadd.f32 %s2404_s15, %s2402_s14 }
 0xc06   : > { %v2262_v45 = vstv %s2261_s19 }
 0xc07   : > { %2263 = vst.msk [vmem:[%s223_s18] sm:$0x1] %vm2089_vm10, %v2262_v45 }
 0xc08 PF: > { %s18_s23 = sadd.s32 1, %s2868_s23  }
 0xc09   : > { %p15_p4 = scmp.ge.s32.totalorder %s18_s23, 4  }
 0xc0b   :  { %17 = sbr.rel (!%p15_p4) target bundleno = 2 (0x2), region = 83 }

</bundles_post_ra>
